<compile_context>
chip_gen: v7x
topology: tpu7x:2x2x1
jax: 0.10.0
libtpu: 0.0.40
codegen_flags: <defaults>
</compile_context>

<pallas_src>
import functools

import jax
import jax.numpy as jnp
from jax.experimental import pallas as pl
from jax.experimental.pallas import tpu as pltpu

_TM = 256  # rows per grid step; always a multiple of 8.


def _round_up(x, m):
    return (x + m - 1) // m * m


# ----------------------------------------------------------------------------
# Pallas kernels
# ----------------------------------------------------------------------------
def _dense_kernel(a_ref, w_ref, b_ref, o_ref, *, relu):
    """out = maybe_relu(a @ w + b); a/w are bf16, accumulate in f32 on the MXU."""
    acc = jnp.dot(a_ref[...], w_ref[...], preferred_element_type=jnp.float32)
    acc = acc + b_ref[...]
    if relu:
        acc = jnp.maximum(acc, 0.0)
    o_ref[...] = acc.astype(o_ref.dtype)


def _mlp_kernel(a_ref, w1_ref, b1_ref, w2_ref, b2_ref, o_ref):
    """Fused fc1(+relu) -> fc2; the hidden activation never leaves VMEM."""
    h = jnp.dot(a_ref[...], w1_ref[...], preferred_element_type=jnp.float32)
    h = jnp.maximum(h + b1_ref[...], 0.0)
    out = jnp.dot(h.astype(jnp.bfloat16), w2_ref[...],
                  preferred_element_type=jnp.float32)
    o_ref[...] = (out + b2_ref[...]).astype(o_ref.dtype)


# ----------------------------------------------------------------------------
# Kernel wrappers: pad M to a tile multiple, pad K to the (pre-padded) weight,
# cast activations to bf16, launch an M-parallel grid.
# ----------------------------------------------------------------------------
def _pad_and_tile(a, k_target):
    m, k = a.shape
    tm = min(_TM, _round_up(m, 8))
    mp = _round_up(m, tm)
    a = a.astype(jnp.bfloat16)
    if (mp, k_target) != (m, k):
        a = jnp.pad(a, ((0, mp - m), (0, k_target - k)))
    return a, tm, mp


def dense(a, w, b, *, relu, out_dtype):
    m = a.shape[0]
    kp, n = w.shape
    a, tm, mp = _pad_and_tile(a, kp)
    out = pl.pallas_call(
        functools.partial(_dense_kernel, relu=relu),
        out_shape=jax.ShapeDtypeStruct((mp, n), out_dtype),
        grid=(mp // tm,),
        in_specs=[
            pl.BlockSpec((tm, kp), lambda i: (i, 0)),
            pl.BlockSpec((kp, n), lambda i: (0, 0)),
            pl.BlockSpec((1, n), lambda i: (0, 0)),
        ],
        out_specs=pl.BlockSpec((tm, n), lambda i: (i, 0)),
        compiler_params=pltpu.CompilerParams(dimension_semantics=("parallel",)),
    )(a, w, b)
    return out[:m] if mp != m else out


def fused_mlp(a, w1, b1, w2, b2):
    m = a.shape[0]
    kp, hdim = w1.shape
    _, n = w2.shape
    a, tm, mp = _pad_and_tile(a, kp)
    out = pl.pallas_call(
        _mlp_kernel,
        out_shape=jax.ShapeDtypeStruct((mp, n), jnp.float32),
        grid=(mp // tm,),
        in_specs=[
            pl.BlockSpec((tm, kp), lambda i: (i, 0)),
            pl.BlockSpec((kp, hdim), lambda i: (0, 0)),
            pl.BlockSpec((1, hdim), lambda i: (0, 0)),
            pl.BlockSpec((hdim, n), lambda i: (0, 0)),
            pl.BlockSpec((1, n), lambda i: (0, 0)),
        ],
        out_specs=pl.BlockSpec((tm, n), lambda i: (i, 0)),
        compiler_params=pltpu.CompilerParams(dimension_semantics=("parallel",)),
    )(a, w1, b1, w2, b2)
    return out[:m] if mp != m else out


# ----------------------------------------------------------------------------
# im2col glue (plain JAX, bf16) + conv wrapper calling the Pallas dense kernel.
# ----------------------------------------------------------------------------
def im2col(x_nhwc, kh, kw, stride):
    n, h, w, c = x_nhwc.shape
    oh = (h - kh) // stride + 1
    ow = (w - kw) // stride + 1
    cols = []
    for i in range(kh):
        for j in range(kw):
            cols.append(x_nhwc[:, i:i + stride * oh:stride,
                               j:j + stride * ow:stride, :])
    # feature order = (kh, kw, cin) with cin fastest — matches the weight reshape.
    patches = jnp.concatenate(cols, axis=-1)
    return patches.reshape(n * oh * ow, kh * kw * c), oh, ow


def conv2d_relu(x_nhwc, w_mat, b, *, kh, kw, stride):
    a, oh, ow = im2col(x_nhwc, kh, kw, stride)
    y = dense(a, w_mat, b, relu=True, out_dtype=jnp.bfloat16)
    return y.reshape(x_nhwc.shape[0], oh, ow, -1)


# ----------------------------------------------------------------------------
# Parameters (deterministic, PyTorch-style uniform(-1/sqrt(fan_in), 1/sqrt(fan_in)))
# ----------------------------------------------------------------------------
def init_params(key, num_frame, num_action):
    def uni(k, shape, fan_in):
        bound = 1.0 / float(fan_in) ** 0.5
        return jax.random.uniform(k, shape, jnp.float32, -bound, bound)

    ks = jax.random.split(key, 10)
    p = {}
    p["w1"] = uni(ks[0], (32, num_frame, 8, 8), num_frame * 8 * 8)
    p["b1"] = uni(ks[1], (32,), num_frame * 8 * 8)
    p["w2"] = uni(ks[2], (64, 32, 4, 4), 32 * 4 * 4)
    p["b2"] = uni(ks[3], (64,), 32 * 4 * 4)
    p["w3"] = uni(ks[4], (64, 64, 3, 3), 64 * 3 * 3)
    p["b3"] = uni(ks[5], (64,), 64 * 3 * 3)
    p["fw1"] = uni(ks[6], (64 * 7 * 7, 512), 64 * 7 * 7)
    p["fb1"] = uni(ks[7], (512,), 64 * 7 * 7)
    p["fw2"] = uni(ks[8], (512, num_action), 512)
    p["fb2"] = uni(ks[9], (num_action,), 512)
    return p


def prepare_params(params):
    """One-time host-side prep: matmul layout, /255 folded into w1, K padded to
    multiples of 128, fc1 rows permuted to NHWC flatten order, weights in bf16."""
    def conv_mat(w, scale=1.0):
        cout, cin, kh, kw = w.shape
        m = jnp.transpose(w.astype(jnp.float32) * scale,
                          (2, 3, 1, 0)).reshape(kh * kw * cin, cout)
        kpad = _round_up(m.shape[0], 128) - m.shape[0]
        if kpad:
            m = jnp.pad(m, ((0, kpad), (0, 0)))
        return m.astype(jnp.bfloat16)

    # fc1 rows are in torch (C, H, W) flatten order; permute to (H, W, C) so the
    # NHWC conv3 output can be flattened with a plain reshape (no transpose).
    fw1 = params["fw1"].astype(jnp.float32).reshape(64, 7, 7, 512)
    fw1 = jnp.transpose(fw1, (1, 2, 0, 3)).reshape(64 * 7 * 7, 512)
    kpad = _round_up(fw1.shape[0], 128) - fw1.shape[0]
    fw1 = jnp.pad(fw1, ((0, kpad), (0, 0))).astype(jnp.bfloat16)

    return {
        "w1": conv_mat(params["w1"], scale=1.0 / 255.0),   # x/255 folded in
        "b1": params["b1"].reshape(1, -1).astype(jnp.float32),
        "w2": conv_mat(params["w2"]),
        "b2": params["b2"].reshape(1, -1).astype(jnp.float32),
        "w3": conv_mat(params["w3"]),
        "b3": params["b3"].reshape(1, -1).astype(jnp.float32),
        "fw1": fw1,
        "fb1": params["fb1"].reshape(1, -1).astype(jnp.float32),
        "fw2": params["fw2"].astype(jnp.bfloat16),
        "fb2": params["fb2"].reshape(1, -1).astype(jnp.float32),
    }


# ----------------------------------------------------------------------------
# Forward: (x/255 folded into w1) -> conv1..3 + relu -> fused fc1+relu+fc2
# ----------------------------------------------------------------------------
def q_network_forward(prepped, x_nchw):
    x = jnp.transpose(x_nchw, (0, 2, 3, 1)).astype(jnp.bfloat16)       # NHWC
    h = conv2d_relu(x, prepped["w1"], prepped["b1"], kh=8, kw=8, stride=4)
    h = conv2d_relu(h, prepped["w2"], prepped["b2"], kh=4, kw=4, stride=2)
    h = conv2d_relu(h, prepped["w3"], prepped["b3"], kh=3, kw=3, stride=1)
    h = h.reshape(h.shape[0], -1)          # NHWC flatten; fw1 rows pre-permuted
    return fused_mlp(h, prepped["fw1"], prepped["fb1"],
                     prepped["fw2"], prepped["fb2"])


if __name__ == "__main__":
    num_frame, num_action, batch = 4, 6, 2
    key = jax.random.PRNGKey(0)
    pkey, xkey = jax.random.split(key)

    params = init_params(pkey, num_frame, num_action)
    prepped = prepare_params(params)

    # 84x84 spatial is required by the fc1 dimension (64*7*7) baked into the module.
    x = jax.random.uniform(xkey, (batch, num_frame, 84, 84),
                           jnp.float32, 0.0, 255.0)

    fwd = jax.jit(q_network_forward)
    q = jax.block_until_ready(fwd(prepped, x))

    assert q.shape == (batch, num_action), q.shape
    assert bool(jnp.all(jnp.isfinite(q)))
    print("KERNEL_OK")
</pallas_src>

<mosaic_0001>
module attributes {stable_mosaic.version = 11 : i64} {
  func.func @_dense_kernel(%arg0: i32, %arg1: memref<256x256xbf16, #tpu.memory_space<vmem>>, %arg2: memref<256x32xbf16, #tpu.memory_space<vmem>>, %arg3: memref<1x32xf32, #tpu.memory_space<vmem>>, %arg4: memref<256x32xbf16, #tpu.memory_space<vmem>>) attributes {dimension_semantics = [#tpu.dimension_semantics<parallel>], iteration_bounds = array<i64: 4>, scalar_prefetch = 0 : i64, scratch_operands = 0 : i64, tpu.core_type = #tpu.core_type<tc>, window_params = [{transform_indices = @transform_0, window_bounds = array<i64: 256, 256>}, {pipeline_mode = #tpu.pipeline_mode<synchronous>, transform_indices = @transform_1, window_bounds = array<i64: 256, 32>}, {pipeline_mode = #tpu.pipeline_mode<synchronous>, transform_indices = @transform_2, window_bounds = array<i64: 1, 32>}, {transform_indices = @transform_3, window_bounds = array<i64: 256, 32>}]} {
    %c0 = arith.constant 0 : index
    %c0_0 = arith.constant 0 : index
    %0 = vector.load %arg1[%c0, %c0_0] : memref<256x256xbf16, #tpu.memory_space<vmem>>, vector<256x256xbf16>
    %c0_1 = arith.constant 0 : index
    %c0_2 = arith.constant 0 : index
    %1 = vector.load %arg2[%c0_1, %c0_2] : memref<256x32xbf16, #tpu.memory_space<vmem>>, vector<256x32xbf16>
    %cst = arith.constant dense<0.000000e+00> : vector<256x32xf32>
    %2 = tpu.matmul %0, %1, %cst {dimension_numbers = #tpu.dot_dimension_numbers<[1], [0], [0], [1], [0, 0, 1, 1], [], []>} : vector<256x256xbf16>, vector<256x32xbf16>, vector<256x32xf32> -> vector<256x32xf32>
    %c0_3 = arith.constant 0 : index
    %c0_4 = arith.constant 0 : index
    %3 = vector.load %arg3[%c0_3, %c0_4] : memref<1x32xf32, #tpu.memory_space<vmem>>, vector<1x32xf32>
    %4 = vector.broadcast %3 : vector<1x32xf32> to vector<256x32xf32>
    %5 = arith.addf %2, %4 : vector<256x32xf32>
    %cst_5 = arith.constant 0.000000e+00 : f32
    %6 = vector.broadcast %cst_5 : f32 to vector<256x32xf32>
    %7 = arith.maximumf %5, %6 : vector<256x32xf32>
    %8 = arith.truncf %7 : vector<256x32xf32> to vector<256x32xbf16>
    %c0_6 = arith.constant 0 : index
    %c0_7 = arith.constant 0 : index
    %9 = vector.load %arg4[%c0_6, %c0_7] : memref<256x32xbf16, #tpu.memory_space<vmem>>, vector<256x32xbf16>
    tpu.vector_store %arg4[%c0_6, %c0_7], %8 {strides = array<i32>} : memref<256x32xbf16, #tpu.memory_space<vmem>>, vector<256x32xbf16>,
    return
  }
  func.func @transform_0(%arg0: i32) -> (i32, i32) {
    %c0_i32 = arith.constant 0 : i32
    %c0_i32_0 = arith.constant 0 : i32
    return %arg0, %c0_i32 : i32, i32
  }
  func.func @transform_1(%arg0: i32) -> (i32, i32) {
    %c0_i32 = arith.constant 0 : i32
    %c0_i32_0 = arith.constant 0 : i32
    %c0_i32_1 = arith.constant 0 : i32
    return %c0_i32, %c0_i32_0 : i32, i32
  }
  func.func @transform_2(%arg0: i32) -> (i32, i32) {
    %c0_i32 = arith.constant 0 : i32
    %c0_i32_0 = arith.constant 0 : i32
    %c0_i32_1 = arith.constant 0 : i32
    return %c0_i32, %c0_i32_0 : i32, i32
  }
  func.func @transform_3(%arg0: i32) -> (i32, i32) {
    %c0_i32 = arith.constant 0 : i32
    %c0_i32_0 = arith.constant 0 : i32
    return %arg0, %c0_i32 : i32, i32
  }
}

module attributes {stable_mosaic.version = 11 : i64} {
  func.func @_dense_kernel(%arg0: i32, %arg1: memref<168x512xbf16, #tpu.memory_space<vmem>>, %arg2: memref<512x64xbf16, #tpu.memory_space<vmem>>, %arg3: memref<1x64xf32, #tpu.memory_space<vmem>>, %arg4: memref<168x64xbf16, #tpu.memory_space<vmem>>) attributes {dimension_semantics = [#tpu.dimension_semantics<parallel>], iteration_bounds = array<i64: 1>, scalar_prefetch = 0 : i64, scratch_operands = 0 : i64, tpu.core_type = #tpu.core_type<tc>, window_params = [{transform_indices = @transform_0, window_bounds = array<i64: 168, 512>}, {pipeline_mode = #tpu.pipeline_mode<synchronous>, transform_indices = @transform_1, window_bounds = array<i64: 512, 64>}, {pipeline_mode = #tpu.pipeline_mode<synchronous>, transform_indices = @transform_2, window_bounds = array<i64: 1, 64>}, {transform_indices = @transform_3, window_bounds = array<i64: 168, 64>}]} {
    %c0 = arith.constant 0 : index
    %c0_0 = arith.constant 0 : index
    %0 = vector.load %arg1[%c0, %c0_0] : memref<168x512xbf16, #tpu.memory_space<vmem>>, vector<168x512xbf16>
    %c0_1 = arith.constant 0 : index
    %c0_2 = arith.constant 0 : index
    %1 = vector.load %arg2[%c0_1, %c0_2] : memref<512x64xbf16, #tpu.memory_space<vmem>>, vector<512x64xbf16>
    %cst = arith.constant dense<0.000000e+00> : vector<168x64xf32>
    %2 = tpu.matmul %0, %1, %cst {dimension_numbers = #tpu.dot_dimension_numbers<[1], [0], [0], [1], [0, 0, 1, 1], [], []>} : vector<168x512xbf16>, vector<512x64xbf16>, vector<168x64xf32> -> vector<168x64xf32>
    %c0_3 = arith.constant 0 : index
    %c0_4 = arith.constant 0 : index
    %3 = vector.load %arg3[%c0_3, %c0_4] : memref<1x64xf32, #tpu.memory_space<vmem>>, vector<1x64xf32>
    %4 = vector.broadcast %3 : vector<1x64xf32> to vector<168x64xf32>
    %5 = arith.addf %2, %4 : vector<168x64xf32>
    %cst_5 = arith.constant 0.000000e+00 : f32
    %6 = vector.broadcast %cst_5 : f32 to vector<168x64xf32>
    %7 = arith.maximumf %5, %6 : vector<168x64xf32>
    %8 = arith.truncf %7 : vector<168x64xf32> to vector<168x64xbf16>
    %c0_6 = arith.constant 0 : index
    %c0_7 = arith.constant 0 : index
    %9 = vector.load %arg4[%c0_6, %c0_7] : memref<168x64xbf16, #tpu.memory_space<vmem>>, vector<168x64xbf16>
    tpu.vector_store %arg4[%c0_6, %c0_7], %8 {strides = array<i32>} : memref<168x64xbf16, #tpu.memory_space<vmem>>, vector<168x64xbf16>,
    return
  }
  func.func @transform_0(%arg0: i32) -> (i32, i32) {
    %c0_i32 = arith.constant 0 : i32
    %c0_i32_0 = arith.constant 0 : i32
    return %arg0, %c0_i32 : i32, i32
  }
  func.func @transform_1(%arg0: i32) -> (i32, i32) {
    %c0_i32 = arith.constant 0 : i32
    %c0_i32_0 = arith.constant 0 : i32
    %c0_i32_1 = arith.constant 0 : i32
    return %c0_i32, %c0_i32_0 : i32, i32
  }
  func.func @transform_2(%arg0: i32) -> (i32, i32) {
    %c0_i32 = arith.constant 0 : i32
    %c0_i32_0 = arith.constant 0 : i32
    %c0_i32_1 = arith.constant 0 : i32
    return %c0_i32, %c0_i32_0 : i32, i32
  }
  func.func @transform_3(%arg0: i32) -> (i32, i32) {
    %c0_i32 = arith.constant 0 : i32
    %c0_i32_0 = arith.constant 0 : i32
    return %arg0, %c0_i32 : i32, i32
  }
}

module attributes {stable_mosaic.version = 11 : i64} {
  func.func @_dense_kernel(%arg0: i32, %arg1: memref<104x640xbf16, #tpu.memory_space<vmem>>, %arg2: memref<640x64xbf16, #tpu.memory_space<vmem>>, %arg3: memref<1x64xf32, #tpu.memory_space<vmem>>, %arg4: memref<104x64xbf16, #tpu.memory_space<vmem>>) attributes {dimension_semantics = [#tpu.dimension_semantics<parallel>], iteration_bounds = array<i64: 1>, scalar_prefetch = 0 : i64, scratch_operands = 0 : i64, tpu.core_type = #tpu.core_type<tc>, window_params = [{transform_indices = @transform_0, window_bounds = array<i64: 104, 640>}, {pipeline_mode = #tpu.pipeline_mode<synchronous>, transform_indices = @transform_1, window_bounds = array<i64: 640, 64>}, {pipeline_mode = #tpu.pipeline_mode<synchronous>, transform_indices = @transform_2, window_bounds = array<i64: 1, 64>}, {transform_indices = @transform_3, window_bounds = array<i64: 104, 64>}]} {
    %c0 = arith.constant 0 : index
    %c0_0 = arith.constant 0 : index
    %0 = vector.load %arg1[%c0, %c0_0] : memref<104x640xbf16, #tpu.memory_space<vmem>>, vector<104x640xbf16>
    %c0_1 = arith.constant 0 : index
    %c0_2 = arith.constant 0 : index
    %1 = vector.load %arg2[%c0_1, %c0_2] : memref<640x64xbf16, #tpu.memory_space<vmem>>, vector<640x64xbf16>
    %cst = arith.constant dense<0.000000e+00> : vector<104x64xf32>
    %2 = tpu.matmul %0, %1, %cst {dimension_numbers = #tpu.dot_dimension_numbers<[1], [0], [0], [1], [0, 0, 1, 1], [], []>} : vector<104x640xbf16>, vector<640x64xbf16>, vector<104x64xf32> -> vector<104x64xf32>
    %c0_3 = arith.constant 0 : index
    %c0_4 = arith.constant 0 : index
    %3 = vector.load %arg3[%c0_3, %c0_4] : memref<1x64xf32, #tpu.memory_space<vmem>>, vector<1x64xf32>
    %4 = vector.broadcast %3 : vector<1x64xf32> to vector<104x64xf32>
    %5 = arith.addf %2, %4 : vector<104x64xf32>
    %cst_5 = arith.constant 0.000000e+00 : f32
    %6 = vector.broadcast %cst_5 : f32 to vector<104x64xf32>
    %7 = arith.maximumf %5, %6 : vector<104x64xf32>
    %8 = arith.truncf %7 : vector<104x64xf32> to vector<104x64xbf16>
    %c0_6 = arith.constant 0 : index
    %c0_7 = arith.constant 0 : index
    %9 = vector.load %arg4[%c0_6, %c0_7] : memref<104x64xbf16, #tpu.memory_space<vmem>>, vector<104x64xbf16>
    tpu.vector_store %arg4[%c0_6, %c0_7], %8 {strides = array<i32>} : memref<104x64xbf16, #tpu.memory_space<vmem>>, vector<104x64xbf16>,
    return
  }
  func.func @transform_0(%arg0: i32) -> (i32, i32) {
    %c0_i32 = arith.constant 0 : i32
    %c0_i32_0 = arith.constant 0 : i32
    return %arg0, %c0_i32 : i32, i32
  }
  func.func @transform_1(%arg0: i32) -> (i32, i32) {
    %c0_i32 = arith.constant 0 : i32
    %c0_i32_0 = arith.constant 0 : i32
    %c0_i32_1 = arith.constant 0 : i32
    return %c0_i32, %c0_i32_0 : i32, i32
  }
  func.func @transform_2(%arg0: i32) -> (i32, i32) {
    %c0_i32 = arith.constant 0 : i32
    %c0_i32_0 = arith.constant 0 : i32
    %c0_i32_1 = arith.constant 0 : i32
    return %c0_i32, %c0_i32_0 : i32, i32
  }
  func.func @transform_3(%arg0: i32) -> (i32, i32) {
    %c0_i32 = arith.constant 0 : i32
    %c0_i32_0 = arith.constant 0 : i32
    return %arg0, %c0_i32 : i32, i32
  }
}

module attributes {stable_mosaic.version = 11 : i64} {
  func.func @_mlp_kernel(%arg0: i32, %arg1: memref<8x3200xbf16, #tpu.memory_space<vmem>>, %arg2: memref<3200x512xbf16, #tpu.memory_space<vmem>>, %arg3: memref<1x512xf32, #tpu.memory_space<vmem>>, %arg4: memref<512x6xbf16, #tpu.memory_space<vmem>>, %arg5: memref<1x6xf32, #tpu.memory_space<vmem>>, %arg6: memref<8x6xf32, #tpu.memory_space<vmem>>) attributes {dimension_semantics = [#tpu.dimension_semantics<parallel>], iteration_bounds = array<i64: 1>, scalar_prefetch = 0 : i64, scratch_operands = 0 : i64, tpu.core_type = #tpu.core_type<tc>, window_params = [{transform_indices = @transform_0, window_bounds = array<i64: 8, 3200>}, {pipeline_mode = #tpu.pipeline_mode<synchronous>, transform_indices = @transform_1, window_bounds = array<i64: 3200, 512>}, {pipeline_mode = #tpu.pipeline_mode<synchronous>, transform_indices = @transform_2, window_bounds = array<i64: 1, 512>}, {pipeline_mode = #tpu.pipeline_mode<synchronous>, transform_indices = @transform_3, window_bounds = array<i64: 512, 6>}, {pipeline_mode = #tpu.pipeline_mode<synchronous>, transform_indices = @transform_4, window_bounds = array<i64: 1, 6>}, {transform_indices = @transform_5, window_bounds = array<i64: 8, 6>}]} {
    %c0 = arith.constant 0 : index
    %c0_0 = arith.constant 0 : index
    %0 = vector.load %arg1[%c0, %c0_0] : memref<8x3200xbf16, #tpu.memory_space<vmem>>, vector<8x3200xbf16>
    %c0_1 = arith.constant 0 : index
    %c0_2 = arith.constant 0 : index
    %1 = vector.load %arg2[%c0_1, %c0_2] : memref<3200x512xbf16, #tpu.memory_space<vmem>>, vector<3200x512xbf16>
    %cst = arith.constant dense<0.000000e+00> : vector<8x512xf32>
    %2 = tpu.matmul %0, %1, %cst {dimension_numbers = #tpu.dot_dimension_numbers<[1], [0], [0], [1], [0, 0, 1, 1], [], []>} : vector<8x3200xbf16>, vector<3200x512xbf16>, vector<8x512xf32> -> vector<8x512xf32>
    %c0_3 = arith.constant 0 : index
    %c0_4 = arith.constant 0 : index
    %3 = vector.load %arg3[%c0_3, %c0_4] : memref<1x512xf32, #tpu.memory_space<vmem>>, vector<1x512xf32>
    %4 = vector.broadcast %3 : vector<1x512xf32> to vector<8x512xf32>
    %5 = arith.addf %2, %4 : vector<8x512xf32>
    %cst_5 = arith.constant 0.000000e+00 : f32
    %6 = vector.broadcast %cst_5 : f32 to vector<8x512xf32>
    %7 = arith.maximumf %5, %6 : vector<8x512xf32>
    %8 = arith.truncf %7 : vector<8x512xf32> to vector<8x512xbf16>
    %c0_6 = arith.constant 0 : index
    %c0_7 = arith.constant 0 : index
    %9 = vector.load %arg4[%c0_6, %c0_7] : memref<512x6xbf16, #tpu.memory_space<vmem>>, vector<512x6xbf16>
    %cst_8 = arith.constant dense<0.000000e+00> : vector<8x6xf32>
    %10 = tpu.matmul %8, %9, %cst_8 {dimension_numbers = #tpu.dot_dimension_numbers<[1], [0], [0], [1], [0, 0, 1, 1], [], []>} : vector<8x512xbf16>, vector<512x6xbf16>, vector<8x6xf32> -> vector<8x6xf32>
    %c0_9 = arith.constant 0 : index
    %c0_10 = arith.constant 0 : index
    %11 = vector.load %arg5[%c0_9, %c0_10] : memref<1x6xf32, #tpu.memory_space<vmem>>, vector<1x6xf32>
    %12 = vector.broadcast %11 : vector<1x6xf32> to vector<8x6xf32>
    %13 = arith.addf %10, %12 : vector<8x6xf32>
    %c0_11 = arith.constant 0 : index
    %c0_12 = arith.constant 0 : index
    %14 = vector.load %arg6[%c0_11, %c0_12] : memref<8x6xf32, #tpu.memory_space<vmem>>, vector<8x6xf32>
    tpu.vector_store %arg6[%c0_11, %c0_12], %13 {strides = array<i32>} : memref<8x6xf32, #tpu.memory_space<vmem>>, vector<8x6xf32>,
    return
  }
  func.func @transform_0(%arg0: i32) -> (i32, i32) {
    %c0_i32 = arith.constant 0 : i32
    %c0_i32_0 = arith.constant 0 : i32
    return %arg0, %c0_i32 : i32, i32
  }
  func.func @transform_1(%arg0: i32) -> (i32, i32) {
    %c0_i32 = arith.constant 0 : i32
    %c0_i32_0 = arith.constant 0 : i32
    %c0_i32_1 = arith.constant 0 : i32
    return %c0_i32, %c0_i32_0 : i32, i32
  }
  func.func @transform_2(%arg0: i32) -> (i32, i32) {
    %c0_i32 = arith.constant 0 : i32
    %c0_i32_0 = arith.constant 0 : i32
    %c0_i32_1 = arith.constant 0 : i32
    return %c0_i32, %c0_i32_0 : i32, i32
  }
  func.func @transform_3(%arg0: i32) -> (i32, i32) {
    %c0_i32 = arith.constant 0 : i32
    %c0_i32_0 = arith.constant 0 : i32
    %c0_i32_1 = arith.constant 0 : i32
    return %c0_i32, %c0_i32_0 : i32, i32
  }
  func.func @transform_4(%arg0: i32) -> (i32, i32) {
    %c0_i32 = arith.constant 0 : i32
    %c0_i32_0 = arith.constant 0 : i32
    %c0_i32_1 = arith.constant 0 : i32
    return %c0_i32, %c0_i32_0 : i32, i32
  }
  func.func @transform_5(%arg0: i32) -> (i32, i32) {
    %c0_i32 = arith.constant 0 : i32
    %c0_i32_0 = arith.constant 0 : i32
    return %arg0, %c0_i32 : i32, i32
  }
}

</mosaic_0001>

<bundles_post_ra>
// kernel: q_network_forward.4
= control target key start
LH: loop header
LB: loop body
LE: loop exit
PB: predicated region body
PF: predicated region fallthrough
CT: control target
= control target key end

     0   :  { %s1269_s12 = smov 0   ;;  %s1475_s0 = inlined_call_operand.vmem [shape: bf16[1024,256], index: 0, kind: input, shape index: {}]   ;;  %s1476_s1 = inlined_call_operand.vmem [shape: bf16[256,32], index: 1, kind: input, shape index: {}]   ;;  %s1477_s2 = inlined_call_operand.vmem [shape: f32[1,32], index: 2, kind: input, shape index: {}]   ;;  %s1478_s3 = inlined_call_operand.vmem [shape: bf16[1024,32], index: 3, kind: output, shape index: {}]  }
   0x1 LB: > { %s915_s13 = sadd.s32 4294967295, %s1247_s12   ;;  %p919_p0 = scmp.ge.s32.totalorder %s1247_s12, 1  ;;  %s1247_s12 = sphi %s1269_s12, %s13_s12  }
   0x2   : > { %p139_p1 = scmp.lt.s32.totalorder %s1247_s12, 5 }
   0x4   : > { %p140_p2 = pnand %p919_p0, %p139_p1 }
   0x5   : > { %v1177_v0 = vld [vmem:[%s1476_s1 + $0x40] sm:$0xff] (!%p140_p2)   ;;  %s920_s16 = sshll.u32 (!%p140_p2), %s915_s13, 5  ;;  %v1179_v2 = vld [vmem:[%s1476_s1 + $0x48] sm:$0xff] (!%p140_p2)   ;;  %v1181_v4 = vld [vmem:[%s1476_s1 + $0x50] sm:$0xff] (!%p140_p2)   ;;  %vm826_vm0 = vcmask (!%p140_p2), 257024  }
   0x6   : > { %143 = sbr.rel (%p140_p2) target bundleno = 318 (0x13e), region = 32  ;;  %v1178_v1 = vld [vmem:[%s1476_s1] sm:$0xff] (!%p140_p2)   ;;  %1041 = vmatprep.subr.bf16.mxu0 (!%p140_p2), %v1177_v0  ;;  %1153 = vmatprep.subr.bf16.mxu1 (!%p140_p2), %v1177_v0  ;;  %v1180_v3 = vld [vmem:[%s1476_s1 + $0x8] sm:$0xff] (!%p140_p2)   ;;  %p165_p3 = scmp.lt.s32.totalorder (!%p140_p2), %s920_s16, 127  ;;  %v1182_v5 = vld [vmem:[%s1476_s1 + $0x10] sm:$0xff] (!%p140_p2)  }
   0x7   : > { %1042 = vmatpush3.bf16.msra.mxu0 (!%p140_p2), %v1178_v1  ;;  %1161 = vmatpush3.bf16.msra.mxu1 (!%p140_p2), %v1178_v1  ;;  %v1183_v6 = vld [vmem:[%s1476_s1 + $0x58] sm:$0xff] (!%p140_p2)   ;;  %v1185_v8 = vld [vmem:[%s1476_s1 + $0x60] sm:$0xff] (!%p140_p2)   ;;  %v1187_v10 = vld [vmem:[%s1476_s1 + $0x68] sm:$0xff] (!%p140_p2)  }
   0x8   : > { %1043 = vmatprep.subr.bf16.mxu0 (!%p140_p2), %v1179_v2  ;;  %1154 = vmatprep.subr.bf16.mxu1 (!%p140_p2), %v1179_v2  ;;  %v1184_v7 = vld [vmem:[%s1476_s1 + $0x18] sm:$0xff] (!%p140_p2)   ;;  %v1186_v9 = vld [vmem:[%s1476_s1 + $0x20] sm:$0xff] (!%p140_p2)   ;;  %v1188_v13 = vld [vmem:[%s1476_s1 + $0x28] sm:$0xff] (!%p140_p2)  }
   0x9   : > { %v1189_v14 = vld [vmem:[%s1476_s1 + $0x70] sm:$0xff] (!%p140_p2)   ;;  %v1191_v16 = vld [vmem:[%s1476_s1 + $0x78] sm:$0xff] (!%p140_p2)   ;;  %v1368_v50 = vld [vmem:[%s1477_s2] ss:$0 sm:$0xff] (!%p140_p2) }
   0xa   : > { %v1190_v15 = vld [vmem:[%s1476_s1 + $0x30] sm:$0xff] (!%p140_p2)   ;;  %v1192_v17 = vld [vmem:[%s1476_s1 + $0x38] sm:$0xff] (!%p140_p2)  }
   0xb   : > { %1044 = vmatpush3.bf16.msra.mxu0 (!%p140_p2), %v1180_v3  ;;  %1162 = vmatpush3.bf16.msra.mxu1 (!%p140_p2), %v1180_v3 }
   0xc   : > { %1045 = vmatprep.subr.bf16.mxu0 (!%p140_p2), %v1181_v4  ;;  %1155 = vmatprep.subr.bf16.mxu1 (!%p140_p2), %v1181_v4 }
   0xd   : > { %s1480_s16 = smov (!%p165_p3, %s920_s16), 127 }
   0xe   : > { %s1008_s4 = sshll.u32 %s1480_s16, 3  ;;  %s924_s28 = sshll.u32 %s1480_s16, 2 }
   0xf   : > { %1046 = vmatpush3.bf16.msra.mxu0 %v1182_v5  ;;  %1163 = vmatpush3.bf16.msra.mxu1 %v1182_v5  ;;  %s1310_s9 = scalar_lea.vmem %s1475_s0, %s1008_s4  ;;  %s1378_s4 = scalar_lea.vmem %s1478_s3, %s924_s28 }
  0x10   : > { %1047 = vmatprep.subr.bf16.mxu0 %v1183_v6  ;;  %1156 = vmatprep.subr.bf16.mxu1 %v1183_v6  ;;  %v1195_v11 = vld [vmem:[%s1310_s9 + $0x4] ss:$8 sps:$4 sm:$0xff]   ;;  %v1193_v18 = vld [vmem:[%s1310_s9] ss:$8 sps:$4 sm:$0xff]   ;;  %v1199_v20 = vld [vmem:[%s1310_s9 + $0x14] ss:$8 sps:$4 sm:$0xff]  }
  0x11   : > { %v1198_v12 = vld [vmem:[%s1310_s9 + $0x84] ss:$8 sps:$4 sm:$0xff]   ;;  %537 = vmatprep.mubr.bf16.mxu0 %v1195_v11  ;;  %v1196_v19 = vld [vmem:[%s1310_s9 + $0x80] ss:$8 sps:$4 sm:$0xff]   ;;  %v1201_v21 = vld [vmem:[%s1310_s9 + $0x94] ss:$8 sps:$4 sm:$0xff]  }
  0x12   : > { %601 = vmatprep.mubr.bf16.mxu1 %v1198_v12  ;;  %v1203_v22 = vld [vmem:[%s1310_s9 + $0x10] ss:$8 sps:$4 sm:$0xff]   ;;  %v1205_v24 = vld [vmem:[%s1310_s9 + $0x24] ss:$8 sps:$4 sm:$0xff]   ;;  %v1209_v26 = vld [vmem:[%s1310_s9 + $0x20] ss:$8 sps:$4 sm:$0xff]  }
  0x13   : > { %1048 = vmatpush3.bf16.msra.mxu0 %v1184_v7  ;;  %1164 = vmatpush3.bf16.msra.mxu1 %v1184_v7  ;;  %v1204_v23 = vld [vmem:[%s1310_s9 + $0x90] ss:$8 sps:$4 sm:$0xff]   ;;  %v1207_v25 = vld [vmem:[%s1310_s9 + $0xa4] ss:$8 sps:$4 sm:$0xff]   ;;  %v1210_v27 = vld [vmem:[%s1310_s9 + $0xa0] ss:$8 sps:$4 sm:$0xff]  }
  0x14   : > { %1049 = vmatprep.subr.bf16.mxu0 %v1185_v8  ;;  %1157 = vmatprep.subr.bf16.mxu1 %v1185_v8  ;;  %v1211_v28 = vld [vmem:[%s1310_s9 + $0x34] ss:$8 sps:$4 sm:$0xff]   ;;  %v1215_v30 = vld [vmem:[%s1310_s9 + $0x30] ss:$8 sps:$4 sm:$0xff]   ;;  %v1217_v32 = vld [vmem:[%s1310_s9 + $0x44] ss:$8 sps:$4 sm:$0xff]  }
  0x15   : > { %v1213_v29 = vld [vmem:[%s1310_s9 + $0xb4] ss:$8 sps:$4 sm:$0xff]   ;;  %v1216_v31 = vld [vmem:[%s1310_s9 + $0xb0] ss:$8 sps:$4 sm:$0xff]   ;;  %v1219_v33 = vld [vmem:[%s1310_s9 + $0xc4] ss:$8 sps:$4 sm:$0xff]  }
  0x16   : > { %v1221_v34 = vld [vmem:[%s1310_s9 + $0x40] ss:$8 sps:$4 sm:$0xff]   ;;  %v1223_v36 = vld [vmem:[%s1310_s9 + $0x54] ss:$8 sps:$4 sm:$0xff]   ;;  %v1227_v38 = vld [vmem:[%s1310_s9 + $0x50] ss:$8 sps:$4 sm:$0xff]  }
  0x17   : > { %1050 = vmatpush3.bf16.msra.mxu0 %v1186_v9  ;;  %1165 = vmatpush3.bf16.msra.mxu1 %v1186_v9  ;;  %v1222_v35 = vld [vmem:[%s1310_s9 + $0xc0] ss:$8 sps:$4 sm:$0xff]   ;;  %v1225_v37 = vld [vmem:[%s1310_s9 + $0xd4] ss:$8 sps:$4 sm:$0xff]   ;;  %v1228_v39 = vld [vmem:[%s1310_s9 + $0xd0] ss:$8 sps:$4 sm:$0xff]  }
  0x18   : > { %1051 = vmatprep.subr.bf16.mxu0 %v1187_v10  ;;  %1158 = vmatprep.subr.bf16.mxu1 %v1187_v10  ;;  %v1229_v40 = vld [vmem:[%s1310_s9 + $0x64] ss:$8 sps:$4 sm:$0xff]   ;;  %v1233_v42 = vld [vmem:[%s1310_s9 + $0x60] ss:$8 sps:$4 sm:$0xff]   ;;  %v1235_v44 = vld [vmem:[%s1310_s9 + $0x74] ss:$8 sps:$4 sm:$0xff]  }
  0x19   : > { %v1231_v41 = vld [vmem:[%s1310_s9 + $0xe4] ss:$8 sps:$4 sm:$0xff]   ;;  %v1234_v43 = vld [vmem:[%s1310_s9 + $0xe0] ss:$8 sps:$4 sm:$0xff]   ;;  %v1237_v45 = vld [vmem:[%s1310_s9 + $0xf4] ss:$8 sps:$4 sm:$0xff]  }
  0x1a   : > { %v1239_v46 = vld [vmem:[%s1310_s9 + $0x70] ss:$8 sps:$4 sm:$0xff]  }
  0x1b   : > { %1052 = vmatpush3.bf16.msra.mxu0 %v1188_v13  ;;  %1166 = vmatpush3.bf16.msra.mxu1 %v1188_v13  ;;  %v1240_v47 = vld [vmem:[%s1310_s9 + $0xf0] ss:$8 sps:$4 sm:$0xff]  }
  0x1c   : > { %1053 = vmatprep.subr.bf16.mxu0 %v1189_v14  ;;  %1159 = vmatprep.subr.bf16.mxu1 %v1189_v14 }
  0x1f   : > { %1054 = vmatpush3.bf16.msra.mxu0 %v1190_v15  ;;  %1167 = vmatpush3.bf16.msra.mxu1 %v1190_v15 }
  0x20   : > { %1055 = vmatprep.subr.bf16.mxu0 %v1191_v16  ;;  %1160 = vmatprep.subr.bf16.mxu1 %v1191_v16 }
  0x23   : > { %1056 = vmatpush3.bf16.msra.mxu0 %v1192_v17  ;;  %1168 = vmatpush3.bf16.msra.mxu1 %v1192_v17 }
  0x26   : > { %538 = vmatmul.mubr.bf16.vlgmr.msra.gmra.mrb[0].mxu0 %v1193_v18  ;;  %602 = vmatmul.mubr.bf16.vlgmr.msra.gmra.mrb[0].mxu1 %v1196_v19 }
  0x27   : > { %545 = vmatprep.mubr.bf16.mxu0 %v1199_v20  ;;  %609 = vmatprep.mubr.bf16.mxu1 %v1201_v21 }
  0x2e   : > { %546 = vmatmul.mubr.bf16.gmra.mrb[4].mxu0 %v1203_v22  ;;  %610 = vmatmul.mubr.bf16.gmra.mrb[4].mxu1 %v1204_v23 }
  0x2f   : > { %553 = vmatprep.mubr.bf16.mxu0 %v1205_v24  ;;  %617 = vmatprep.mubr.bf16.mxu1 %v1207_v25 }
  0x36   : > { %554 = vmatmul.mubr.bf16.gmra.mrb[8].mxu0 %v1209_v26  ;;  %618 = vmatmul.mubr.bf16.gmra.mrb[8].mxu1 %v1210_v27 }
  0x37   : > { %561 = vmatprep.mubr.bf16.mxu0 %v1211_v28  ;;  %625 = vmatprep.mubr.bf16.mxu1 %v1213_v29 }
  0x3e   : > { %562 = vmatmul.mubr.bf16.gmra.mrb[12].mxu0 %v1215_v30  ;;  %626 = vmatmul.mubr.bf16.gmra.mrb[12].mxu1 %v1216_v31 }
  0x3f   : > { %569 = vmatprep.mubr.bf16.mxu0 %v1217_v32  ;;  %633 = vmatprep.mubr.bf16.mxu1 %v1219_v33 }
  0x46   : > { %570 = vmatmul.mubr.bf16.gmra.mrb[16].mxu0 %v1221_v34  ;;  %634 = vmatmul.mubr.bf16.gmra.mrb[16].mxu1 %v1222_v35 }
  0x47   : > { %577 = vmatprep.mubr.bf16.mxu0 %v1223_v36  ;;  %641 = vmatprep.mubr.bf16.mxu1 %v1225_v37 }
  0x4e   : > { %578 = vmatmul.mubr.bf16.gmra.mrb[20].mxu0 %v1227_v38  ;;  %642 = vmatmul.mubr.bf16.gmra.mrb[20].mxu1 %v1228_v39 }
  0x4f   : > { %585 = vmatprep.mubr.bf16.mxu0 %v1229_v40  ;;  %649 = vmatprep.mubr.bf16.mxu1 %v1231_v41 }
  0x56   : > { %586 = vmatmul.mubr.bf16.gmra.mrb[24].mxu0 %v1233_v42  ;;  %650 = vmatmul.mubr.bf16.gmra.mrb[24].mxu1 %v1234_v43 }
  0x57   : > { %593 = vmatprep.mubr.bf16.mxu0 %v1235_v44  ;;  %657 = vmatprep.mubr.bf16.mxu1 %v1237_v45 }
  0x5e   : > { %594 = vmatmul.mubr.bf16.gmra.mrb[28].mxu0 %v1239_v46  ;;  %658 = vmatmul.mubr.bf16.gmra.mrb[28].mxu1 %v1240_v47 }
  0xf9   : > { %v1057_v48 = vpop.f32.mrb[0].mxu0  ;;  %v1105_v49 = vpop.f32.mrb[0].mxu1 }
  0xfa   : > { %v1058_v51 = vpop.f32.mrb[1].mxu0  ;;  %v1106_v52 = vpop.f32.mrb[1].mxu1 }
  0xfb   : > { %v1059_v53 = vadd.f32 %v1058_v51, %v1057_v48  ;;  %v1107_v54 = vadd.f32 %v1106_v52, %v1105_v49  ;;  %v1060_v55 = vpop.f32.mrb[2].mxu0  ;;  %v1108_v56 = vpop.f32.mrb[2].mxu1 }
  0xfc   : > { %v1061_v57 = vpop.f32.mrb[3].mxu0  ;;  %v1109_v58 = vpop.f32.mrb[3].mxu1 }
  0xfd   : > { %v540_v59 = vadd.f32 %v1059_v53, %v1368_v50  ;;  %v604_v60 = vadd.f32 %v1107_v54, %v1368_v50  ;;  %v1062_v61 = vadd.f32 %v1061_v57, %v1060_v55  ;;  %v1110_v62 = vadd.f32 %v1109_v58, %v1108_v56 }
  0xff   : > { %v666_v63 = vmax.f32 %v540_v59, 0.0  ;;  %v682_v0 = vmax.f32 %v604_v60, 0.0  ;;  %v543_v1 = vadd.f32 %v1062_v61, %v1368_v50  ;;  %v607_v2 = vadd.f32 %v1110_v62, %v1368_v50 }
 0x101   : > { %v1009_v3 = vpack.c.bf16 %v666_v63, %v666_v63  ;;  %v1025_v4 = vpack.c.bf16 %v682_v0, %v682_v0  ;;  %v667_v5 = vmax.f32 %v543_v1, 0.0  ;;  %v683_v6 = vmax.f32 %v607_v2, 0.0  ;;  %v1063_v7 = vpop.f32.mrb[4].mxu0  ;;  %v1111_v8 = vpop.f32.mrb[4].mxu1 }
 0x102   : > { %v1064_v9 = vpop.f32.mrb[5].mxu0  ;;  %v1112_v10 = vpop.f32.mrb[5].mxu1 }
 0x103   : > { %827 = vst.msk [vmem:[%s1378_s4] sm:$0xf] %vm826_vm0, %v1009_v3  ;;  %843 = vst.msk [vmem:[%s1378_s4 + $0x40] sm:$0xf] %vm826_vm0, %v1025_v4  ;;  %v1010_v11 = vpack.c.bf16 %v667_v5, %v667_v5  ;;  %v1026_v12 = vpack.c.bf16 %v683_v6, %v683_v6  ;;  %v1065_v13 = vadd.f32 %v1064_v9, %v1063_v7  ;;  %v1066_v15 = vpop.f32.mrb[6].mxu0  ;;  %v1114_v16 = vpop.f32.mrb[6].mxu1 }
 0x104   : > { %v1113_v14 = vadd.f32 %v1112_v10, %v1111_v8  ;;  %v1067_v17 = vpop.f32.mrb[7].mxu0  ;;  %v1115_v18 = vpop.f32.mrb[7].mxu1 }
 0x105   : > { %828 = vst.msk [vmem:[%s1378_s4 + $0x4] sm:$0xf] %vm826_vm0, %v1010_v11  ;;  %844 = vst.msk [vmem:[%s1378_s4 + $0x44] sm:$0xf] %vm826_vm0, %v1026_v12  ;;  %v548_v19 = vadd.f32 %v1065_v13, %v1368_v50  ;;  %v1068_v21 = vadd.f32 %v1067_v17, %v1066_v15  ;;  %v1116_v22 = vadd.f32 %v1115_v18, %v1114_v16 }
 0x106   : > { %v612_v20 = vadd.f32 %v1113_v14, %v1368_v50 }
 0x107   : > { %v668_v23 = vmax.f32 %v548_v19, 0.0  ;;  %v551_v25 = vadd.f32 %v1068_v21, %v1368_v50  ;;  %v615_v26 = vadd.f32 %v1116_v22, %v1368_v50 }
 0x108   : > { %v684_v24 = vmax.f32 %v612_v20, 0.0 }
 0x109   : > { %v1011_v27 = vpack.c.bf16 %v668_v23, %v668_v23  ;;  %v669_v29 = vmax.f32 %v551_v25, 0.0  ;;  %v685_v30 = vmax.f32 %v615_v26, 0.0  ;;  %v1069_v31 = vpop.f32.mrb[8].mxu0  ;;  %v1117_v32 = vpop.f32.mrb[8].mxu1 }
 0x10a   : > { %v1027_v28 = vpack.c.bf16 %v684_v24, %v684_v24  ;;  %v1070_v33 = vpop.f32.mrb[9].mxu0  ;;  %v1118_v34 = vpop.f32.mrb[9].mxu1 }
 0x10b   : > { %829 = vst.msk [vmem:[%s1378_s4 + $0x8] sm:$0xf] %vm826_vm0, %v1011_v27  ;;  %v1012_v35 = vpack.c.bf16 %v669_v29, %v669_v29  ;;  %v1028_v36 = vpack.c.bf16 %v685_v30, %v685_v30  ;;  %v1071_v37 = vadd.f32 %v1070_v33, %v1069_v31  ;;  %v1119_v38 = vadd.f32 %v1118_v34, %v1117_v32  ;;  %v1072_v39 = vpop.f32.mrb[10].mxu0  ;;  %v1120_v40 = vpop.f32.mrb[10].mxu1 }
 0x10c   : > { %845 = vst.msk [vmem:[%s1378_s4 + $0x48] sm:$0xf] %vm826_vm0, %v1027_v28  ;;  %v1073_v41 = vpop.f32.mrb[11].mxu0  ;;  %v1121_v42 = vpop.f32.mrb[11].mxu1 }
 0x10d   : > { %830 = vst.msk [vmem:[%s1378_s4 + $0xc] sm:$0xf] %vm826_vm0, %v1012_v35  ;;  %846 = vst.msk [vmem:[%s1378_s4 + $0x4c] sm:$0xf] %vm826_vm0, %v1028_v36  ;;  %v556_v43 = vadd.f32 %v1071_v37, %v1368_v50  ;;  %v620_v44 = vadd.f32 %v1119_v38, %v1368_v50  ;;  %v1074_v45 = vadd.f32 %v1073_v41, %v1072_v39 }
 0x10e   : > { %v1122_v46 = vadd.f32 %v1121_v42, %v1120_v40 }
 0x10f   : > { %v670_v47 = vmax.f32 %v556_v43, 0.0  ;;  %v686_v48 = vmax.f32 %v620_v44, 0.0  ;;  %v559_v49 = vadd.f32 %v1074_v45, %v1368_v50 }
 0x110   : > { %v623_v51 = vadd.f32 %v1122_v46, %v1368_v50 }
 0x111   : > { %v1013_v52 = vpack.c.bf16 %v670_v47, %v670_v47  ;;  %v1029_v53 = vpack.c.bf16 %v686_v48, %v686_v48  ;;  %v671_v54 = vmax.f32 %v559_v49, 0.0  ;;  %v1075_v56 = vpop.f32.mrb[12].mxu0  ;;  %v1123_v57 = vpop.f32.mrb[12].mxu1 }
 0x112   : > { %v687_v55 = vmax.f32 %v623_v51, 0.0  ;;  %v1076_v58 = vpop.f32.mrb[13].mxu0  ;;  %v1124_v59 = vpop.f32.mrb[13].mxu1 }
 0x113   : > { %831 = vst.msk [vmem:[%s1378_s4 + $0x10] sm:$0xf] %vm826_vm0, %v1013_v52  ;;  %847 = vst.msk [vmem:[%s1378_s4 + $0x50] sm:$0xf] %vm826_vm0, %v1029_v53  ;;  %v1014_v60 = vpack.c.bf16 %v671_v54, %v671_v54  ;;  %v1077_v62 = vadd.f32 %v1076_v58, %v1075_v56  ;;  %v1125_v63 = vadd.f32 %v1124_v59, %v1123_v57  ;;  %v1078_v0 = vpop.f32.mrb[14].mxu0  ;;  %v1126_v1 = vpop.f32.mrb[14].mxu1 }
 0x114   : > { %v1030_v61 = vpack.c.bf16 %v687_v55, %v687_v55  ;;  %v1079_v2 = vpop.f32.mrb[15].mxu0  ;;  %v1127_v3 = vpop.f32.mrb[15].mxu1 }
 0x115   : > { %832 = vst.msk [vmem:[%s1378_s4 + $0x14] sm:$0xf] %vm826_vm0, %v1014_v60  ;;  %v564_v4 = vadd.f32 %v1077_v62, %v1368_v50  ;;  %v628_v5 = vadd.f32 %v1125_v63, %v1368_v50  ;;  %v1080_v6 = vadd.f32 %v1079_v2, %v1078_v0  ;;  %v1128_v7 = vadd.f32 %v1127_v3, %v1126_v1 }
 0x116   : > { %848 = vst.msk [vmem:[%s1378_s4 + $0x54] sm:$0xf] %vm826_vm0, %v1030_v61 }
 0x117   : > { %v672_v8 = vmax.f32 %v564_v4, 0.0  ;;  %v688_v9 = vmax.f32 %v628_v5, 0.0  ;;  %v567_v10 = vadd.f32 %v1080_v6, %v1368_v50  ;;  %v631_v11 = vadd.f32 %v1128_v7, %v1368_v50 }
 0x119   : > { %v1015_v12 = vpack.c.bf16 %v672_v8, %v672_v8  ;;  %v1031_v13 = vpack.c.bf16 %v688_v9, %v688_v9  ;;  %v673_v14 = vmax.f32 %v567_v10, 0.0  ;;  %v689_v15 = vmax.f32 %v631_v11, 0.0  ;;  %v1081_v16 = vpop.f32.mrb[16].mxu0  ;;  %v1129_v17 = vpop.f32.mrb[16].mxu1 }
 0x11a   : > { %v1082_v18 = vpop.f32.mrb[17].mxu0  ;;  %v1130_v19 = vpop.f32.mrb[17].mxu1 }
 0x11b   : > { %833 = vst.msk [vmem:[%s1378_s4 + $0x18] sm:$0xf] %vm826_vm0, %v1015_v12  ;;  %849 = vst.msk [vmem:[%s1378_s4 + $0x58] sm:$0xf] %vm826_vm0, %v1031_v13  ;;  %v1016_v20 = vpack.c.bf16 %v673_v14, %v673_v14  ;;  %v1032_v21 = vpack.c.bf16 %v689_v15, %v689_v15  ;;  %v1083_v22 = vadd.f32 %v1082_v18, %v1081_v16  ;;  %v1084_v24 = vpop.f32.mrb[18].mxu0  ;;  %v1132_v25 = vpop.f32.mrb[18].mxu1 }
 0x11c   : > { %v1131_v23 = vadd.f32 %v1130_v19, %v1129_v17  ;;  %v1085_v26 = vpop.f32.mrb[19].mxu0  ;;  %v1133_v27 = vpop.f32.mrb[19].mxu1 }
 0x11d   : > { %834 = vst.msk [vmem:[%s1378_s4 + $0x1c] sm:$0xf] %vm826_vm0, %v1016_v20  ;;  %850 = vst.msk [vmem:[%s1378_s4 + $0x5c] sm:$0xf] %vm826_vm0, %v1032_v21  ;;  %v572_v28 = vadd.f32 %v1083_v22, %v1368_v50  ;;  %v1086_v30 = vadd.f32 %v1085_v26, %v1084_v24  ;;  %v1134_v31 = vadd.f32 %v1133_v27, %v1132_v25 }
 0x11e   : > { %v636_v29 = vadd.f32 %v1131_v23, %v1368_v50 }
 0x11f   : > { %v674_v32 = vmax.f32 %v572_v28, 0.0  ;;  %v575_v34 = vadd.f32 %v1086_v30, %v1368_v50  ;;  %v639_v35 = vadd.f32 %v1134_v31, %v1368_v50 }
 0x120   : > { %v690_v33 = vmax.f32 %v636_v29, 0.0 }
 0x121   : > { %v1017_v36 = vpack.c.bf16 %v674_v32, %v674_v32  ;;  %v675_v38 = vmax.f32 %v575_v34, 0.0  ;;  %v691_v39 = vmax.f32 %v639_v35, 0.0  ;;  %v1087_v40 = vpop.f32.mrb[20].mxu0  ;;  %v1135_v41 = vpop.f32.mrb[20].mxu1 }
 0x122   : > { %v1033_v37 = vpack.c.bf16 %v690_v33, %v690_v33  ;;  %v1088_v42 = vpop.f32.mrb[21].mxu0  ;;  %v1136_v43 = vpop.f32.mrb[21].mxu1 }
 0x123   : > { %835 = vst.msk [vmem:[%s1378_s4 + $0x20] sm:$0xf] %vm826_vm0, %v1017_v36  ;;  %v1018_v44 = vpack.c.bf16 %v675_v38, %v675_v38  ;;  %v1034_v45 = vpack.c.bf16 %v691_v39, %v691_v39  ;;  %v1089_v46 = vadd.f32 %v1088_v42, %v1087_v40  ;;  %v1137_v47 = vadd.f32 %v1136_v43, %v1135_v41  ;;  %v1090_v48 = vpop.f32.mrb[22].mxu0  ;;  %v1138_v49 = vpop.f32.mrb[22].mxu1 }
 0x124   : > { %851 = vst.msk [vmem:[%s1378_s4 + $0x60] sm:$0xf] %vm826_vm0, %v1033_v37  ;;  %v1091_v51 = vpop.f32.mrb[23].mxu0  ;;  %v1139_v52 = vpop.f32.mrb[23].mxu1 }
 0x125   : > { %836 = vst.msk [vmem:[%s1378_s4 + $0x24] sm:$0xf] %vm826_vm0, %v1018_v44  ;;  %852 = vst.msk [vmem:[%s1378_s4 + $0x64] sm:$0xf] %vm826_vm0, %v1034_v45  ;;  %v580_v53 = vadd.f32 %v1089_v46, %v1368_v50  ;;  %v644_v54 = vadd.f32 %v1137_v47, %v1368_v50  ;;  %v1092_v55 = vadd.f32 %v1091_v51, %v1090_v48 }
 0x126   : > { %v1140_v56 = vadd.f32 %v1139_v52, %v1138_v49 }
 0x127   : > { %v676_v57 = vmax.f32 %v580_v53, 0.0  ;;  %v692_v58 = vmax.f32 %v644_v54, 0.0  ;;  %v583_v59 = vadd.f32 %v1092_v55, %v1368_v50 }
 0x128   : > { %v647_v60 = vadd.f32 %v1140_v56, %v1368_v50 }
 0x129   : > { %v1019_v61 = vpack.c.bf16 %v676_v57, %v676_v57  ;;  %v1035_v62 = vpack.c.bf16 %v692_v58, %v692_v58  ;;  %v677_v63 = vmax.f32 %v583_v59, 0.0  ;;  %v1093_v1 = vpop.f32.mrb[24].mxu0  ;;  %v1141_v2 = vpop.f32.mrb[24].mxu1 }
 0x12a   : > { %v693_v0 = vmax.f32 %v647_v60, 0.0  ;;  %v1094_v3 = vpop.f32.mrb[25].mxu0  ;;  %v1142_v4 = vpop.f32.mrb[25].mxu1 }
 0x12b   : > { %837 = vst.msk [vmem:[%s1378_s4 + $0x28] sm:$0xf] %vm826_vm0, %v1019_v61  ;;  %853 = vst.msk [vmem:[%s1378_s4 + $0x68] sm:$0xf] %vm826_vm0, %v1035_v62  ;;  %v1020_v5 = vpack.c.bf16 %v677_v63, %v677_v63  ;;  %v1095_v7 = vadd.f32 %v1094_v3, %v1093_v1  ;;  %v1143_v8 = vadd.f32 %v1142_v4, %v1141_v2  ;;  %v1096_v9 = vpop.f32.mrb[26].mxu0  ;;  %v1144_v10 = vpop.f32.mrb[26].mxu1 }
 0x12c   : > { %v1036_v6 = vpack.c.bf16 %v693_v0, %v693_v0  ;;  %v1097_v11 = vpop.f32.mrb[27].mxu0  ;;  %v1145_v12 = vpop.f32.mrb[27].mxu1 }
 0x12d   : > { %838 = vst.msk [vmem:[%s1378_s4 + $0x2c] sm:$0xf] %vm826_vm0, %v1020_v5  ;;  %v588_v13 = vadd.f32 %v1095_v7, %v1368_v50  ;;  %v652_v14 = vadd.f32 %v1143_v8, %v1368_v50  ;;  %v1098_v15 = vadd.f32 %v1097_v11, %v1096_v9  ;;  %v1146_v16 = vadd.f32 %v1145_v12, %v1144_v10 }
 0x12e   : > { %854 = vst.msk [vmem:[%s1378_s4 + $0x6c] sm:$0xf] %vm826_vm0, %v1036_v6 }
 0x12f   : > { %v678_v17 = vmax.f32 %v588_v13, 0.0  ;;  %v694_v18 = vmax.f32 %v652_v14, 0.0  ;;  %v591_v19 = vadd.f32 %v1098_v15, %v1368_v50  ;;  %v655_v20 = vadd.f32 %v1146_v16, %v1368_v50 }
 0x131   : > { %v1021_v21 = vpack.c.bf16 %v678_v17, %v678_v17  ;;  %v1037_v22 = vpack.c.bf16 %v694_v18, %v694_v18  ;;  %v679_v23 = vmax.f32 %v591_v19, 0.0  ;;  %v695_v24 = vmax.f32 %v655_v20, 0.0  ;;  %v1099_v25 = vpop.f32.mrb[28].mxu0  ;;  %v1147_v26 = vpop.f32.mrb[28].mxu1 }
 0x132   : > { %v1100_v27 = vpop.f32.mrb[29].mxu0  ;;  %v1148_v28 = vpop.f32.mrb[29].mxu1 }
 0x133   : > { %839 = vst.msk [vmem:[%s1378_s4 + $0x30] sm:$0xf] %vm826_vm0, %v1021_v21  ;;  %855 = vst.msk [vmem:[%s1378_s4 + $0x70] sm:$0xf] %vm826_vm0, %v1037_v22  ;;  %v1022_v29 = vpack.c.bf16 %v679_v23, %v679_v23  ;;  %v1038_v30 = vpack.c.bf16 %v695_v24, %v695_v24  ;;  %v1101_v31 = vadd.f32 %v1100_v27, %v1099_v25  ;;  %v1102_v33 = vpop.f32.mrb[30].mxu0  ;;  %v1150_v34 = vpop.f32.mrb[30].mxu1 }
 0x134   : > { %v1149_v32 = vadd.f32 %v1148_v28, %v1147_v26  ;;  %v1103_v35 = vpop.f32.mrb[31].mxu0  ;;  %v1151_v36 = vpop.f32.mrb[31].mxu1 }
 0x135   : > { %840 = vst.msk [vmem:[%s1378_s4 + $0x34] sm:$0xf] %vm826_vm0, %v1022_v29  ;;  %856 = vst.msk [vmem:[%s1378_s4 + $0x74] sm:$0xf] %vm826_vm0, %v1038_v30  ;;  %v596_v37 = vadd.f32 %v1101_v31, %v1368_v50  ;;  %v1104_v39 = vadd.f32 %v1103_v35, %v1102_v33  ;;  %v1152_v40 = vadd.f32 %v1151_v36, %v1150_v34 }
 0x136   : > { %v660_v38 = vadd.f32 %v1149_v32, %v1368_v50 }
 0x137   : > { %v680_v41 = vmax.f32 %v596_v37, 0.0  ;;  %v599_v43 = vadd.f32 %v1104_v39, %v1368_v50  ;;  %v663_v44 = vadd.f32 %v1152_v40, %v1368_v50 }
 0x138   : > { %v696_v42 = vmax.f32 %v660_v38, 0.0 }
 0x139   : > { %v1023_v45 = vpack.c.bf16 %v680_v41, %v680_v41  ;;  %v681_v47 = vmax.f32 %v599_v43, 0.0  ;;  %v697_v48 = vmax.f32 %v663_v44, 0.0 }
 0x13a   : > { %v1039_v46 = vpack.c.bf16 %v696_v42, %v696_v42 }
 0x13b   : > { %841 = vst.msk [vmem:[%s1378_s4 + $0x38] sm:$0xf] %vm826_vm0, %v1023_v45  ;;  %v1024_v49 = vpack.c.bf16 %v681_v47, %v681_v47  ;;  %v1040_v51 = vpack.c.bf16 %v697_v48, %v697_v48 }
 0x13c   : > { %857 = vst.msk [vmem:[%s1378_s4 + $0x78] sm:$0xf] %vm826_vm0, %v1039_v46 }
 0x13d   : > { %842 = vst.msk [vmem:[%s1378_s4 + $0x3c] sm:$0xf] %vm826_vm0, %v1024_v49  ;;  %858 = vst.msk [vmem:[%s1378_s4 + $0x7c] sm:$0xf] %vm826_vm0, %v1040_v51 }
 0x13e PF: > { %s13_s12 = sadd.s32 1, %s1247_s12  }
 0x13f   : > { %p10_p4 = scmp.ge.s32.totalorder %s13_s12, 6  }
 0x141   :  { %12 = sbr.rel (!%p10_p4) target bundleno = 1 (0x1), region = 62 }

// kernel: q_network_forward.5
= control target key start
LH: loop header
LB: loop body
LE: loop exit
PB: predicated region body
PF: predicated region fallthrough
CT: control target
= control target key end

     0   :  { %vm880_vm0 = vcmask 519168   ;;  %s1637_s1 = inlined_call_operand.vmem [shape: bf16[512,64], index: 1, kind: input, shape index: {}]   ;;  %s1638_s0 = inlined_call_operand.vmem [shape: bf16[168,512], index: 0, kind: input, shape index: {}]   ;;  %s1639_s2 = inlined_call_operand.vmem [shape: f32[1,64], index: 2, kind: input, shape index: {}]   ;;  %s1640_s3 = inlined_call_operand.vmem [shape: bf16[168,64], index: 3, kind: output, shape index: {}]  }
   0x1   :  { %v1189_v0 = vld [vmem:[%s1637_s1 + $0x40] sm:$0xff]   ;;  %v1193_v4 = vld [vmem:[%s1637_s1 + $0x48] sm:$0xff]   ;;  %v1197_v8 = vld [vmem:[%s1637_s1 + $0x50] sm:$0xff]  }
   0x2   :  { %v1190_v1 = vld [vmem:[%s1637_s1 + $0xc0] sm:$0xff]   ;;  %1025 = vmatprep.subr.bf16.mxu0 %v1189_v0  ;;  %v1194_v5 = vld [vmem:[%s1637_s1 + $0xc8] sm:$0xff]   ;;  %v1198_v9 = vld [vmem:[%s1637_s1 + $0xd0] sm:$0xff]  }
   0x3   :  { %v1191_v2 = vld [vmem:[%s1637_s1] sm:$0xff]   ;;  %1107 = vmatprep.subr.bf16.mxu1 %v1190_v1  ;;  %v1195_v6 = vld [vmem:[%s1637_s1 + $0x8] sm:$0xff]   ;;  %v1199_v10 = vld [vmem:[%s1637_s1 + $0x10] sm:$0xff]  }
   0x4   :  { %v1192_v3 = vld [vmem:[%s1637_s1 + $0x80] sm:$0xff]   ;;  %1026 = vmatpush3.bf16.msra.mxu0 %v1191_v2  ;;  %v1196_v7 = vld [vmem:[%s1637_s1 + $0x88] sm:$0xff]   ;;  %v1200_v11 = vld [vmem:[%s1637_s1 + $0x90] sm:$0xff]  }
   0x5   :  { %1108 = vmatpush3.bf16.msra.mxu1 %v1192_v3  ;;  %1027 = vmatprep.subr.bf16.mxu0 %v1193_v4  ;;  %v1201_v12 = vld [vmem:[%s1637_s1 + $0x58] sm:$0xff]   ;;  %v1205_v16 = vld [vmem:[%s1637_s1 + $0x60] sm:$0xff]   ;;  %v1209_v20 = vld [vmem:[%s1637_s1 + $0x68] sm:$0xff]  }
   0x6   :  { %1109 = vmatprep.subr.bf16.mxu1 %v1194_v5  ;;  %v1202_v13 = vld [vmem:[%s1637_s1 + $0xd8] sm:$0xff]   ;;  %v1206_v17 = vld [vmem:[%s1637_s1 + $0xe0] sm:$0xff]   ;;  %v1210_v21 = vld [vmem:[%s1637_s1 + $0xe8] sm:$0xff]  }
   0x7   :  { %v1203_v14 = vld [vmem:[%s1637_s1 + $0x18] sm:$0xff]   ;;  %v1207_v18 = vld [vmem:[%s1637_s1 + $0x20] sm:$0xff]   ;;  %v1211_v22 = vld [vmem:[%s1637_s1 + $0x28] sm:$0xff]  }
   0x8   :  { %1028 = vmatpush3.bf16.msra.mxu0 %v1195_v6  ;;  %v1204_v15 = vld [vmem:[%s1637_s1 + $0x98] sm:$0xff]   ;;  %v1208_v19 = vld [vmem:[%s1637_s1 + $0xa0] sm:$0xff]   ;;  %v1212_v23 = vld [vmem:[%s1637_s1 + $0xa8] sm:$0xff]  }
   0x9   :  { %1110 = vmatpush3.bf16.msra.mxu1 %v1196_v7  ;;  %1029 = vmatprep.subr.bf16.mxu0 %v1197_v8  ;;  %v1213_v24 = vld [vmem:[%s1637_s1 + $0x70] sm:$0xff]   ;;  %v1217_v28 = vld [vmem:[%s1637_s1 + $0x78] sm:$0xff]   ;;  %v55_v6 = vld [vmem:[%s1638_s0 + $0x140] sm:$0xff] }
   0xa   :  { %1111 = vmatprep.subr.bf16.mxu1 %v1198_v9  ;;  %v1214_v25 = vld [vmem:[%s1637_s1 + $0xf0] sm:$0xff]   ;;  %v1218_v29 = vld [vmem:[%s1637_s1 + $0xf8] sm:$0xff]   ;;  %v56_v7 = vld [vmem:[%s1638_s0 + $0x148] sm:$0xff] }
   0xb   :  { %v1215_v26 = vld [vmem:[%s1637_s1 + $0x30] sm:$0xff]   ;;  %v1219_v30 = vld [vmem:[%s1637_s1 + $0x38] sm:$0xff]  }
   0xc   :  { %1030 = vmatpush3.bf16.msra.mxu0 %v1199_v10  ;;  %v1216_v27 = vld [vmem:[%s1637_s1 + $0xb0] sm:$0xff]   ;;  %v1220_v31 = vld [vmem:[%s1637_s1 + $0xb8] sm:$0xff]   ;;  %v948_v10 = vcombine.high %v55_v6, %v55_v6 }
   0xd   :  { %1112 = vmatpush3.bf16.msra.mxu1 %v1200_v11  ;;  %1031 = vmatprep.subr.bf16.mxu0 %v1201_v12  ;;  %v1221_v32 = vld [vmem:[%s1638_s0] ss:$16 sps:$4 sm:$0xff]   ;;  %v1223_v33 = vld [vmem:[%s1638_s0 + $0x4] ss:$16 sps:$4 sm:$0xff]   ;;  %v1224_v34 = vld [vmem:[%s1638_s0 + $0x8] ss:$16 sps:$4 sm:$0xff]   ;;  %v950_v11 = vcombine.high %v56_v7, %v56_v7  ;;  %v947_v12 = vcombine.low %v55_v6, %v55_v6 }
   0xe   :  { %1113 = vmatprep.subr.bf16.mxu1 %v1202_v13  ;;  %v1226_v35 = vld [vmem:[%s1638_s0 + $0xc] ss:$16 sps:$4 sm:$0xff]   ;;  %566 = vmatprep.mubr.bf16.mxu0 %v1223_v33  ;;  %v1227_v36 = vld [vmem:[%s1638_s0 + $0x24] ss:$16 sps:$4 sm:$0xff]   ;;  %v1231_v38 = vld [vmem:[%s1638_s0 + $0x20] ss:$16 sps:$4 sm:$0xff]   ;;  %v949_v13 = vcombine.low %v56_v7, %v56_v7 }
   0xf   :  { %686 = vmatprep.mubr.bf16.mxu1 %v1226_v35  ;;  %v1229_v37 = vld [vmem:[%s1638_s0 + $0x2c] ss:$16 sps:$4 sm:$0xff]   ;;  %v1232_v39 = vld [vmem:[%s1638_s0 + $0x28] ss:$16 sps:$4 sm:$0xff]   ;;  %v1233_v40 = vld [vmem:[%s1638_s0 + $0x44] ss:$16 sps:$4 sm:$0xff]  }
  0x10   :  { %1032 = vmatpush3.bf16.msra.mxu0 %v1203_v14  ;;  %v1235_v41 = vld [vmem:[%s1638_s0 + $0x4c] ss:$16 sps:$4 sm:$0xff]   ;;  %v1237_v42 = vld [vmem:[%s1638_s0 + $0x40] ss:$16 sps:$4 sm:$0xff]   ;;  %v1238_v43 = vld [vmem:[%s1638_s0 + $0x48] ss:$16 sps:$4 sm:$0xff]  }
  0x11   :  { %1114 = vmatpush3.bf16.msra.mxu1 %v1204_v15  ;;  %1033 = vmatprep.subr.bf16.mxu0 %v1205_v16  ;;  %v1239_v44 = vld [vmem:[%s1638_s0 + $0x64] ss:$16 sps:$4 sm:$0xff]   ;;  %v1241_v45 = vld [vmem:[%s1638_s0 + $0x6c] ss:$16 sps:$4 sm:$0xff]   ;;  %v1243_v46 = vld [vmem:[%s1638_s0 + $0x60] ss:$16 sps:$4 sm:$0xff]  }
  0x12   :  { %1115 = vmatprep.subr.bf16.mxu1 %v1206_v17  ;;  %v1244_v47 = vld [vmem:[%s1638_s0 + $0x68] ss:$16 sps:$4 sm:$0xff]   ;;  %v1245_v48 = vld [vmem:[%s1638_s0 + $0x84] ss:$16 sps:$4 sm:$0xff]   ;;  %v1247_v49 = vld [vmem:[%s1638_s0 + $0x8c] ss:$16 sps:$4 sm:$0xff]  }
  0x13   :  { %v1249_v50 = vld [vmem:[%s1638_s0 + $0x80] ss:$16 sps:$4 sm:$0xff]   ;;  %v1250_v51 = vld [vmem:[%s1638_s0 + $0x88] ss:$16 sps:$4 sm:$0xff]   ;;  %v1251_v52 = vld [vmem:[%s1638_s0 + $0xa4] ss:$16 sps:$4 sm:$0xff]  }
  0x14   :  { %1034 = vmatpush3.bf16.msra.mxu0 %v1207_v18  ;;  %v1253_v53 = vld [vmem:[%s1638_s0 + $0xac] ss:$16 sps:$4 sm:$0xff]   ;;  %v1255_v54 = vld [vmem:[%s1638_s0 + $0xa0] ss:$16 sps:$4 sm:$0xff]   ;;  %v1256_v55 = vld [vmem:[%s1638_s0 + $0xa8] ss:$16 sps:$4 sm:$0xff]  }
  0x15   :  { %1116 = vmatpush3.bf16.msra.mxu1 %v1208_v19  ;;  %1035 = vmatprep.subr.bf16.mxu0 %v1209_v20  ;;  %v1257_v56 = vld [vmem:[%s1638_s0 + $0xc4] ss:$16 sps:$4 sm:$0xff]   ;;  %v1259_v57 = vld [vmem:[%s1638_s0 + $0xcc] ss:$16 sps:$4 sm:$0xff]   ;;  %v1261_v58 = vld [vmem:[%s1638_s0 + $0xc0] ss:$16 sps:$4 sm:$0xff]  }
  0x16   :  { %1117 = vmatprep.subr.bf16.mxu1 %v1210_v21  ;;  %v1262_v59 = vld [vmem:[%s1638_s0 + $0xc8] ss:$16 sps:$4 sm:$0xff]   ;;  %v1263_v60 = vld [vmem:[%s1638_s0 + $0xe4] ss:$16 sps:$4 sm:$0xff]   ;;  %v1265_v61 = vld [vmem:[%s1638_s0 + $0xec] ss:$16 sps:$4 sm:$0xff]  }
  0x17   :  { %v1267_v62 = vld [vmem:[%s1638_s0 + $0xe0] ss:$16 sps:$4 sm:$0xff]   ;;  %v1268_v63 = vld [vmem:[%s1638_s0 + $0xe8] ss:$16 sps:$4 sm:$0xff]   ;;  %v1269_v0 = vld [vmem:[%s1638_s0 + $0x104] ss:$16 sps:$4 sm:$0xff]  }
  0x18   :  { %1036 = vmatpush3.bf16.msra.mxu0 %v1211_v22  ;;  %v1271_v1 = vld [vmem:[%s1638_s0 + $0x10c] ss:$16 sps:$4 sm:$0xff]   ;;  %v1273_v2 = vld [vmem:[%s1638_s0 + $0x100] ss:$16 sps:$4 sm:$0xff]   ;;  %v1274_v3 = vld [vmem:[%s1638_s0 + $0x108] ss:$16 sps:$4 sm:$0xff]  }
  0x19   :  { %1118 = vmatpush3.bf16.msra.mxu1 %v1212_v23  ;;  %1037 = vmatprep.subr.bf16.mxu0 %v1213_v24  ;;  %v1275_v4 = vld [vmem:[%s1638_s0 + $0x124] ss:$16 sps:$4 sm:$0xff]   ;;  %v1277_v5 = vld [vmem:[%s1638_s0 + $0x12c] ss:$16 sps:$4 sm:$0xff]   ;;  %v1279_v8 = vld [vmem:[%s1638_s0 + $0x120] ss:$16 sps:$4 sm:$0xff]  }
  0x1a   :  { %1119 = vmatprep.subr.bf16.mxu1 %v1214_v25  ;;  %v1280_v9 = vld [vmem:[%s1638_s0 + $0x128] ss:$16 sps:$4 sm:$0xff]   ;;  %v1530_v16 = vld [vmem:[%s1639_s2] ss:$0 sm:$0xff] }
  0x1c   :  { %1038 = vmatpush3.bf16.msra.mxu0 %v1215_v26 }
  0x1d   :  { %1120 = vmatpush3.bf16.msra.mxu1 %v1216_v27  ;;  %1039 = vmatprep.subr.bf16.mxu0 %v1217_v28 }
  0x1e   :  { %1121 = vmatprep.subr.bf16.mxu1 %v1218_v29 }
  0x20   :  { %1040 = vmatpush3.bf16.msra.mxu0 %v1219_v30 }
  0x21   :  { %1122 = vmatpush3.bf16.msra.mxu1 %v1220_v31 }
  0x23   :  { %567 = vmatmul.mubr.bf16.vlgmr.msra.gmra.mrb[0].mxu0 %v1221_v32 }
  0x24   :  { %687 = vmatmul.mubr.bf16.vlgmr.msra.gmra.mrb[0].mxu1 %v1224_v34  ;;  %574 = vmatprep.mubr.bf16.mxu0 %v1227_v36 }
  0x25   :  { %694 = vmatprep.mubr.bf16.mxu1 %v1229_v37 }
  0x2b   :  { %575 = vmatmul.mubr.bf16.gmra.mrb[4].mxu0 %v1231_v38 }
  0x2c   :  { %695 = vmatmul.mubr.bf16.gmra.mrb[4].mxu1 %v1232_v39  ;;  %582 = vmatprep.mubr.bf16.mxu0 %v1233_v40 }
  0x2d   :  { %702 = vmatprep.mubr.bf16.mxu1 %v1235_v41 }
  0x33   :  { %583 = vmatmul.mubr.bf16.gmra.mrb[8].mxu0 %v1237_v42 }
  0x34   :  { %703 = vmatmul.mubr.bf16.gmra.mrb[8].mxu1 %v1238_v43  ;;  %590 = vmatprep.mubr.bf16.mxu0 %v1239_v44 }
  0x35   :  { %710 = vmatprep.mubr.bf16.mxu1 %v1241_v45 }
  0x3b   :  { %591 = vmatmul.mubr.bf16.gmra.mrb[12].mxu0 %v1243_v46 }
  0x3c   :  { %711 = vmatmul.mubr.bf16.gmra.mrb[12].mxu1 %v1244_v47  ;;  %598 = vmatprep.mubr.bf16.mxu0 %v1245_v48 }
  0x3d   :  { %718 = vmatprep.mubr.bf16.mxu1 %v1247_v49 }
  0x43   :  { %599 = vmatmul.mubr.bf16.gmra.mrb[16].mxu0 %v1249_v50 }
  0x44   :  { %719 = vmatmul.mubr.bf16.gmra.mrb[16].mxu1 %v1250_v51  ;;  %606 = vmatprep.mubr.bf16.mxu0 %v1251_v52 }
  0x45   :  { %726 = vmatprep.mubr.bf16.mxu1 %v1253_v53 }
  0x4b   :  { %607 = vmatmul.mubr.bf16.gmra.mrb[20].mxu0 %v1255_v54 }
  0x4c   :  { %727 = vmatmul.mubr.bf16.gmra.mrb[20].mxu1 %v1256_v55  ;;  %614 = vmatprep.mubr.bf16.mxu0 %v1257_v56 }
  0x4d   :  { %734 = vmatprep.mubr.bf16.mxu1 %v1259_v57 }
  0x53   :  { %615 = vmatmul.mubr.bf16.gmra.mrb[24].mxu0 %v1261_v58 }
  0x54   :  { %735 = vmatmul.mubr.bf16.gmra.mrb[24].mxu1 %v1262_v59  ;;  %622 = vmatprep.mubr.bf16.mxu0 %v1263_v60 }
  0x55   :  { %742 = vmatprep.mubr.bf16.mxu1 %v1265_v61 }
  0x5b   :  { %623 = vmatmul.mubr.bf16.gmra.mrb[28].mxu0 %v1267_v62 }
  0x5c   :  { %743 = vmatmul.mubr.bf16.gmra.mrb[28].mxu1 %v1268_v63  ;;  %630 = vmatprep.mubr.bf16.mxu0 %v1269_v0 }
  0x5d   :  { %750 = vmatprep.mubr.bf16.mxu1 %v1271_v1 }
  0x63   :  { %631 = vmatmul.mubr.bf16.gmra.mrb[32].mxu0 %v1273_v2 }
  0x64   :  { %751 = vmatmul.mubr.bf16.gmra.mrb[32].mxu1 %v1274_v3  ;;  %638 = vmatprep.mubr.bf16.mxu0 %v1275_v4 }
  0x65   :  { %758 = vmatprep.mubr.bf16.mxu1 %v1277_v5 }
  0x6b   :  { %639 = vmatmul.mubr.bf16.gmra.mrb[36].mxu0 %v1279_v8 }
  0x6c   :  { %759 = vmatmul.mubr.bf16.gmra.mrb[36].mxu1 %v1280_v9  ;;  %646 = vmatprep.mubr.bf16.mxu0 %v948_v10 }
  0x6d   :  { %766 = vmatprep.mubr.bf16.mxu1 %v950_v11 }
  0x73   :  { %647 = vmatmul.mubr.bf16.gmra.mrb[40].mxu0 %v947_v12 }
  0x74   :  { %767 = vmatmul.mubr.bf16.gmra.mrb[40].mxu1 %v949_v13 }
  0xf6   :  { %v1041_v14 = vpop.f32.mrb[0].mxu0 }
  0xf7   :  { %v1123_v15 = vpop.f32.mrb[0].mxu1  ;;  %v1042_v17 = vpop.f32.mrb[1].mxu0 }
  0xf8   :  { %v1043_v18 = vadd.f32 %v1042_v17, %v1041_v14  ;;  %v1124_v19 = vpop.f32.mrb[1].mxu1  ;;  %v1044_v20 = vpop.f32.mrb[2].mxu0 }
  0xf9   :  { %v1125_v21 = vadd.f32 %v1124_v19, %v1123_v15  ;;  %v1126_v22 = vpop.f32.mrb[2].mxu1  ;;  %v1045_v23 = vpop.f32.mrb[3].mxu0 }
  0xfa   :  { %v569_v24 = vadd.f32 %v1043_v18, %v1530_v16  ;;  %v1046_v25 = vadd.f32 %v1045_v23, %v1044_v20  ;;  %v1127_v26 = vpop.f32.mrb[3].mxu1 }
  0xfb   :  { %v1128_v27 = vadd.f32 %v1127_v26, %v1126_v22 }
  0xfc   :  { %v689_v28 = vadd.f32 %v1125_v21, %v569_v24  ;;  %v572_v29 = vadd.f32 %v1046_v25, %v1530_v16 }
  0xfe   :  { %v774_v30 = vmax.f32 %v689_v28, 0.0  ;;  %v692_v31 = vadd.f32 %v1128_v27, %v572_v29  ;;  %v1047_v32 = vpop.f32.mrb[4].mxu0 }
  0xff   :  { %v1129_v33 = vpop.f32.mrb[4].mxu1  ;;  %v1048_v34 = vpop.f32.mrb[5].mxu0 }
 0x100   :  { %v1004_v35 = vpack.c.bf16 %v774_v30, %v774_v30  ;;  %v775_v36 = vmax.f32 %v692_v31, 0.0  ;;  %v1049_v37 = vadd.f32 %v1048_v34, %v1047_v32  ;;  %v1130_v38 = vpop.f32.mrb[5].mxu1  ;;  %v1050_v39 = vpop.f32.mrb[6].mxu0 }
 0x101   :  { %v1131_v40 = vadd.f32 %v1130_v38, %v1129_v33  ;;  %v1132_v41 = vpop.f32.mrb[6].mxu1  ;;  %v1051_v42 = vpop.f32.mrb[7].mxu0 }
 0x102   :  { %881 = vst.msk [vmem:[%s1640_s3] sm:$0xf] %vm880_vm0, %v1004_v35  ;;  %v1005_v43 = vpack.c.bf16 %v775_v36, %v775_v36  ;;  %v577_v44 = vadd.f32 %v1049_v37, %v1530_v16  ;;  %v1052_v45 = vadd.f32 %v1051_v42, %v1050_v39  ;;  %v1133_v46 = vpop.f32.mrb[7].mxu1 }
 0x103   :  { %v1134_v47 = vadd.f32 %v1133_v46, %v1132_v41 }
 0x104   :  { %882 = vst.msk [vmem:[%s1640_s3 + $0x4] sm:$0xf] %vm880_vm0, %v1005_v43  ;;  %v697_v48 = vadd.f32 %v1131_v40, %v577_v44  ;;  %v580_v49 = vadd.f32 %v1052_v45, %v1530_v16 }
 0x106   :  { %v776_v50 = vmax.f32 %v697_v48, 0.0  ;;  %v700_v51 = vadd.f32 %v1134_v47, %v580_v49  ;;  %v1053_v52 = vpop.f32.mrb[8].mxu0 }
 0x107   :  { %v1135_v53 = vpop.f32.mrb[8].mxu1  ;;  %v1054_v54 = vpop.f32.mrb[9].mxu0 }
 0x108   :  { %v1006_v55 = vpack.c.bf16 %v776_v50, %v776_v50  ;;  %v777_v56 = vmax.f32 %v700_v51, 0.0  ;;  %v1055_v57 = vadd.f32 %v1054_v54, %v1053_v52  ;;  %v1136_v58 = vpop.f32.mrb[9].mxu1  ;;  %v1056_v59 = vpop.f32.mrb[10].mxu0 }
 0x109   :  { %v1137_v60 = vadd.f32 %v1136_v58, %v1135_v53  ;;  %v1138_v61 = vpop.f32.mrb[10].mxu1  ;;  %v1057_v62 = vpop.f32.mrb[11].mxu0 }
 0x10a   :  { %883 = vst.msk [vmem:[%s1640_s3 + $0x8] sm:$0xf] %vm880_vm0, %v1006_v55  ;;  %v1007_v63 = vpack.c.bf16 %v777_v56, %v777_v56  ;;  %v585_v0 = vadd.f32 %v1055_v57, %v1530_v16  ;;  %v1058_v1 = vadd.f32 %v1057_v62, %v1056_v59  ;;  %v1139_v2 = vpop.f32.mrb[11].mxu1 }
 0x10b   :  { %v1140_v3 = vadd.f32 %v1139_v2, %v1138_v61 }
 0x10c   :  { %884 = vst.msk [vmem:[%s1640_s3 + $0xc] sm:$0xf] %vm880_vm0, %v1007_v63  ;;  %v705_v4 = vadd.f32 %v1137_v60, %v585_v0  ;;  %v588_v5 = vadd.f32 %v1058_v1, %v1530_v16 }
 0x10e   :  { %v778_v6 = vmax.f32 %v705_v4, 0.0  ;;  %v708_v7 = vadd.f32 %v1140_v3, %v588_v5  ;;  %v1059_v8 = vpop.f32.mrb[12].mxu0 }
 0x10f   :  { %v1141_v9 = vpop.f32.mrb[12].mxu1  ;;  %v1060_v10 = vpop.f32.mrb[13].mxu0 }
 0x110   :  { %v1008_v11 = vpack.c.bf16 %v778_v6, %v778_v6  ;;  %v779_v12 = vmax.f32 %v708_v7, 0.0  ;;  %v1061_v13 = vadd.f32 %v1060_v10, %v1059_v8  ;;  %v1142_v14 = vpop.f32.mrb[13].mxu1  ;;  %v1062_v15 = vpop.f32.mrb[14].mxu0 }
 0x111   :  { %v1143_v17 = vadd.f32 %v1142_v14, %v1141_v9  ;;  %v1144_v18 = vpop.f32.mrb[14].mxu1  ;;  %v1063_v19 = vpop.f32.mrb[15].mxu0 }
 0x112   :  { %885 = vst.msk [vmem:[%s1640_s3 + $0x10] sm:$0xf] %vm880_vm0, %v1008_v11  ;;  %v1009_v20 = vpack.c.bf16 %v779_v12, %v779_v12  ;;  %v593_v21 = vadd.f32 %v1061_v13, %v1530_v16  ;;  %v1064_v22 = vadd.f32 %v1063_v19, %v1062_v15  ;;  %v1145_v23 = vpop.f32.mrb[15].mxu1 }
 0x113   :  { %v1146_v24 = vadd.f32 %v1145_v23, %v1144_v18 }
 0x114   :  { %886 = vst.msk [vmem:[%s1640_s3 + $0x14] sm:$0xf] %vm880_vm0, %v1009_v20  ;;  %v713_v25 = vadd.f32 %v1143_v17, %v593_v21  ;;  %v596_v26 = vadd.f32 %v1064_v22, %v1530_v16 }
 0x116   :  { %v780_v27 = vmax.f32 %v713_v25, 0.0  ;;  %v716_v28 = vadd.f32 %v1146_v24, %v596_v26  ;;  %v1065_v29 = vpop.f32.mrb[16].mxu0 }
 0x117   :  { %v1147_v30 = vpop.f32.mrb[16].mxu1  ;;  %v1066_v31 = vpop.f32.mrb[17].mxu0 }
 0x118   :  { %v1010_v32 = vpack.c.bf16 %v780_v27, %v780_v27  ;;  %v781_v33 = vmax.f32 %v716_v28, 0.0  ;;  %v1067_v34 = vadd.f32 %v1066_v31, %v1065_v29  ;;  %v1148_v35 = vpop.f32.mrb[17].mxu1  ;;  %v1068_v36 = vpop.f32.mrb[18].mxu0 }
 0x119   :  { %v1149_v37 = vadd.f32 %v1148_v35, %v1147_v30  ;;  %v1150_v38 = vpop.f32.mrb[18].mxu1  ;;  %v1069_v39 = vpop.f32.mrb[19].mxu0 }
 0x11a   :  { %887 = vst.msk [vmem:[%s1640_s3 + $0x18] sm:$0xf] %vm880_vm0, %v1010_v32  ;;  %v1011_v40 = vpack.c.bf16 %v781_v33, %v781_v33  ;;  %v601_v41 = vadd.f32 %v1067_v34, %v1530_v16  ;;  %v1070_v42 = vadd.f32 %v1069_v39, %v1068_v36  ;;  %v1151_v43 = vpop.f32.mrb[19].mxu1 }
 0x11b   :  { %v1152_v44 = vadd.f32 %v1151_v43, %v1150_v38 }
 0x11c   :  { %888 = vst.msk [vmem:[%s1640_s3 + $0x1c] sm:$0xf] %vm880_vm0, %v1011_v40  ;;  %v721_v45 = vadd.f32 %v1149_v37, %v601_v41  ;;  %v604_v46 = vadd.f32 %v1070_v42, %v1530_v16 }
 0x11e   :  { %v782_v47 = vmax.f32 %v721_v45, 0.0  ;;  %v724_v48 = vadd.f32 %v1152_v44, %v604_v46  ;;  %v1071_v49 = vpop.f32.mrb[20].mxu0 }
 0x11f   :  { %v1153_v50 = vpop.f32.mrb[20].mxu1  ;;  %v1072_v51 = vpop.f32.mrb[21].mxu0 }
 0x120   :  { %v1012_v52 = vpack.c.bf16 %v782_v47, %v782_v47  ;;  %v783_v53 = vmax.f32 %v724_v48, 0.0  ;;  %v1073_v54 = vadd.f32 %v1072_v51, %v1071_v49  ;;  %v1154_v55 = vpop.f32.mrb[21].mxu1  ;;  %v1074_v56 = vpop.f32.mrb[22].mxu0 }
 0x121   :  { %v1155_v57 = vadd.f32 %v1154_v55, %v1153_v50  ;;  %v1156_v58 = vpop.f32.mrb[22].mxu1  ;;  %v1075_v59 = vpop.f32.mrb[23].mxu0 }
 0x122   :  { %889 = vst.msk [vmem:[%s1640_s3 + $0x20] sm:$0xf] %vm880_vm0, %v1012_v52  ;;  %v1013_v60 = vpack.c.bf16 %v783_v53, %v783_v53  ;;  %v609_v61 = vadd.f32 %v1073_v54, %v1530_v16  ;;  %v1076_v62 = vadd.f32 %v1075_v59, %v1074_v56  ;;  %v1157_v63 = vpop.f32.mrb[23].mxu1 }
 0x123   :  { %v1158_v0 = vadd.f32 %v1157_v63, %v1156_v58 }
 0x124   :  { %890 = vst.msk [vmem:[%s1640_s3 + $0x24] sm:$0xf] %vm880_vm0, %v1013_v60  ;;  %v729_v1 = vadd.f32 %v1155_v57, %v609_v61  ;;  %v612_v2 = vadd.f32 %v1076_v62, %v1530_v16 }
 0x126   :  { %v784_v3 = vmax.f32 %v729_v1, 0.0  ;;  %v732_v4 = vadd.f32 %v1158_v0, %v612_v2  ;;  %v1077_v5 = vpop.f32.mrb[24].mxu0 }
 0x127   :  { %v1159_v6 = vpop.f32.mrb[24].mxu1  ;;  %v1078_v7 = vpop.f32.mrb[25].mxu0 }
 0x128   :  { %v1014_v8 = vpack.c.bf16 %v784_v3, %v784_v3  ;;  %v785_v9 = vmax.f32 %v732_v4, 0.0  ;;  %v1079_v10 = vadd.f32 %v1078_v7, %v1077_v5  ;;  %v1160_v11 = vpop.f32.mrb[25].mxu1  ;;  %v1080_v12 = vpop.f32.mrb[26].mxu0 }
 0x129   :  { %v1161_v13 = vadd.f32 %v1160_v11, %v1159_v6  ;;  %v1162_v14 = vpop.f32.mrb[26].mxu1  ;;  %v1081_v15 = vpop.f32.mrb[27].mxu0 }
 0x12a   :  { %891 = vst.msk [vmem:[%s1640_s3 + $0x28] sm:$0xf] %vm880_vm0, %v1014_v8  ;;  %v1015_v17 = vpack.c.bf16 %v785_v9, %v785_v9  ;;  %v617_v18 = vadd.f32 %v1079_v10, %v1530_v16  ;;  %v1082_v19 = vadd.f32 %v1081_v15, %v1080_v12  ;;  %v1163_v20 = vpop.f32.mrb[27].mxu1 }
 0x12b   :  { %v1164_v21 = vadd.f32 %v1163_v20, %v1162_v14 }
 0x12c   :  { %892 = vst.msk [vmem:[%s1640_s3 + $0x2c] sm:$0xf] %vm880_vm0, %v1015_v17  ;;  %v737_v22 = vadd.f32 %v1161_v13, %v617_v18  ;;  %v620_v23 = vadd.f32 %v1082_v19, %v1530_v16 }
 0x12e   :  { %v786_v24 = vmax.f32 %v737_v22, 0.0  ;;  %v740_v25 = vadd.f32 %v1164_v21, %v620_v23  ;;  %v1083_v26 = vpop.f32.mrb[28].mxu0 }
 0x12f   :  { %v1165_v27 = vpop.f32.mrb[28].mxu1  ;;  %v1084_v28 = vpop.f32.mrb[29].mxu0 }
 0x130   :  { %v1016_v29 = vpack.c.bf16 %v786_v24, %v786_v24  ;;  %v787_v30 = vmax.f32 %v740_v25, 0.0  ;;  %v1085_v31 = vadd.f32 %v1084_v28, %v1083_v26  ;;  %v1166_v32 = vpop.f32.mrb[29].mxu1  ;;  %v1086_v33 = vpop.f32.mrb[30].mxu0 }
 0x131   :  { %v1167_v34 = vadd.f32 %v1166_v32, %v1165_v27  ;;  %v1168_v35 = vpop.f32.mrb[30].mxu1  ;;  %v1087_v36 = vpop.f32.mrb[31].mxu0 }
 0x132   :  { %893 = vst.msk [vmem:[%s1640_s3 + $0x30] sm:$0xf] %vm880_vm0, %v1016_v29  ;;  %v1017_v37 = vpack.c.bf16 %v787_v30, %v787_v30  ;;  %v625_v38 = vadd.f32 %v1085_v31, %v1530_v16  ;;  %v1088_v39 = vadd.f32 %v1087_v36, %v1086_v33  ;;  %v1169_v40 = vpop.f32.mrb[31].mxu1 }
 0x133   :  { %v1170_v41 = vadd.f32 %v1169_v40, %v1168_v35 }
 0x134   :  { %894 = vst.msk [vmem:[%s1640_s3 + $0x34] sm:$0xf] %vm880_vm0, %v1017_v37  ;;  %v745_v42 = vadd.f32 %v1167_v34, %v625_v38  ;;  %v628_v43 = vadd.f32 %v1088_v39, %v1530_v16 }
 0x136   :  { %v788_v44 = vmax.f32 %v745_v42, 0.0  ;;  %v748_v45 = vadd.f32 %v1170_v41, %v628_v43  ;;  %v1089_v46 = vpop.f32.mrb[32].mxu0 }
 0x137   :  { %v1171_v47 = vpop.f32.mrb[32].mxu1  ;;  %v1090_v48 = vpop.f32.mrb[33].mxu0 }
 0x138   :  { %v1018_v49 = vpack.c.bf16 %v788_v44, %v788_v44  ;;  %v789_v50 = vmax.f32 %v748_v45, 0.0  ;;  %v1091_v51 = vadd.f32 %v1090_v48, %v1089_v46  ;;  %v1172_v52 = vpop.f32.mrb[33].mxu1  ;;  %v1092_v53 = vpop.f32.mrb[34].mxu0 }
 0x139   :  { %v1173_v54 = vadd.f32 %v1172_v52, %v1171_v47  ;;  %v1174_v55 = vpop.f32.mrb[34].mxu1  ;;  %v1093_v56 = vpop.f32.mrb[35].mxu0 }
 0x13a   :  { %895 = vst.msk [vmem:[%s1640_s3 + $0x38] sm:$0xf] %vm880_vm0, %v1018_v49  ;;  %v1019_v57 = vpack.c.bf16 %v789_v50, %v789_v50  ;;  %v633_v58 = vadd.f32 %v1091_v51, %v1530_v16  ;;  %v1094_v59 = vadd.f32 %v1093_v56, %v1092_v53  ;;  %v1175_v60 = vpop.f32.mrb[35].mxu1 }
 0x13b   :  { %v1176_v61 = vadd.f32 %v1175_v60, %v1174_v55 }
 0x13c   :  { %896 = vst.msk [vmem:[%s1640_s3 + $0x3c] sm:$0xf] %vm880_vm0, %v1019_v57  ;;  %v753_v62 = vadd.f32 %v1173_v54, %v633_v58  ;;  %v636_v63 = vadd.f32 %v1094_v59, %v1530_v16 }
 0x13e   :  { %v790_v0 = vmax.f32 %v753_v62, 0.0  ;;  %v756_v1 = vadd.f32 %v1176_v61, %v636_v63  ;;  %v1095_v2 = vpop.f32.mrb[36].mxu0 }
 0x13f   :  { %v1177_v3 = vpop.f32.mrb[36].mxu1  ;;  %v1096_v4 = vpop.f32.mrb[37].mxu0 }
 0x140   :  { %v1020_v5 = vpack.c.bf16 %v790_v0, %v790_v0  ;;  %v791_v6 = vmax.f32 %v756_v1, 0.0  ;;  %v1097_v7 = vadd.f32 %v1096_v4, %v1095_v2  ;;  %v1178_v8 = vpop.f32.mrb[37].mxu1  ;;  %v1098_v9 = vpop.f32.mrb[38].mxu0 }
 0x141   :  { %v1179_v10 = vadd.f32 %v1178_v8, %v1177_v3  ;;  %v1180_v11 = vpop.f32.mrb[38].mxu1  ;;  %v1099_v12 = vpop.f32.mrb[39].mxu0 }
 0x142   :  { %897 = vst.msk [vmem:[%s1640_s3 + $0x40] sm:$0xf] %vm880_vm0, %v1020_v5  ;;  %v1021_v13 = vpack.c.bf16 %v791_v6, %v791_v6  ;;  %v641_v14 = vadd.f32 %v1097_v7, %v1530_v16  ;;  %v1100_v15 = vadd.f32 %v1099_v12, %v1098_v9  ;;  %v1181_v17 = vpop.f32.mrb[39].mxu1 }
 0x143   :  { %v1182_v18 = vadd.f32 %v1181_v17, %v1180_v11 }
 0x144   :  { %898 = vst.msk [vmem:[%s1640_s3 + $0x44] sm:$0xf] %vm880_vm0, %v1021_v13  ;;  %v761_v19 = vadd.f32 %v1179_v10, %v641_v14  ;;  %v644_v20 = vadd.f32 %v1100_v15, %v1530_v16 }
 0x146   :  { %v792_v21 = vmax.f32 %v761_v19, 0.0  ;;  %v764_v22 = vadd.f32 %v1182_v18, %v644_v20  ;;  %v1101_v23 = vpop.f32.mrb[40].mxu0 }
 0x147   :  { %v1183_v24 = vpop.f32.mrb[40].mxu1  ;;  %v1102_v25 = vpop.f32.mrb[41].mxu0 }
 0x148   :  { %v1022_v26 = vpack.c.bf16 %v792_v21, %v792_v21  ;;  %v793_v27 = vmax.f32 %v764_v22, 0.0  ;;  %v1103_v28 = vadd.f32 %v1102_v25, %v1101_v23  ;;  %v1184_v29 = vpop.f32.mrb[41].mxu1  ;;  %v1104_v30 = vpop.f32.mrb[42].mxu0 }
 0x149   :  { %v1185_v31 = vadd.f32 %v1184_v29, %v1183_v24  ;;  %v1186_v32 = vpop.f32.mrb[42].mxu1  ;;  %v1105_v33 = vpop.f32.mrb[43].mxu0 }
 0x14a   :  { %899 = vst.msk [vmem:[%s1640_s3 + $0x48] sm:$0xf] %vm880_vm0, %v1022_v26  ;;  %v1023_v34 = vpack.c.bf16 %v793_v27, %v793_v27  ;;  %v649_v35 = vadd.f32 %v1103_v28, %v1530_v16  ;;  %v1187_v36 = vpop.f32.mrb[43].mxu1 }
 0x14c   :  { %900 = vst.msk [vmem:[%s1640_s3 + $0x4c] sm:$0xf] %vm880_vm0, %v1023_v34  ;;  %v769_v37 = vadd.f32 %v1185_v31, %v649_v35 }
 0x14e   :  { %v794_v38 = vmax.f32 %v769_v37, 0.0 }
 0x150   :  { %v1024_v39 = vpack.c.bf16 %v794_v38, %v794_v38 }
 0x152   :  { %901 = vst.msk [vmem:[%s1640_s3 + $0x50] sm:$0xf] %vm880_vm0, %v1024_v39 }

// kernel: q_network_forward.6
= control target key start
LH: loop header
LB: loop body
LE: loop exit
PB: predicated region body
PF: predicated region fallthrough
CT: control target
= control target key end

     0   :  { %v1285_v24 = vmov 0.0   ;;  %vm1286_vm0 = vmmov 0   ;;  %vm885_vm1 = vcmask 519168   ;;  %s1639_s1 = inlined_call_operand.vmem [shape: bf16[640,64], index: 1, kind: input, shape index: {}]   ;;  %s1640_s0 = inlined_call_operand.vmem [shape: bf16[104,640], index: 0, kind: input, shape index: {}]   ;;  %s1641_s2 = inlined_call_operand.vmem [shape: f32[1,64], index: 2, kind: input, shape index: {}]   ;;  %s1642_s3 = inlined_call_operand.vmem [shape: bf16[104,64], index: 3, kind: output, shape index: {}]  }
   0x1   :  { %v1198_v0 = vld [vmem:[%s1639_s1 + $0x40] sm:$0xff]   ;;  %v1200_v2 = vld [vmem:[%s1639_s1 + $0x48] sm:$0xff]   ;;  %v1202_v4 = vld [vmem:[%s1639_s1 + $0x50] sm:$0xff]  }
   0x2   :  { %v1199_v1 = vld [vmem:[%s1639_s1] sm:$0xff]   ;;  %1180 = vmatprep.subr.bf16.mxu1 %v1198_v0  ;;  %1005 = vmatprep.subr.bf16.mxu0 %v1198_v0  ;;  %v1201_v3 = vld [vmem:[%s1639_s1 + $0x8] sm:$0xff]   ;;  %v1203_v5 = vld [vmem:[%s1639_s1 + $0x10] sm:$0xff]  }
   0x3   :  { %1188 = vmatpush3.bf16.msra.mxu1 %v1199_v1  ;;  %1006 = vmatpush3.bf16.msra.mxu0 %v1199_v1  ;;  %v1204_v6 = vld [vmem:[%s1639_s1 + $0x58] sm:$0xff]   ;;  %v1206_v8 = vld [vmem:[%s1639_s1 + $0x60] sm:$0xff]   ;;  %v1208_v10 = vld [vmem:[%s1639_s1 + $0x68] sm:$0xff]  }
   0x4   :  { %1181 = vmatprep.subr.bf16.mxu1 %v1200_v2  ;;  %1007 = vmatprep.subr.bf16.mxu0 %v1200_v2  ;;  %v1205_v7 = vld [vmem:[%s1639_s1 + $0x18] sm:$0xff]   ;;  %v1207_v9 = vld [vmem:[%s1639_s1 + $0x20] sm:$0xff]   ;;  %v1209_v12 = vld [vmem:[%s1639_s1 + $0x28] sm:$0xff]  }
   0x5   :  { %v1216_v11 = vld [vmem:[%s1640_s0 + $0xa4] ss:$20 sps:$4 sm:$0xff]   ;;  %v1210_v14 = vld [vmem:[%s1639_s1 + $0x70] sm:$0xff]   ;;  %v1223_v23 = vld [vmem:[%s1639_s1 + $0xc8] sm:$0xff]  }
   0x6   :  { %v1220_v13 = vld [vmem:[%s1640_s0 + $0x4] ss:$20 sps:$4 sm:$0xff]   ;;  %619 = vmatprep.mubr.bf16.mxu1 %v1216_v11  ;;  %v1211_v15 = vld [vmem:[%s1639_s1 + $0x30] sm:$0xff]   ;;  %v1227_v25 = vld [vmem:[%s1640_s0 + $0x2c] ss:$20 sps:$4 sm:$0xff]  }
   0x7   :  { %1189 = vmatpush3.bf16.msra.mxu1 %v1201_v3  ;;  %1008 = vmatpush3.bf16.msra.mxu0 %v1201_v3  ;;  %v1212_v16 = vld [vmem:[%s1639_s1 + $0x78] sm:$0xff]   ;;  %v1217_v18 = vld [vmem:[%s1639_s1 + $0xc0] sm:$0xff]   ;;  %v1224_v27 = vld [vmem:[%s1639_s1 + $0x88] sm:$0xff]  }
   0x8   :  { %1182 = vmatprep.subr.bf16.mxu1 %v1202_v4  ;;  %1009 = vmatprep.subr.bf16.mxu0 %v1202_v4  ;;  %v1213_v17 = vld [vmem:[%s1639_s1 + $0x38] sm:$0xff]   ;;  %v1214_v19 = vld [vmem:[%s1640_s0 + $0xa0] ss:$20 sps:$4 sm:$0xff]   ;;  %v1225_v28 = vld [vmem:[%s1639_s1 + $0x108] sm:$0xff]  }
   0x9   :  { %587 = vmatprep.mubr.bf16.mxu0 %v1220_v13  ;;  %v1218_v20 = vld [vmem:[%s1640_s0] ss:$20 sps:$4 sm:$0xff]   ;;  %v1230_v31 = vld [vmem:[%s1640_s0 + $0x28] ss:$20 sps:$4 sm:$0xff]   ;;  %v1242_v42 = vld [vmem:[%s1640_s0 + $0x50] ss:$20 sps:$4 sm:$0xff]  }
   0xa   :  { %v1221_v21 = vld [vmem:[%s1639_s1 + $0x80] sm:$0xff]   ;;  %v1226_v29 = vld [vmem:[%s1639_s1 + $0xd0] sm:$0xff]   ;;  %v1235_v32 = vld [vmem:[%s1640_s0 + $0xc8] ss:$20 sps:$4 sm:$0xff]  }
   0xb   :  { %1190 = vmatpush3.bf16.msra.mxu1 %v1203_v5  ;;  %1010 = vmatpush3.bf16.msra.mxu0 %v1203_v5  ;;  %v1222_v22 = vld [vmem:[%s1639_s1 + $0x100] sm:$0xff]   ;;  %v1229_v30 = vld [vmem:[%s1639_s1 + $0x90] sm:$0xff]   ;;  %v1234_v35 = vld [vmem:[%s1639_s1 + $0xd8] sm:$0xff]  }
   0xc   :  { %1183 = vmatprep.subr.bf16.mxu1 %v1204_v6  ;;  %1011 = vmatprep.subr.bf16.mxu0 %v1204_v6  ;;  %v1232_v26 = vld [vmem:[%s1640_s0 + $0xcc] ss:$20 sps:$4 sm:$0xff]   ;;  %v51_v33 = vld [vmem:[%s1640_s0 + $0xf0] sm:$0xff]  ;;  %v1236_v38 = vld [vmem:[%s1639_s1 + $0x98] sm:$0xff]  }
   0xd   :  { %v1231_v34 = vld [vmem:[%s1639_s1 + $0x110] sm:$0xff]   ;;  %v935_v37 = vcombine.high %v51_v33, %v51_v33  ;;  %v1237_v39 = vld [vmem:[%s1639_s1 + $0x118] sm:$0xff]   ;;  %v1238_v40 = vld [vmem:[%s1639_s1 + $0xe0] sm:$0xff]   ;;  %v934_v43 = vcombine.low %v51_v33, %v51_v33 }
   0xe   :  { %v1239_v36 = vld [vmem:[%s1640_s0 + $0x54] ss:$20 sps:$4 sm:$0xff]   ;;  %v1241_v41 = vld [vmem:[%s1639_s1 + $0xa0] sm:$0xff]   ;;  %v1250_v46 = vld [vmem:[%s1640_s0 + $0x7c] ss:$20 sps:$4 sm:$0xff]  }
   0xf   :  { %1191 = vmatpush3.bf16.msra.mxu1 %v1205_v7  ;;  %1012 = vmatpush3.bf16.msra.mxu0 %v1205_v7  ;;  %v1243_v44 = vld [vmem:[%s1639_s1 + $0x120] sm:$0xff]   ;;  %v1245_v45 = vld [vmem:[%s1639_s1 + $0xe8] sm:$0xff]   ;;  %v1249_v50 = vld [vmem:[%s1639_s1 + $0xf0] sm:$0xff]  }
  0x10   :  { %1184 = vmatprep.subr.bf16.mxu1 %v1206_v8  ;;  %1013 = vmatprep.subr.bf16.mxu0 %v1206_v8  ;;  %v1259_v47 = vld [vmem:[%s1640_s0 + $0xc] ss:$20 sps:$4 sm:$0xff]   ;;  %v1252_v51 = vld [vmem:[%s1639_s1 + $0xb0] sm:$0xff]   ;;  %v1255_v54 = vld [vmem:[%s1639_s1 + $0xf8] sm:$0xff]  }
  0x11   :  { %v1247_v48 = vld [vmem:[%s1639_s1 + $0xa8] sm:$0xff]   ;;  %v1254_v53 = vld [vmem:[%s1639_s1 + $0x130] sm:$0xff]   ;;  %v1256_v55 = vld [vmem:[%s1639_s1 + $0xb8] sm:$0xff]  }
  0x12   :  { %v1248_v49 = vld [vmem:[%s1639_s1 + $0x128] sm:$0xff]   ;;  %v1260_v56 = vld [vmem:[%s1639_s1 + $0x138] sm:$0xff]   ;;  %v1261_v58 = vld [vmem:[%s1640_s0 + $0x10] ss:$20 sps:$4 sm:$0xff]  }
  0x13   :  { %1192 = vmatpush3.bf16.msra.mxu1 %v1207_v9  ;;  %1014 = vmatpush3.bf16.msra.mxu0 %v1207_v9  ;;  %v1253_v52 = vld [vmem:[%s1640_s0 + $0x78] ss:$20 sps:$4 sm:$0xff]   ;;  %v1257_v57 = vld [vmem:[%s1640_s0 + $0x8] ss:$20 sps:$4 sm:$0xff]   ;;  %v1264_v60 = vld [vmem:[%s1640_s0 + $0x30] ss:$20 sps:$4 sm:$0xff]  }
  0x14   :  { %1185 = vmatprep.subr.bf16.mxu1 %v1208_v10  ;;  %1015 = vmatprep.subr.bf16.mxu0 %v1208_v10  ;;  %v1262_v59 = vld [vmem:[%s1640_s0 + $0x34] ss:$20 sps:$4 sm:$0xff]   ;;  %v1265_v61 = vld [vmem:[%s1640_s0 + $0x38] ss:$20 sps:$4 sm:$0xff]   ;;  %v1266_v62 = vld [vmem:[%s1640_s0 + $0x5c] ss:$20 sps:$4 sm:$0xff]  }
  0x15   :  { %v1268_v63 = vld [vmem:[%s1640_s0 + $0x58] ss:$20 sps:$4 sm:$0xff]   ;;  %v1269_v0 = vld [vmem:[%s1640_s0 + $0x60] ss:$20 sps:$4 sm:$0xff]   ;;  %v1273_v3 = vld [vmem:[%s1640_s0 + $0x88] ss:$20 sps:$4 sm:$0xff]  }
  0x16   :  { %v1270_v1 = vld [vmem:[%s1640_s0 + $0x84] ss:$20 sps:$4 sm:$0xff]   ;;  %v1272_v2 = vld [vmem:[%s1640_s0 + $0x80] ss:$20 sps:$4 sm:$0xff]   ;;  %v1276_v5 = vld [vmem:[%s1640_s0 + $0xa8] ss:$20 sps:$4 sm:$0xff]  }
  0x17   :  { %1193 = vmatpush3.bf16.msra.mxu1 %v1209_v12  ;;  %1016 = vmatpush3.bf16.msra.mxu0 %v1209_v12  ;;  %v1274_v4 = vld [vmem:[%s1640_s0 + $0xac] ss:$20 sps:$4 sm:$0xff]   ;;  %v1277_v6 = vld [vmem:[%s1640_s0 + $0xb0] ss:$20 sps:$4 sm:$0xff]   ;;  %v1278_v7 = vld [vmem:[%s1640_s0 + $0xd4] ss:$20 sps:$4 sm:$0xff]  }
  0x18   :  { %1186 = vmatprep.subr.bf16.mxu1 %v1210_v14  ;;  %1017 = vmatprep.subr.bf16.mxu0 %v1210_v14  ;;  %v52_v8 = vld [vmem:[%s1640_s0 + $0xf8] sm:$0xff]  ;;  %v1280_v9 = vld [vmem:[%s1640_s0 + $0xd0] ss:$20 sps:$4 sm:$0xff]   ;;  %v1284_v13 = vld [vmem:[%s1640_s0 + $0x100] ss:$0 sps:$4 sm:$0xff]  }
  0x19   :  { %v1281_v10 = vld [vmem:[%s1640_s0 + $0xd8] ss:$20 sps:$4 sm:$0xff]   ;;  %v937_v11 = vcombine.high %v52_v8, %v52_v8  ;;  %v936_v12 = vcombine.low %v52_v8, %v52_v8 }
  0x1b   :  { %1194 = vmatpush3.bf16.msra.mxu1 %v1211_v15  ;;  %1018 = vmatpush3.bf16.msra.mxu0 %v1211_v15 }
  0x1c   :  { %1187 = vmatprep.subr.bf16.mxu1 %v1212_v16  ;;  %1019 = vmatprep.subr.bf16.mxu0 %v1212_v16 }
  0x1f   :  { %1195 = vmatpush3.bf16.msra.mxu1 %v1213_v17  ;;  %1020 = vmatpush3.bf16.msra.mxu0 %v1213_v17 }
  0x20   :  { %1063 = vmatprep.subr.bf16.mxu1 %v1217_v18  ;;  %1136 = vmatprep.subr.bf16.mxu0 %v1285_v24 }
  0x22   :  { %620 = vmatmul.mubr.bf16.vlgmr.msra.gmra.mrb[0].mxu1 %v1214_v19  ;;  %588 = vmatmul.mubr.bf16.vlgmr.msra.gmra.mrb[0].mxu0 %v1218_v20 }
  0x23   :  { %1064 = vmatpush3.bf16.msra.mxu1 %v1221_v21  ;;  %1137 = vmatpush3.bf16.msra.mxu0 %v1222_v22 }
  0x24   :  { %1065 = vmatprep.subr.bf16.mxu1 %v1223_v23  ;;  %1138 = vmatprep.subr.bf16.mxu0 %v1285_v24 }
  0x25   :  { %595 = vmatprep.mubr.bf16.mxu0 %v1227_v25  ;;  %627 = vmatprep.mubr.bf16.mxu1 %v1232_v26 }
  0x27   :  { %1066 = vmatpush3.bf16.msra.mxu1 %v1224_v27  ;;  %1139 = vmatpush3.bf16.msra.mxu0 %v1225_v28 }
  0x28   :  { %1067 = vmatprep.subr.bf16.mxu1 %v1226_v29  ;;  %1140 = vmatprep.subr.bf16.mxu0 %v1285_v24 }
  0x2a   :  { %596 = vmatmul.mubr.bf16.gmra.mrb[4].mxu0 %v1230_v31  ;;  %628 = vmatmul.mubr.bf16.gmra.mrb[4].mxu1 %v1235_v32 }
  0x2b   :  { %1068 = vmatpush3.bf16.msra.mxu1 %v1229_v30  ;;  %1141 = vmatpush3.bf16.msra.mxu0 %v1231_v34 }
  0x2c   :  { %1069 = vmatprep.subr.bf16.mxu1 %v1234_v35  ;;  %1142 = vmatprep.subr.bf16.mxu0 %v1285_v24 }
  0x2d   :  { %603 = vmatprep.mubr.bf16.mxu0 %v1239_v36  ;;  %635 = vmatprep.mubr.bf16.mxu1 %v935_v37 }
  0x2f   :  { %1070 = vmatpush3.bf16.msra.mxu1 %v1236_v38  ;;  %1143 = vmatpush3.bf16.msra.mxu0 %v1237_v39 }
  0x30   :  { %1071 = vmatprep.subr.bf16.mxu1 %v1238_v40  ;;  %1144 = vmatprep.subr.bf16.mxu0 %v1285_v24 }
  0x32   :  { %604 = vmatmul.mubr.bf16.gmra.mrb[8].mxu0 %v1242_v42  ;;  %636 = vmatmul.mubr.bf16.gmra.mrb[8].mxu1 %v934_v43 }
  0x33   :  { %1072 = vmatpush3.bf16.msra.mxu1 %v1241_v41  ;;  %1145 = vmatpush3.bf16.msra.mxu0 %v1243_v44 }
  0x34   :  { %1073 = vmatprep.subr.bf16.mxu1 %v1245_v45  ;;  %1146 = vmatprep.subr.bf16.mxu0 %v1285_v24 }
  0x35   :  { %611 = vmatprep.mubr.bf16.mxu0 %v1250_v46  ;;  %675 = vmatprep.mubr.bf16.mxu1 %v1259_v47 }
  0x37   :  { %1074 = vmatpush3.bf16.msra.mxu1 %v1247_v48  ;;  %1147 = vmatpush3.bf16.msra.mxu0 %v1248_v49 }
  0x38   :  { %1075 = vmatprep.subr.bf16.mxu1 %v1249_v50  ;;  %1148 = vmatprep.subr.bf16.mxu0 %v1285_v24 }
  0x3a   :  { %612 = vmatmul.mubr.bf16.gmra.mrb[12].mxu0 %v1253_v52 }
  0x3b   :  { %1076 = vmatpush3.bf16.msra.mxu1 %v1252_v51  ;;  %1149 = vmatpush3.bf16.msra.mxu0 %v1254_v53 }
  0x3c   :  { %1077 = vmatprep.subr.bf16.mxu1 %v1255_v54  ;;  %1150 = vmatprep.subr.bf16.mxu0 %v1285_v24 }
  0x3d   :  { %1152 = vmatprep.mubr.msk.bf16.mxu0 %vm1286_vm0, %v1285_v24 }
  0x3f   :  { %1078 = vmatpush3.bf16.msra.mxu1 %v1256_v55  ;;  %1151 = vmatpush3.bf16.msra.mxu0 %v1260_v56 }
  0x42   :  { %676 = vmatmul.mubr.bf16.vlgmr.msra.gmra.mrb[12].mxu1 %v1257_v57  ;;  %1153 = vmatmul.mubr.bf16.vlgmr.msra.gmra.mrb[16].mxu0 %v1261_v58  ;;  %v1565_v57 = vld [vmem:[%s1641_s2] ss:$0 sm:$0xff] }
  0x43   :  { %683 = vmatprep.mubr.bf16.mxu1 %v1262_v59  ;;  %1156 = vmatprep.mubr.msk.bf16.mxu0 %vm1286_vm0, %v1285_v24 }
  0x4a   :  { %684 = vmatmul.mubr.bf16.gmra.mrb[16].mxu1 %v1264_v60  ;;  %1157 = vmatmul.mubr.bf16.gmra.mrb[20].mxu0 %v1265_v61 }
  0x4b   :  { %691 = vmatprep.mubr.bf16.mxu1 %v1266_v62  ;;  %1160 = vmatprep.mubr.msk.bf16.mxu0 %vm1286_vm0, %v1285_v24 }
  0x52   :  { %692 = vmatmul.mubr.bf16.gmra.mrb[20].mxu1 %v1268_v63  ;;  %1161 = vmatmul.mubr.bf16.gmra.mrb[24].mxu0 %v1269_v0 }
  0x53   :  { %699 = vmatprep.mubr.bf16.mxu1 %v1270_v1  ;;  %1164 = vmatprep.mubr.msk.bf16.mxu0 %vm1286_vm0, %v1285_v24 }
  0x5a   :  { %700 = vmatmul.mubr.bf16.gmra.mrb[24].mxu1 %v1272_v2  ;;  %1165 = vmatmul.mubr.bf16.gmra.mrb[28].mxu0 %v1273_v3 }
  0x5b   :  { %707 = vmatprep.mubr.bf16.mxu1 %v1274_v4  ;;  %1168 = vmatprep.mubr.msk.bf16.mxu0 %vm1286_vm0, %v1285_v24 }
  0x62   :  { %708 = vmatmul.mubr.bf16.gmra.mrb[28].mxu1 %v1276_v5  ;;  %1169 = vmatmul.mubr.bf16.gmra.mrb[32].mxu0 %v1277_v6 }
  0x63   :  { %715 = vmatprep.mubr.bf16.mxu1 %v1278_v7  ;;  %1172 = vmatprep.mubr.msk.bf16.mxu0 %vm1286_vm0, %v1285_v24 }
  0x6a   :  { %716 = vmatmul.mubr.bf16.gmra.mrb[32].mxu1 %v1280_v9  ;;  %1173 = vmatmul.mubr.bf16.gmra.mrb[36].mxu0 %v1281_v10 }
  0x6b   :  { %723 = vmatprep.mubr.bf16.mxu1 %v937_v11  ;;  %1176 = vmatprep.mubr.msk.bf16.mxu0 %vm1286_vm0, %v1285_v24 }
  0x72   :  { %724 = vmatmul.mubr.bf16.gmra.mrb[36].mxu1 %v936_v12  ;;  %1177 = vmatmul.mubr.bf16.gmra.mrb[40].mxu0 %v1284_v13 }
  0xf5   :  { %v1045_v14 = vpop.f32.mrb[0].mxu1  ;;  %v1021_v15 = vpop.f32.mrb[0].mxu0 }
  0xf6   :  { %v1046_v16 = vpop.f32.mrb[1].mxu1  ;;  %v1022_v17 = vpop.f32.mrb[1].mxu0 }
  0xf7   :  { %v1548_v18 = vadd.f32 %v1046_v16, %v1045_v14  ;;  %v1048_v19 = vpop.f32.mrb[2].mxu1  ;;  %v1023_v20 = vadd.f32 %v1022_v17, %v1021_v15  ;;  %v1024_v21 = vpop.f32.mrb[2].mxu0 }
  0xf8   :  { %v1049_v22 = vpop.f32.mrb[3].mxu1  ;;  %v1025_v23 = vpop.f32.mrb[3].mxu0 }
  0xf9   :  { %v1550_v25 = vadd.f32 %v1049_v22, %v1048_v19  ;;  %v1026_v24 = vadd.f32 %v1025_v23, %v1024_v21  ;;  %v590_v60 = vadd.f32 %v1023_v20, %v1565_v57 }
  0xfb   :  { %v593_v2 = vadd.f32 %v1026_v24, %v1565_v57 }
  0xfd   :  { %v1027_v26 = vpop.f32.mrb[4].mxu0  ;;  %v1051_v27 = vpop.f32.mrb[4].mxu1 }
  0xfe   :  { %v1028_v28 = vpop.f32.mrb[5].mxu0  ;;  %v1052_v29 = vpop.f32.mrb[5].mxu1 }
  0xff   :  { %v1029_v30 = vadd.f32 %v1028_v28, %v1027_v26  ;;  %v1030_v31 = vpop.f32.mrb[6].mxu0  ;;  %v1552_v32 = vadd.f32 %v1052_v29, %v1051_v27  ;;  %v1054_v33 = vpop.f32.mrb[6].mxu1 }
 0x100   :  { %v1031_v34 = vpop.f32.mrb[7].mxu0  ;;  %v1055_v35 = vpop.f32.mrb[7].mxu1 }
 0x101   :  { %v1032_v36 = vadd.f32 %v1031_v34, %v1030_v31  ;;  %v1554_v37 = vadd.f32 %v1055_v35, %v1054_v33  ;;  %v598_v13 = vadd.f32 %v1029_v30, %v1565_v57 }
 0x103   :  { %v601_v22 = vadd.f32 %v1032_v36, %v1565_v57 }
 0x105   :  { %v1033_v38 = vpop.f32.mrb[8].mxu0  ;;  %v1057_v39 = vpop.f32.mrb[8].mxu1 }
 0x106   :  { %v1034_v40 = vpop.f32.mrb[9].mxu0  ;;  %v1058_v41 = vpop.f32.mrb[9].mxu1 }
 0x107   :  { %v1035_v42 = vadd.f32 %v1034_v40, %v1033_v38  ;;  %v1036_v43 = vpop.f32.mrb[10].mxu0  ;;  %v1556_v44 = vadd.f32 %v1058_v41, %v1057_v39  ;;  %v1060_v45 = vpop.f32.mrb[10].mxu1 }
 0x108   :  { %v1037_v46 = vpop.f32.mrb[11].mxu0  ;;  %v1061_v47 = vpop.f32.mrb[11].mxu1 }
 0x109   :  { %v1038_v48 = vadd.f32 %v1037_v46, %v1036_v43  ;;  %v606_v36 = vadd.f32 %v1035_v42, %v1565_v57 }
 0x10b   :  { %v609_v47 = vadd.f32 %v1038_v48, %v1565_v57 }
 0x10d   :  { %v1039_v49 = vpop.f32.mrb[12].mxu0 }
 0x10e   :  { %v1040_v50 = vpop.f32.mrb[13].mxu0 }
 0x10f   :  { %v1558_v51 = vadd.f32 %v1040_v50, %v1039_v49  ;;  %v1042_v52 = vpop.f32.mrb[14].mxu0 }
 0x110   :  { %v1043_v53 = vpop.f32.mrb[15].mxu0 }
 0x111   :  { %v1560_v54 = vadd.f32 %v1043_v53, %v1042_v52 }
 0x115   :  { %v1079_v55 = vpop.f32.mrb[12].mxu1  ;;  %v765_v56 = vpop.f32.mrb[16].mxu0 }
 0x116   :  { %v1080_v58 = vpop.f32.mrb[13].mxu1  ;;  %v1154_v59 = vpop.f32.mrb[17].mxu0 }
 0x117   :  { %v1081_v61 = vadd.f32 %v1080_v58, %v1079_v55  ;;  %v1082_v62 = vpop.f32.mrb[14].mxu1  ;;  %v768_v63 = vpop.f32.mrb[18].mxu0 }
 0x118   :  { %v1083_v0 = vpop.f32.mrb[15].mxu1  ;;  %v1155_v1 = vpop.f32.mrb[19].mxu0 }
 0x119   :  { %v678_v3 = vadd.f32 %v1081_v61, %v590_v60  ;;  %v1084_v4 = vadd.f32 %v1083_v0, %v1082_v62  ;;  %v614_v61 = vadd.f32 %v1558_v51, %v1565_v57 }
 0x11b   :  { %v766_v5 = vadd.f32 %v765_v56, %v678_v3  ;;  %v681_v6 = vadd.f32 %v1084_v4, %v593_v2 }
 0x11d   :  { %v819_v7 = vmax.f32 %v766_v5, 0.0  ;;  %v769_v8 = vadd.f32 %v768_v63, %v681_v6  ;;  %v1085_v9 = vpop.f32.mrb[16].mxu1  ;;  %v773_v10 = vpop.f32.mrb[20].mxu0  ;;  %v617_v5 = vadd.f32 %v1560_v54, %v1565_v57 }
 0x11e   :  { %v1086_v11 = vpop.f32.mrb[17].mxu1  ;;  %v1158_v12 = vpop.f32.mrb[21].mxu0 }
 0x11f   :  { %v992_v14 = vpack.c.bf16 %v819_v7, %v819_v7  ;;  %v820_v15 = vmax.f32 %v769_v8, 0.0  ;;  %v1087_v16 = vadd.f32 %v1086_v11, %v1085_v9  ;;  %v1088_v17 = vpop.f32.mrb[18].mxu1  ;;  %v776_v19 = vpop.f32.mrb[22].mxu0 }
 0x120   :  { %v1089_v20 = vpop.f32.mrb[19].mxu1  ;;  %v1159_v21 = vpop.f32.mrb[23].mxu0 }
 0x121   :  { %886 = vst.msk [vmem:[%s1642_s3] sm:$0xf] %vm885_vm1, %v992_v14  ;;  %v993_v23 = vpack.c.bf16 %v820_v15, %v820_v15  ;;  %v686_v24 = vadd.f32 %v1087_v16, %v598_v13  ;;  %v1090_v26 = vadd.f32 %v1089_v20, %v1088_v17  ;;  %v622_v15 = vadd.f32 %v1548_v18, %v1565_v57 }
 0x123   :  { %887 = vst.msk [vmem:[%s1642_s3 + $0x4] sm:$0xf] %vm885_vm1, %v993_v23  ;;  %v774_v27 = vadd.f32 %v773_v10, %v686_v24  ;;  %v689_v28 = vadd.f32 %v1090_v26, %v601_v22  ;;  %v625_v24 = vadd.f32 %v1550_v25, %v1565_v57 }
 0x125   :  { %v821_v29 = vmax.f32 %v774_v27, 0.0  ;;  %v777_v30 = vadd.f32 %v776_v19, %v689_v28  ;;  %v1091_v31 = vpop.f32.mrb[20].mxu1  ;;  %v781_v33 = vpop.f32.mrb[24].mxu0 }
 0x126   :  { %v1092_v34 = vpop.f32.mrb[21].mxu1  ;;  %v1162_v35 = vpop.f32.mrb[25].mxu0 }
 0x127   :  { %v994_v38 = vpack.c.bf16 %v821_v29, %v821_v29  ;;  %v822_v39 = vmax.f32 %v777_v30, 0.0  ;;  %v1093_v40 = vadd.f32 %v1092_v34, %v1091_v31  ;;  %v1094_v41 = vpop.f32.mrb[22].mxu1  ;;  %v784_v43 = vpop.f32.mrb[26].mxu0 }
 0x128   :  { %v1095_v45 = vpop.f32.mrb[23].mxu1  ;;  %v1163_v46 = vpop.f32.mrb[27].mxu0 }
 0x129   :  { %888 = vst.msk [vmem:[%s1642_s3 + $0x8] sm:$0xf] %vm885_vm1, %v994_v38  ;;  %v995_v49 = vpack.c.bf16 %v822_v39, %v822_v39  ;;  %v694_v50 = vadd.f32 %v1093_v40, %v606_v36  ;;  %v1096_v52 = vadd.f32 %v1095_v45, %v1094_v41  ;;  %v630_v36 = vadd.f32 %v1552_v32, %v1565_v57 }
 0x12b   :  { %889 = vst.msk [vmem:[%s1642_s3 + $0xc] sm:$0xf] %vm885_vm1, %v995_v49  ;;  %v782_v42 = vadd.f32 %v781_v33, %v694_v50  ;;  %v697_v53 = vadd.f32 %v1096_v52, %v609_v47  ;;  %v633_v47 = vadd.f32 %v1554_v37, %v1565_v57 }
 0x12d   :  { %v823_v55 = vmax.f32 %v782_v42, 0.0  ;;  %v785_v56 = vadd.f32 %v784_v43, %v697_v53  ;;  %v1097_v58 = vpop.f32.mrb[24].mxu1  ;;  %v789_v59 = vpop.f32.mrb[28].mxu0 }
 0x12e   :  { %v1098_v48 = vpop.f32.mrb[25].mxu1  ;;  %v1166_v60 = vpop.f32.mrb[29].mxu0 }
 0x12f   :  { %v996_v62 = vpack.c.bf16 %v823_v55, %v823_v55  ;;  %v824_v63 = vmax.f32 %v785_v56, 0.0  ;;  %v1099_v0 = vadd.f32 %v1098_v48, %v1097_v58  ;;  %v1100_v1 = vpop.f32.mrb[26].mxu1  ;;  %v792_v2 = vpop.f32.mrb[30].mxu0  ;;  %v638_v48 = vadd.f32 %v1556_v44, %v1565_v57 }
 0x130   :  { %v1101_v3 = vpop.f32.mrb[27].mxu1  ;;  %v1167_v4 = vpop.f32.mrb[31].mxu0 }
 0x131   :  { %890 = vst.msk [vmem:[%s1642_s3 + $0x10] sm:$0xf] %vm885_vm1, %v996_v62  ;;  %v997_v6 = vpack.c.bf16 %v824_v63, %v824_v63  ;;  %v702_v7 = vadd.f32 %v1099_v0, %v614_v61  ;;  %v1102_v8 = vadd.f32 %v1101_v3, %v1100_v1 }
 0x133   :  { %891 = vst.msk [vmem:[%s1642_s3 + $0x14] sm:$0xf] %vm885_vm1, %v997_v6  ;;  %v790_v51 = vadd.f32 %v789_v59, %v702_v7  ;;  %v705_v9 = vadd.f32 %v1102_v8, %v617_v5 }
 0x135   :  { %v825_v10 = vmax.f32 %v790_v51, 0.0  ;;  %v793_v11 = vadd.f32 %v792_v2, %v705_v9  ;;  %v1103_v12 = vpop.f32.mrb[28].mxu1  ;;  %v797_v13 = vpop.f32.mrb[32].mxu0 }
 0x136   :  { %v1104_v54 = vpop.f32.mrb[29].mxu1  ;;  %v1170_v14 = vpop.f32.mrb[33].mxu0 }
 0x137   :  { %v998_v16 = vpack.c.bf16 %v825_v10, %v825_v10  ;;  %v826_v17 = vmax.f32 %v793_v11, 0.0  ;;  %v1105_v19 = vadd.f32 %v1104_v54, %v1103_v12  ;;  %v1106_v20 = vpop.f32.mrb[30].mxu1  ;;  %v800_v21 = vpop.f32.mrb[34].mxu0 }
 0x138   :  { %v1107_v22 = vpop.f32.mrb[31].mxu1  ;;  %v1171_v23 = vpop.f32.mrb[35].mxu0 }
 0x139   :  { %892 = vst.msk [vmem:[%s1642_s3 + $0x18] sm:$0xf] %vm885_vm1, %v998_v16  ;;  %v999_v26 = vpack.c.bf16 %v826_v17, %v826_v17  ;;  %v710_v27 = vadd.f32 %v1105_v19, %v622_v15  ;;  %v1108_v28 = vadd.f32 %v1107_v22, %v1106_v20 }
 0x13b   :  { %893 = vst.msk [vmem:[%s1642_s3 + $0x1c] sm:$0xf] %vm885_vm1, %v999_v26  ;;  %v798_v18 = vadd.f32 %v797_v13, %v710_v27  ;;  %v713_v29 = vadd.f32 %v1108_v28, %v625_v24 }
 0x13d   :  { %v827_v30 = vmax.f32 %v798_v18, 0.0  ;;  %v801_v31 = vadd.f32 %v800_v21, %v713_v29  ;;  %v1109_v33 = vpop.f32.mrb[32].mxu1  ;;  %v805_v34 = vpop.f32.mrb[36].mxu0 }
 0x13e   :  { %v1110_v25 = vpop.f32.mrb[33].mxu1  ;;  %v1174_v35 = vpop.f32.mrb[37].mxu0 }
 0x13f   :  { %v1000_v38 = vpack.c.bf16 %v827_v30, %v827_v30  ;;  %v828_v39 = vmax.f32 %v801_v31, 0.0  ;;  %v1111_v40 = vadd.f32 %v1110_v25, %v1109_v33  ;;  %v1112_v41 = vpop.f32.mrb[34].mxu1  ;;  %v808_v43 = vpop.f32.mrb[38].mxu0 }
 0x140   :  { %v1113_v45 = vpop.f32.mrb[35].mxu1  ;;  %v1175_v46 = vpop.f32.mrb[39].mxu0 }
 0x141   :  { %894 = vst.msk [vmem:[%s1642_s3 + $0x20] sm:$0xf] %vm885_vm1, %v1000_v38  ;;  %v1001_v49 = vpack.c.bf16 %v828_v39, %v828_v39  ;;  %v718_v50 = vadd.f32 %v1111_v40, %v630_v36  ;;  %v1114_v52 = vadd.f32 %v1113_v45, %v1112_v41 }
 0x143   :  { %895 = vst.msk [vmem:[%s1642_s3 + $0x24] sm:$0xf] %vm885_vm1, %v1001_v49  ;;  %v806_v32 = vadd.f32 %v805_v34, %v718_v50  ;;  %v721_v42 = vadd.f32 %v1114_v52, %v633_v47 }
 0x145   :  { %v829_v53 = vmax.f32 %v806_v32, 0.0  ;;  %v809_v55 = vadd.f32 %v808_v43, %v721_v42  ;;  %v1115_v56 = vpop.f32.mrb[36].mxu1  ;;  %v813_v58 = vpop.f32.mrb[40].mxu0 }
 0x146   :  { %v1116_v37 = vpop.f32.mrb[37].mxu1  ;;  %v1178_v59 = vpop.f32.mrb[41].mxu0 }
 0x147   :  { %v1002_v60 = vpack.c.bf16 %v829_v53, %v829_v53  ;;  %v830_v61 = vmax.f32 %v809_v55, 0.0  ;;  %v1117_v62 = vadd.f32 %v1116_v37, %v1115_v56  ;;  %v1118_v63 = vpop.f32.mrb[38].mxu1  ;;  %v816_v0 = vpop.f32.mrb[42].mxu0 }
 0x148   :  { %v1119_v1 = vpop.f32.mrb[39].mxu1  ;;  %v1179_v2 = vpop.f32.mrb[43].mxu0 }
 0x149   :  { %896 = vst.msk [vmem:[%s1642_s3 + $0x28] sm:$0xf] %vm885_vm1, %v1002_v60  ;;  %v1003_v3 = vpack.c.bf16 %v830_v61, %v830_v61  ;;  %v726_v4 = vadd.f32 %v1117_v62, %v638_v48 }
 0x14b   :  { %897 = vst.msk [vmem:[%s1642_s3 + $0x2c] sm:$0xf] %vm885_vm1, %v1003_v3  ;;  %v814_v44 = vadd.f32 %v813_v58, %v726_v4 }
 0x14d   :  { %v831_v57 = vmax.f32 %v814_v44, 0.0 }
 0x14f   :  { %v1004_v5 = vpack.c.bf16 %v831_v57, %v831_v57 }
 0x151   :  { %898 = vst.msk [vmem:[%s1642_s3 + $0x30] sm:$0xf] %vm885_vm1, %v1004_v5 }

// kernel: q_network_forward.7
= control target key start
LH: loop header
LB: loop body
LE: loop exit
PB: predicated region body
PF: predicated region fallthrough
CT: control target
= control target key end

     0   :  { %vm6361_vm0 = vcmask 48128   ;;  %s11268_s1 = inlined_call_operand.vmem [shape: bf16[3200,512], index: 1, kind: input, shape index: {}]   ;;  %s11269_s0 = inlined_call_operand.vmem [shape: bf16[8,3200], index: 0, kind: input, shape index: {}]   ;;  %s11270_s3 = inlined_call_operand.vmem [shape: bf16[512,6], index: 3, kind: input, shape index: {}]   ;;  %s11271_s2 = inlined_call_operand.vmem [shape: f32[1,512], index: 2, kind: input, shape index: {}]   ;;  %s11272_s4 = inlined_call_operand.vmem [shape: f32[1,6], index: 4, kind: input, shape index: {}]   ;;  %s11273_s5 = inlined_call_operand.vmem [shape: f32[8,6], index: 5, kind: output, shape index: {}]  }
   0x1   :  { %v7370_v0 = vld [vmem:[%s11268_s1 + $0x4] ss:$16 sps:$4 sm:$0xff]   ;;  %v7372_v1 = vld [vmem:[%s11268_s1 + $0xc] ss:$16 sps:$4 sm:$0xff]   ;;  %v7374_v2 = vld [vmem:[%s11268_s1] ss:$16 sps:$4 sm:$0xff]  }
   0x2   :  { %4944 = vmatprep.subr.bf16.mxu0 %v7370_v0  ;;  %v7375_v3 = vld [vmem:[%s11268_s1 + $0x8] ss:$16 sps:$4 sm:$0xff]   ;;  %5477 = vmatprep.subr.bf16.mxu1 %v7372_v1  ;;  %v7376_v4 = vld [vmem:[%s11268_s1 + $0x24] ss:$16 sps:$4 sm:$0xff]   ;;  %v7378_v5 = vld [vmem:[%s11268_s1 + $0x2c] ss:$16 sps:$4 sm:$0xff]  }
   0x3   :  { %4945 = vmatpush1.bf16.msra.mxu0 %v7374_v2  ;;  %5478 = vmatpush1.bf16.msra.mxu1 %v7375_v3  ;;  %v7380_v6 = vld [vmem:[%s11268_s1 + $0x20] ss:$16 sps:$4 sm:$0xff]   ;;  %v7381_v7 = vld [vmem:[%s11268_s1 + $0x28] ss:$16 sps:$4 sm:$0xff]   ;;  %v7382_v8 = vld [vmem:[%s11268_s1 + $0x44] ss:$16 sps:$4 sm:$0xff]  }
   0x4   :  { %4946 = vmatprep.subr.bf16.mxu0 %v7376_v4  ;;  %5479 = vmatprep.subr.bf16.mxu1 %v7378_v5  ;;  %v7384_v9 = vld [vmem:[%s11268_s1 + $0x4c] ss:$16 sps:$4 sm:$0xff]   ;;  %v7386_v10 = vld [vmem:[%s11268_s1 + $0x40] ss:$16 sps:$4 sm:$0xff]   ;;  %v7387_v11 = vld [vmem:[%s11268_s1 + $0x48] ss:$16 sps:$4 sm:$0xff]  }
   0x5   :  { %v7388_v12 = vld [vmem:[%s11268_s1 + $0x64] ss:$16 sps:$4 sm:$0xff]   ;;  %v7390_v13 = vld [vmem:[%s11268_s1 + $0x6c] ss:$16 sps:$4 sm:$0xff]   ;;  %v7392_v14 = vld [vmem:[%s11268_s1 + $0x60] ss:$16 sps:$4 sm:$0xff]  }
   0x6   :  { %v7393_v15 = vld [vmem:[%s11268_s1 + $0x68] ss:$16 sps:$4 sm:$0xff]   ;;  %v7394_v16 = vld [vmem:[%s11268_s1 + $0x84] ss:$16 sps:$4 sm:$0xff]   ;;  %v7396_v17 = vld [vmem:[%s11268_s1 + $0x8c] ss:$16 sps:$4 sm:$0xff]  }
   0x7   :  { %4947 = vmatpush1.bf16.msra.mxu0 %v7380_v6  ;;  %5480 = vmatpush1.bf16.msra.mxu1 %v7381_v7  ;;  %v7398_v18 = vld [vmem:[%s11268_s1 + $0x80] ss:$16 sps:$4 sm:$0xff]   ;;  %v7399_v19 = vld [vmem:[%s11268_s1 + $0x88] ss:$16 sps:$4 sm:$0xff]   ;;  %v7400_v20 = vld [vmem:[%s11268_s1 + $0xa4] ss:$16 sps:$4 sm:$0xff]  }
   0x8   :  { %4948 = vmatprep.subr.bf16.mxu0 %v7382_v8  ;;  %5481 = vmatprep.subr.bf16.mxu1 %v7384_v9  ;;  %v7402_v21 = vld [vmem:[%s11268_s1 + $0xac] ss:$16 sps:$4 sm:$0xff]   ;;  %v7404_v22 = vld [vmem:[%s11268_s1 + $0xa0] ss:$16 sps:$4 sm:$0xff]   ;;  %v7405_v23 = vld [vmem:[%s11268_s1 + $0xa8] ss:$16 sps:$4 sm:$0xff]  }
   0x9   :  { %v7406_v24 = vld [vmem:[%s11268_s1 + $0xc4] ss:$16 sps:$4 sm:$0xff]   ;;  %v7408_v25 = vld [vmem:[%s11268_s1 + $0xcc] ss:$16 sps:$4 sm:$0xff]   ;;  %v7410_v26 = vld [vmem:[%s11268_s1 + $0xc0] ss:$16 sps:$4 sm:$0xff]  }
   0xa   :  { %v7411_v27 = vld [vmem:[%s11268_s1 + $0xc8] ss:$16 sps:$4 sm:$0xff]   ;;  %v7412_v28 = vld [vmem:[%s11268_s1 + $0xe4] ss:$16 sps:$4 sm:$0xff]   ;;  %v7414_v29 = vld [vmem:[%s11268_s1 + $0xec] ss:$16 sps:$4 sm:$0xff]  }
   0xb   :  { %4949 = vmatpush1.bf16.msra.mxu0 %v7386_v10  ;;  %5482 = vmatpush1.bf16.msra.mxu1 %v7387_v11  ;;  %v7416_v30 = vld [vmem:[%s11268_s1 + $0xe0] ss:$16 sps:$4 sm:$0xff]   ;;  %v7417_v31 = vld [vmem:[%s11268_s1 + $0xe8] ss:$16 sps:$4 sm:$0xff]   ;;  %v7418_v32 = vld [vmem:[%s11268_s1 + $0x104] ss:$16 sps:$4 sm:$0xff]  }
   0xc   :  { %4950 = vmatprep.subr.bf16.mxu0 %v7388_v12  ;;  %5483 = vmatprep.subr.bf16.mxu1 %v7390_v13  ;;  %v7420_v33 = vld [vmem:[%s11268_s1 + $0x10c] ss:$16 sps:$4 sm:$0xff]   ;;  %v7422_v34 = vld [vmem:[%s11268_s1 + $0x100] ss:$16 sps:$4 sm:$0xff]   ;;  %v7423_v35 = vld [vmem:[%s11268_s1 + $0x108] ss:$16 sps:$4 sm:$0xff]  }
   0xd   :  { %v7424_v36 = vld [vmem:[%s11268_s1 + $0x124] ss:$16 sps:$4 sm:$0xff]   ;;  %v7426_v37 = vld [vmem:[%s11268_s1 + $0x12c] ss:$16 sps:$4 sm:$0xff]   ;;  %v7428_v38 = vld [vmem:[%s11268_s1 + $0x120] ss:$16 sps:$4 sm:$0xff]  }
   0xe   :  { %v7429_v39 = vld [vmem:[%s11268_s1 + $0x128] ss:$16 sps:$4 sm:$0xff]   ;;  %v7430_v40 = vld [vmem:[%s11268_s1 + $0x144] ss:$16 sps:$4 sm:$0xff]   ;;  %v7432_v41 = vld [vmem:[%s11268_s1 + $0x14c] ss:$16 sps:$4 sm:$0xff]  }
   0xf   :  { %4951 = vmatpush1.bf16.msra.mxu0 %v7392_v14  ;;  %5484 = vmatpush1.bf16.msra.mxu1 %v7393_v15  ;;  %v7434_v42 = vld [vmem:[%s11268_s1 + $0x140] ss:$16 sps:$4 sm:$0xff]   ;;  %v7435_v43 = vld [vmem:[%s11268_s1 + $0x148] ss:$16 sps:$4 sm:$0xff]   ;;  %v7436_v44 = vld [vmem:[%s11268_s1 + $0x164] ss:$16 sps:$4 sm:$0xff]  }
  0x10   :  { %4952 = vmatprep.subr.bf16.mxu0 %v7394_v16  ;;  %5485 = vmatprep.subr.bf16.mxu1 %v7396_v17  ;;  %v7438_v45 = vld [vmem:[%s11268_s1 + $0x16c] ss:$16 sps:$4 sm:$0xff]   ;;  %v21_v46 = vld [vmem:[%s11269_s0] sm:$0xff]  ;;  %v7441_v49 = vld [vmem:[%s11268_s1 + $0x168] ss:$16 sps:$4 sm:$0xff]  }
  0x11   :  { %v7440_v47 = vld [vmem:[%s11268_s1 + $0x160] ss:$16 sps:$4 sm:$0xff]   ;;  %v6368_v48 = vcombine.high %v21_v46, %v21_v46  ;;  %v7442_v50 = vld [vmem:[%s11268_s1 + $0x184] ss:$16 sps:$4 sm:$0xff]   ;;  %v7444_v51 = vld [vmem:[%s11268_s1 + $0x18c] ss:$16 sps:$4 sm:$0xff]   ;;  %v6367_v4 = vcombine.low %v21_v46, %v21_v46 }
  0x12   :  { %v7446_v52 = vld [vmem:[%s11268_s1 + $0x180] ss:$16 sps:$4 sm:$0xff]   ;;  %v7447_v53 = vld [vmem:[%s11268_s1 + $0x188] ss:$16 sps:$4 sm:$0xff]   ;;  %v7448_v54 = vld [vmem:[%s11268_s1 + $0x1a4] ss:$16 sps:$4 sm:$0xff]  }
  0x13   :  { %4953 = vmatpush1.bf16.msra.mxu0 %v7398_v18  ;;  %5486 = vmatpush1.bf16.msra.mxu1 %v7399_v19  ;;  %v7450_v55 = vld [vmem:[%s11268_s1 + $0x1ac] ss:$16 sps:$4 sm:$0xff]   ;;  %v7452_v56 = vld [vmem:[%s11268_s1 + $0x1a0] ss:$16 sps:$4 sm:$0xff]   ;;  %v7453_v57 = vld [vmem:[%s11268_s1 + $0x1a8] ss:$16 sps:$4 sm:$0xff]  }
  0x14   :  { %4954 = vmatprep.subr.bf16.mxu0 %v7400_v20  ;;  %5487 = vmatprep.subr.bf16.mxu1 %v7402_v21  ;;  %v7454_v58 = vld [vmem:[%s11268_s1 + $0x1c4] ss:$16 sps:$4 sm:$0xff]   ;;  %v7456_v59 = vld [vmem:[%s11268_s1 + $0x1cc] ss:$16 sps:$4 sm:$0xff]   ;;  %v7458_v60 = vld [vmem:[%s11268_s1 + $0x1c0] ss:$16 sps:$4 sm:$0xff]  }
  0x15   :  { %4976 = vmatprep.mubr.bf16.mxu0 %v6368_v48  ;;  %5509 = vmatprep.mubr.bf16.mxu1 %v6368_v48  ;;  %v7459_v61 = vld [vmem:[%s11268_s1 + $0x1c8] ss:$16 sps:$4 sm:$0xff]   ;;  %v7460_v62 = vld [vmem:[%s11268_s1 + $0x1e4] ss:$16 sps:$4 sm:$0xff]   ;;  %v7462_v63 = vld [vmem:[%s11268_s1 + $0x1ec] ss:$16 sps:$4 sm:$0xff]  }
  0x16   :  { %v7464_v0 = vld [vmem:[%s11268_s1 + $0x1e0] ss:$16 sps:$4 sm:$0xff]   ;;  %v7465_v1 = vld [vmem:[%s11268_s1 + $0x1e8] ss:$16 sps:$4 sm:$0xff]   ;;  %v7470_v2 = vld [vmem:[%s11268_s1 + $0x204] ss:$16 sps:$4 sm:$0xff]  }
  0x17   :  { %4955 = vmatpush1.bf16.msra.mxu0 %v7404_v22  ;;  %5488 = vmatpush1.bf16.msra.mxu1 %v7405_v23  ;;  %v7473_v3 = vld [vmem:[%s11268_s1 + $0x20c] ss:$16 sps:$4 sm:$0xff]   ;;  %v7468_v5 = vld [vmem:[%s11268_s1 + $0x200] ss:$16 sps:$4 sm:$0xff]   ;;  %v7471_v6 = vld [vmem:[%s11268_s1 + $0x208] ss:$16 sps:$4 sm:$0xff]  }
  0x18   :  { %4956 = vmatprep.subr.bf16.mxu0 %v7406_v24  ;;  %5489 = vmatprep.subr.bf16.mxu1 %v7408_v25  ;;  %v7476_v7 = vld [vmem:[%s11268_s1 + $0x224] ss:$16 sps:$4 sm:$0xff]   ;;  %v7479_v8 = vld [vmem:[%s11268_s1 + $0x22c] ss:$16 sps:$4 sm:$0xff]   ;;  %v7474_v9 = vld [vmem:[%s11268_s1 + $0x220] ss:$16 sps:$4 sm:$0xff]  }
  0x19   :  { %v7477_v10 = vld [vmem:[%s11268_s1 + $0x228] ss:$16 sps:$4 sm:$0xff]   ;;  %v7482_v11 = vld [vmem:[%s11268_s1 + $0x244] ss:$16 sps:$4 sm:$0xff]   ;;  %v7485_v12 = vld [vmem:[%s11268_s1 + $0x24c] ss:$16 sps:$4 sm:$0xff]  }
  0x1a   :  { %v7480_v13 = vld [vmem:[%s11268_s1 + $0x240] ss:$16 sps:$4 sm:$0xff]   ;;  %v7483_v14 = vld [vmem:[%s11268_s1 + $0x248] ss:$16 sps:$4 sm:$0xff]   ;;  %v7488_v15 = vld [vmem:[%s11268_s1 + $0x264] ss:$16 sps:$4 sm:$0xff]  }
  0x1b   :  { %4957 = vmatpush1.bf16.msra.mxu0 %v7410_v26  ;;  %5490 = vmatpush1.bf16.msra.mxu1 %v7411_v27  ;;  %v7491_v16 = vld [vmem:[%s11268_s1 + $0x26c] ss:$16 sps:$4 sm:$0xff]   ;;  %v7486_v17 = vld [vmem:[%s11268_s1 + $0x260] ss:$16 sps:$4 sm:$0xff]   ;;  %v7489_v18 = vld [vmem:[%s11268_s1 + $0x268] ss:$16 sps:$4 sm:$0xff]  }
  0x1c   :  { %4958 = vmatprep.subr.bf16.mxu0 %v7412_v28  ;;  %5491 = vmatprep.subr.bf16.mxu1 %v7414_v29  ;;  %v7494_v19 = vld [vmem:[%s11268_s1 + $0x284] ss:$16 sps:$4 sm:$0xff]   ;;  %v7497_v20 = vld [vmem:[%s11268_s1 + $0x28c] ss:$16 sps:$4 sm:$0xff]   ;;  %v7492_v21 = vld [vmem:[%s11268_s1 + $0x280] ss:$16 sps:$4 sm:$0xff]  }
  0x1d   :  { %v7495_v22 = vld [vmem:[%s11268_s1 + $0x288] ss:$16 sps:$4 sm:$0xff]   ;;  %v7500_v23 = vld [vmem:[%s11268_s1 + $0x2a4] ss:$16 sps:$4 sm:$0xff]   ;;  %v7503_v24 = vld [vmem:[%s11268_s1 + $0x2ac] ss:$16 sps:$4 sm:$0xff]  }
  0x1e   :  { %v7498_v25 = vld [vmem:[%s11268_s1 + $0x2a0] ss:$16 sps:$4 sm:$0xff]   ;;  %v7501_v26 = vld [vmem:[%s11268_s1 + $0x2a8] ss:$16 sps:$4 sm:$0xff]   ;;  %v7506_v27 = vld [vmem:[%s11268_s1 + $0x2c4] ss:$16 sps:$4 sm:$0xff]  }
  0x1f   :  { %4959 = vmatpush1.bf16.msra.mxu0 %v7416_v30  ;;  %5492 = vmatpush1.bf16.msra.mxu1 %v7417_v31  ;;  %v7509_v28 = vld [vmem:[%s11268_s1 + $0x2cc] ss:$16 sps:$4 sm:$0xff]   ;;  %v7504_v31 = vld [vmem:[%s11268_s1 + $0x2c0] ss:$16 sps:$4 sm:$0xff]   ;;  %v7531_v48 = vld [vmem:[%s11268_s1 + $0x348] ss:$16 sps:$4 sm:$0xff]  }
  0x20   :  { %4960 = vmatprep.subr.bf16.mxu0 %v7418_v32  ;;  %5493 = vmatprep.subr.bf16.mxu1 %v7420_v33  ;;  %v8934_v29 = vld [vmem:[%s11269_s0 + $0x8] sm:$0xff]  ;;  %v7512_v33 = vld [vmem:[%s11268_s1 + $0x2e4] ss:$16 sps:$4 sm:$0xff]  }
  0x21   :  { %v6370_v30 = vcombine.high %v8934_v29, %v8934_v29  ;;  %v7507_v32 = vld [vmem:[%s11268_s1 + $0x2c8] ss:$16 sps:$4 sm:$0xff]   ;;  %v7533_v46 = vld [vmem:[%s11268_s1 + $0x34c] ss:$16 sps:$4 sm:$0xff]  }
  0x23   :  { %4961 = vmatpush1.bf16.msra.mxu0 %v7422_v34  ;;  %5494 = vmatpush1.bf16.msra.mxu1 %v7423_v35  ;;  %v7515_v34 = vld [vmem:[%s11268_s1 + $0x2ec] ss:$16 sps:$4 sm:$0xff]   ;;  %v7510_v35 = vld [vmem:[%s11268_s1 + $0x2e0] ss:$16 sps:$4 sm:$0xff]  }
  0x24   :  { %4962 = vmatprep.subr.bf16.mxu0 %v7424_v36  ;;  %5495 = vmatprep.subr.bf16.mxu1 %v7426_v37  ;;  %v7513_v36 = vld [vmem:[%s11268_s1 + $0x2e8] ss:$16 sps:$4 sm:$0xff]   ;;  %v7518_v37 = vld [vmem:[%s11268_s1 + $0x304] ss:$16 sps:$4 sm:$0xff]  }
  0x27   :  { %4963 = vmatpush1.bf16.msra.mxu0 %v7428_v38  ;;  %5496 = vmatpush1.bf16.msra.mxu1 %v7429_v39  ;;  %v7521_v38 = vld [vmem:[%s11268_s1 + $0x30c] ss:$16 sps:$4 sm:$0xff]   ;;  %v7516_v39 = vld [vmem:[%s11268_s1 + $0x300] ss:$16 sps:$4 sm:$0xff]  }
  0x28   :  { %4964 = vmatprep.subr.bf16.mxu0 %v7430_v40  ;;  %5497 = vmatprep.subr.bf16.mxu1 %v7432_v41  ;;  %v7519_v40 = vld [vmem:[%s11268_s1 + $0x308] ss:$16 sps:$4 sm:$0xff]   ;;  %v7524_v41 = vld [vmem:[%s11268_s1 + $0x324] ss:$16 sps:$4 sm:$0xff]  }
  0x2b   :  { %4965 = vmatpush1.bf16.msra.mxu0 %v7434_v42  ;;  %5498 = vmatpush1.bf16.msra.mxu1 %v7435_v43  ;;  %v7527_v42 = vld [vmem:[%s11268_s1 + $0x32c] ss:$16 sps:$4 sm:$0xff]   ;;  %v7522_v43 = vld [vmem:[%s11268_s1 + $0x320] ss:$16 sps:$4 sm:$0xff]  }
  0x2c   :  { %4966 = vmatprep.subr.bf16.mxu0 %v7436_v44  ;;  %5499 = vmatprep.subr.bf16.mxu1 %v7438_v45  ;;  %v7525_v44 = vld [vmem:[%s11268_s1 + $0x328] ss:$16 sps:$4 sm:$0xff]   ;;  %v7530_v45 = vld [vmem:[%s11268_s1 + $0x344] ss:$16 sps:$4 sm:$0xff]  }
  0x2f   :  { %4967 = vmatpush1.bf16.msra.mxu0 %v7440_v47  ;;  %5500 = vmatpush1.bf16.msra.mxu1 %v7441_v49  ;;  %v7528_v47 = vld [vmem:[%s11268_s1 + $0x340] ss:$16 sps:$4 sm:$0xff]   ;;  %v7536_v49 = vld [vmem:[%s11268_s1 + $0x364] ss:$16 sps:$4 sm:$0xff]  }
  0x30   :  { %4968 = vmatprep.subr.bf16.mxu0 %v7442_v50  ;;  %5501 = vmatprep.subr.bf16.mxu1 %v7444_v51  ;;  %v7539_v50 = vld [vmem:[%s11268_s1 + $0x36c] ss:$16 sps:$4 sm:$0xff]   ;;  %v7534_v51 = vld [vmem:[%s11268_s1 + $0x360] ss:$16 sps:$4 sm:$0xff]  }
  0x33   :  { %4969 = vmatpush1.bf16.msra.mxu0 %v7446_v52  ;;  %5502 = vmatpush1.bf16.msra.mxu1 %v7447_v53  ;;  %v7537_v52 = vld [vmem:[%s11268_s1 + $0x368] ss:$16 sps:$4 sm:$0xff]   ;;  %v7542_v53 = vld [vmem:[%s11268_s1 + $0x384] ss:$16 sps:$4 sm:$0xff]  }
  0x34   :  { %4970 = vmatprep.subr.bf16.mxu0 %v7448_v54  ;;  %5503 = vmatprep.subr.bf16.mxu1 %v7450_v55  ;;  %v7545_v54 = vld [vmem:[%s11268_s1 + $0x38c] ss:$16 sps:$4 sm:$0xff]   ;;  %v7540_v55 = vld [vmem:[%s11268_s1 + $0x380] ss:$16 sps:$4 sm:$0xff]  }
  0x37   :  { %4971 = vmatpush1.bf16.msra.mxu0 %v7452_v56  ;;  %5504 = vmatpush1.bf16.msra.mxu1 %v7453_v57  ;;  %v7543_v56 = vld [vmem:[%s11268_s1 + $0x388] ss:$16 sps:$4 sm:$0xff]   ;;  %v7548_v57 = vld [vmem:[%s11268_s1 + $0x3a4] ss:$16 sps:$4 sm:$0xff]  }
  0x38   :  { %4972 = vmatprep.subr.bf16.mxu0 %v7454_v58  ;;  %5505 = vmatprep.subr.bf16.mxu1 %v7456_v59  ;;  %v7551_v58 = vld [vmem:[%s11268_s1 + $0x3ac] ss:$16 sps:$4 sm:$0xff]   ;;  %v7546_v59 = vld [vmem:[%s11268_s1 + $0x3a0] ss:$16 sps:$4 sm:$0xff]  }
  0x3b   :  { %4973 = vmatpush1.bf16.msra.mxu0 %v7458_v60  ;;  %5506 = vmatpush1.bf16.msra.mxu1 %v7459_v61  ;;  %v7549_v60 = vld [vmem:[%s11268_s1 + $0x3a8] ss:$16 sps:$4 sm:$0xff]   ;;  %v7554_v61 = vld [vmem:[%s11268_s1 + $0x3c4] ss:$16 sps:$4 sm:$0xff]  }
  0x3c   :  { %4974 = vmatprep.subr.bf16.mxu0 %v7460_v62  ;;  %5507 = vmatprep.subr.bf16.mxu1 %v7462_v63  ;;  %v7557_v62 = vld [vmem:[%s11268_s1 + $0x3cc] ss:$16 sps:$4 sm:$0xff]   ;;  %v7552_v63 = vld [vmem:[%s11268_s1 + $0x3c0] ss:$16 sps:$4 sm:$0xff]  }
  0x3f   :  { %4975 = vmatpush1.bf16.msra.mxu0 %v7464_v0  ;;  %5508 = vmatpush1.bf16.msra.mxu1 %v7465_v1  ;;  %v7555_v0 = vld [vmem:[%s11268_s1 + $0x3c8] ss:$16 sps:$4 sm:$0xff]   ;;  %v7560_v1 = vld [vmem:[%s11268_s1 + $0x3e4] ss:$16 sps:$4 sm:$0xff]  }
  0x40   :  { %4985 = vmatprep.subr.bf16.mxu0 %v7470_v2  ;;  %5518 = vmatprep.subr.bf16.mxu1 %v7473_v3  ;;  %v7563_v2 = vld [vmem:[%s11268_s1 + $0x3ec] ss:$16 sps:$4 sm:$0xff]   ;;  %v7558_v3 = vld [vmem:[%s11268_s1 + $0x3e0] ss:$16 sps:$4 sm:$0xff]  }
  0x42   :  { %4977 = vmatmul.mubr.bf16.vlgmr.msra.gmra.mrb[0].mxu0 %v6367_v4  ;;  %5510 = vmatmul.mubr.bf16.vlgmr.msra.gmra.mrb[0].mxu1 %v6367_v4  ;;  %v7561_v4 = vld [vmem:[%s11268_s1 + $0x3e8] ss:$16 sps:$4 sm:$0xff]  }
  0x43   :  { %4986 = vmatpush1.bf16.msra.mxu0 %v7468_v5  ;;  %5519 = vmatpush1.bf16.msra.mxu1 %v7471_v6  ;;  %v7568_v5 = vld [vmem:[%s11268_s1 + $0x404] ss:$16 sps:$4 sm:$0xff]   ;;  %v7571_v6 = vld [vmem:[%s11268_s1 + $0x40c] ss:$16 sps:$4 sm:$0xff]  }
  0x44   :  { %4987 = vmatprep.subr.bf16.mxu0 %v7476_v7  ;;  %5520 = vmatprep.subr.bf16.mxu1 %v7479_v8  ;;  %v6369_v7 = vcombine.low %v8934_v29, %v8934_v29  ;;  %v7566_v8 = vld [vmem:[%s11268_s1 + $0x400] ss:$16 sps:$4 sm:$0xff]   ;;  %v7601_v29 = vld [vmem:[%s11268_s1 + $0x4ac] ss:$16 sps:$4 sm:$0xff]  }
  0x45   :  { %5017 = vmatprep.mubr.bf16.mxu0 %v6370_v30  ;;  %5550 = vmatprep.mubr.bf16.mxu1 %v6370_v30  ;;  %v7596_v30 = vld [vmem:[%s11268_s1 + $0x4a0] ss:$16 sps:$4 sm:$0xff]  }
  0x47   :  { %4988 = vmatpush1.bf16.msra.mxu0 %v7474_v9  ;;  %5521 = vmatpush1.bf16.msra.mxu1 %v7477_v10  ;;  %v7569_v9 = vld [vmem:[%s11268_s1 + $0x408] ss:$16 sps:$4 sm:$0xff]   ;;  %v7574_v10 = vld [vmem:[%s11268_s1 + $0x424] ss:$16 sps:$4 sm:$0xff]  }
  0x48   :  { %4989 = vmatprep.subr.bf16.mxu0 %v7482_v11  ;;  %5522 = vmatprep.subr.bf16.mxu1 %v7485_v12  ;;  %v9072_v11 = vld [vmem:[%s11269_s0 + $0x10] sm:$0xff]  ;;  %v7577_v12 = vld [vmem:[%s11268_s1 + $0x42c] ss:$16 sps:$4 sm:$0xff]  }
  0x4b   :  { %4990 = vmatpush1.bf16.msra.mxu0 %v7480_v13  ;;  %5523 = vmatpush1.bf16.msra.mxu1 %v7483_v14  ;;  %v6372_v13 = vcombine.high %v9072_v11, %v9072_v11  ;;  %v7572_v14 = vld [vmem:[%s11268_s1 + $0x420] ss:$16 sps:$4 sm:$0xff]  }
  0x4c   :  { %4991 = vmatprep.subr.bf16.mxu0 %v7488_v15  ;;  %5524 = vmatprep.subr.bf16.mxu1 %v7491_v16  ;;  %v7575_v15 = vld [vmem:[%s11268_s1 + $0x428] ss:$16 sps:$4 sm:$0xff]   ;;  %v7580_v16 = vld [vmem:[%s11268_s1 + $0x444] ss:$16 sps:$4 sm:$0xff]  }
  0x4f   :  { %4992 = vmatpush1.bf16.msra.mxu0 %v7486_v17  ;;  %5525 = vmatpush1.bf16.msra.mxu1 %v7489_v18  ;;  %v7583_v17 = vld [vmem:[%s11268_s1 + $0x44c] ss:$16 sps:$4 sm:$0xff]   ;;  %v7578_v18 = vld [vmem:[%s11268_s1 + $0x440] ss:$16 sps:$4 sm:$0xff]  }
  0x50   :  { %4993 = vmatprep.subr.bf16.mxu0 %v7494_v19  ;;  %5526 = vmatprep.subr.bf16.mxu1 %v7497_v20  ;;  %v7581_v19 = vld [vmem:[%s11268_s1 + $0x448] ss:$16 sps:$4 sm:$0xff]   ;;  %v7586_v20 = vld [vmem:[%s11268_s1 + $0x464] ss:$16 sps:$4 sm:$0xff]  }
  0x53   :  { %4994 = vmatpush1.bf16.msra.mxu0 %v7492_v21  ;;  %5527 = vmatpush1.bf16.msra.mxu1 %v7495_v22  ;;  %v7589_v21 = vld [vmem:[%s11268_s1 + $0x46c] ss:$16 sps:$4 sm:$0xff]   ;;  %v7584_v22 = vld [vmem:[%s11268_s1 + $0x460] ss:$16 sps:$4 sm:$0xff]  }
  0x54   :  { %4995 = vmatprep.subr.bf16.mxu0 %v7500_v23  ;;  %5528 = vmatprep.subr.bf16.mxu1 %v7503_v24  ;;  %v7587_v23 = vld [vmem:[%s11268_s1 + $0x468] ss:$16 sps:$4 sm:$0xff]   ;;  %v7592_v24 = vld [vmem:[%s11268_s1 + $0x484] ss:$16 sps:$4 sm:$0xff]  }
  0x57   :  { %4996 = vmatpush1.bf16.msra.mxu0 %v7498_v25  ;;  %5529 = vmatpush1.bf16.msra.mxu1 %v7501_v26  ;;  %v7595_v25 = vld [vmem:[%s11268_s1 + $0x48c] ss:$16 sps:$4 sm:$0xff]   ;;  %v7590_v26 = vld [vmem:[%s11268_s1 + $0x480] ss:$16 sps:$4 sm:$0xff]  }
  0x58   :  { %4997 = vmatprep.subr.bf16.mxu0 %v7506_v27  ;;  %5530 = vmatprep.subr.bf16.mxu1 %v7509_v28  ;;  %v7593_v27 = vld [vmem:[%s11268_s1 + $0x488] ss:$16 sps:$4 sm:$0xff]   ;;  %v7598_v28 = vld [vmem:[%s11268_s1 + $0x4a4] ss:$16 sps:$4 sm:$0xff]  }
  0x5b   :  { %4998 = vmatpush1.bf16.msra.mxu0 %v7504_v31  ;;  %5531 = vmatpush1.bf16.msra.mxu1 %v7507_v32  ;;  %v7599_v31 = vld [vmem:[%s11268_s1 + $0x4a8] ss:$16 sps:$4 sm:$0xff]   ;;  %v7604_v32 = vld [vmem:[%s11268_s1 + $0x4c4] ss:$16 sps:$4 sm:$0xff]  }
  0x5c   :  { %4999 = vmatprep.subr.bf16.mxu0 %v7512_v33  ;;  %5532 = vmatprep.subr.bf16.mxu1 %v7515_v34  ;;  %v7607_v33 = vld [vmem:[%s11268_s1 + $0x4cc] ss:$16 sps:$4 sm:$0xff]   ;;  %v7602_v34 = vld [vmem:[%s11268_s1 + $0x4c0] ss:$16 sps:$4 sm:$0xff]  }
  0x5f   :  { %5000 = vmatpush1.bf16.msra.mxu0 %v7510_v35  ;;  %5533 = vmatpush1.bf16.msra.mxu1 %v7513_v36  ;;  %v7605_v35 = vld [vmem:[%s11268_s1 + $0x4c8] ss:$16 sps:$4 sm:$0xff]   ;;  %v7610_v36 = vld [vmem:[%s11268_s1 + $0x4e4] ss:$16 sps:$4 sm:$0xff]  }
  0x60   :  { %5001 = vmatprep.subr.bf16.mxu0 %v7518_v37  ;;  %5534 = vmatprep.subr.bf16.mxu1 %v7521_v38  ;;  %v7613_v37 = vld [vmem:[%s11268_s1 + $0x4ec] ss:$16 sps:$4 sm:$0xff]   ;;  %v7608_v38 = vld [vmem:[%s11268_s1 + $0x4e0] ss:$16 sps:$4 sm:$0xff]  }
  0x63   :  { %5002 = vmatpush1.bf16.msra.mxu0 %v7516_v39  ;;  %5535 = vmatpush1.bf16.msra.mxu1 %v7519_v40  ;;  %v7611_v39 = vld [vmem:[%s11268_s1 + $0x4e8] ss:$16 sps:$4 sm:$0xff]   ;;  %v7616_v40 = vld [vmem:[%s11268_s1 + $0x504] ss:$16 sps:$4 sm:$0xff]  }
  0x64   :  { %5003 = vmatprep.subr.bf16.mxu0 %v7524_v41  ;;  %5536 = vmatprep.subr.bf16.mxu1 %v7527_v42  ;;  %v7619_v41 = vld [vmem:[%s11268_s1 + $0x50c] ss:$16 sps:$4 sm:$0xff]   ;;  %v7614_v42 = vld [vmem:[%s11268_s1 + $0x500] ss:$16 sps:$4 sm:$0xff]  }
  0x67   :  { %5004 = vmatpush1.bf16.msra.mxu0 %v7522_v43  ;;  %5537 = vmatpush1.bf16.msra.mxu1 %v7525_v44  ;;  %v7617_v43 = vld [vmem:[%s11268_s1 + $0x508] ss:$16 sps:$4 sm:$0xff]   ;;  %v7622_v44 = vld [vmem:[%s11268_s1 + $0x524] ss:$16 sps:$4 sm:$0xff]  }
  0x68   :  { %5005 = vmatprep.subr.bf16.mxu0 %v7530_v45  ;;  %5538 = vmatprep.subr.bf16.mxu1 %v7533_v46  ;;  %v7625_v45 = vld [vmem:[%s11268_s1 + $0x52c] ss:$16 sps:$4 sm:$0xff]   ;;  %v7620_v46 = vld [vmem:[%s11268_s1 + $0x520] ss:$16 sps:$4 sm:$0xff]  }
  0x6b   :  { %5006 = vmatpush1.bf16.msra.mxu0 %v7528_v47  ;;  %5539 = vmatpush1.bf16.msra.mxu1 %v7531_v48  ;;  %v7623_v47 = vld [vmem:[%s11268_s1 + $0x528] ss:$16 sps:$4 sm:$0xff]   ;;  %v7628_v48 = vld [vmem:[%s11268_s1 + $0x544] ss:$16 sps:$4 sm:$0xff]  }
  0x6c   :  { %5007 = vmatprep.subr.bf16.mxu0 %v7536_v49  ;;  %5540 = vmatprep.subr.bf16.mxu1 %v7539_v50  ;;  %v7631_v49 = vld [vmem:[%s11268_s1 + $0x54c] ss:$16 sps:$4 sm:$0xff]   ;;  %v7626_v50 = vld [vmem:[%s11268_s1 + $0x540] ss:$16 sps:$4 sm:$0xff]  }
  0x6f   :  { %5008 = vmatpush1.bf16.msra.mxu0 %v7534_v51  ;;  %5541 = vmatpush1.bf16.msra.mxu1 %v7537_v52  ;;  %v7629_v51 = vld [vmem:[%s11268_s1 + $0x548] ss:$16 sps:$4 sm:$0xff]   ;;  %v7634_v52 = vld [vmem:[%s11268_s1 + $0x564] ss:$16 sps:$4 sm:$0xff]  }
  0x70   :  { %5009 = vmatprep.subr.bf16.mxu0 %v7542_v53  ;;  %5542 = vmatprep.subr.bf16.mxu1 %v7545_v54  ;;  %v7637_v53 = vld [vmem:[%s11268_s1 + $0x56c] ss:$16 sps:$4 sm:$0xff]   ;;  %v7632_v54 = vld [vmem:[%s11268_s1 + $0x560] ss:$16 sps:$4 sm:$0xff]  }
  0x73   :  { %5010 = vmatpush1.bf16.msra.mxu0 %v7540_v55  ;;  %5543 = vmatpush1.bf16.msra.mxu1 %v7543_v56  ;;  %v7635_v55 = vld [vmem:[%s11268_s1 + $0x568] ss:$16 sps:$4 sm:$0xff]   ;;  %v7640_v56 = vld [vmem:[%s11268_s1 + $0x584] ss:$16 sps:$4 sm:$0xff]  }
  0x74   :  { %5011 = vmatprep.subr.bf16.mxu0 %v7548_v57  ;;  %5544 = vmatprep.subr.bf16.mxu1 %v7551_v58  ;;  %v7643_v57 = vld [vmem:[%s11268_s1 + $0x58c] ss:$16 sps:$4 sm:$0xff]   ;;  %v7638_v58 = vld [vmem:[%s11268_s1 + $0x580] ss:$16 sps:$4 sm:$0xff]  }
  0x77   :  { %5012 = vmatpush1.bf16.msra.mxu0 %v7546_v59  ;;  %5545 = vmatpush1.bf16.msra.mxu1 %v7549_v60  ;;  %v7641_v59 = vld [vmem:[%s11268_s1 + $0x588] ss:$16 sps:$4 sm:$0xff]   ;;  %v7646_v60 = vld [vmem:[%s11268_s1 + $0x5a4] ss:$16 sps:$4 sm:$0xff]  }
  0x78   :  { %5013 = vmatprep.subr.bf16.mxu0 %v7554_v61  ;;  %5546 = vmatprep.subr.bf16.mxu1 %v7557_v62  ;;  %v7649_v61 = vld [vmem:[%s11268_s1 + $0x5ac] ss:$16 sps:$4 sm:$0xff]   ;;  %v7644_v62 = vld [vmem:[%s11268_s1 + $0x5a0] ss:$16 sps:$4 sm:$0xff]  }
  0x7b   :  { %5014 = vmatpush1.bf16.msra.mxu0 %v7552_v63  ;;  %5547 = vmatpush1.bf16.msra.mxu1 %v7555_v0  ;;  %v7647_v63 = vld [vmem:[%s11268_s1 + $0x5a8] ss:$16 sps:$4 sm:$0xff]   ;;  %v7652_v0 = vld [vmem:[%s11268_s1 + $0x5c4] ss:$16 sps:$4 sm:$0xff]  }
  0x7c   :  { %5015 = vmatprep.subr.bf16.mxu0 %v7560_v1  ;;  %5548 = vmatprep.subr.bf16.mxu1 %v7563_v2  ;;  %v7655_v1 = vld [vmem:[%s11268_s1 + $0x5cc] ss:$16 sps:$4 sm:$0xff]   ;;  %v7650_v2 = vld [vmem:[%s11268_s1 + $0x5c0] ss:$16 sps:$4 sm:$0xff]  }
  0x7f   :  { %5016 = vmatpush1.bf16.msra.mxu0 %v7558_v3  ;;  %5549 = vmatpush1.bf16.msra.mxu1 %v7561_v4  ;;  %v7653_v3 = vld [vmem:[%s11268_s1 + $0x5c8] ss:$16 sps:$4 sm:$0xff]   ;;  %v7658_v4 = vld [vmem:[%s11268_s1 + $0x5e4] ss:$16 sps:$4 sm:$0xff]  }
  0x80   :  { %5026 = vmatprep.subr.bf16.mxu0 %v7568_v5  ;;  %5559 = vmatprep.subr.bf16.mxu1 %v7571_v6  ;;  %v7661_v5 = vld [vmem:[%s11268_s1 + $0x5ec] ss:$16 sps:$4 sm:$0xff]   ;;  %v7656_v6 = vld [vmem:[%s11268_s1 + $0x5e0] ss:$16 sps:$4 sm:$0xff]  }
  0x82   :  { %5018 = vmatmul.mubr.bf16.vlgmr.msra.gmra.mrb[0].mxu0 %v6369_v7  ;;  %5551 = vmatmul.mubr.bf16.vlgmr.msra.gmra.mrb[0].mxu1 %v6369_v7  ;;  %v7659_v7 = vld [vmem:[%s11268_s1 + $0x5e8] ss:$16 sps:$4 sm:$0xff]  }
  0x83   :  { %5027 = vmatpush1.bf16.msra.mxu0 %v7566_v8  ;;  %5560 = vmatpush1.bf16.msra.mxu1 %v7569_v9  ;;  %v7666_v8 = vld [vmem:[%s11268_s1 + $0x604] ss:$16 sps:$4 sm:$0xff]   ;;  %v7669_v9 = vld [vmem:[%s11268_s1 + $0x60c] ss:$16 sps:$4 sm:$0xff]  }
  0x84   :  { %5028 = vmatprep.subr.bf16.mxu0 %v7574_v10  ;;  %5561 = vmatprep.subr.bf16.mxu1 %v7577_v12  ;;  %v7664_v10 = vld [vmem:[%s11268_s1 + $0x600] ss:$16 sps:$4 sm:$0xff]   ;;  %v6371_v12 = vcombine.low %v9072_v11, %v9072_v11  ;;  %v7675_v11 = vld [vmem:[%s11268_s1 + $0x62c] ss:$16 sps:$4 sm:$0xff]  }
  0x85   :  { %5058 = vmatprep.mubr.bf16.mxu0 %v6372_v13  ;;  %5591 = vmatprep.mubr.bf16.mxu1 %v6372_v13  ;;  %v7667_v13 = vld [vmem:[%s11268_s1 + $0x608] ss:$16 sps:$4 sm:$0xff]  }
  0x87   :  { %5029 = vmatpush1.bf16.msra.mxu0 %v7572_v14  ;;  %5562 = vmatpush1.bf16.msra.mxu1 %v7575_v15  ;;  %v9270_v14 = vld [vmem:[%s11269_s0 + $0x18] sm:$0xff]  ;;  %v7672_v15 = vld [vmem:[%s11268_s1 + $0x624] ss:$16 sps:$4 sm:$0xff]  }
  0x88   :  { %5030 = vmatprep.subr.bf16.mxu0 %v7580_v16  ;;  %5563 = vmatprep.subr.bf16.mxu1 %v7583_v17  ;;  %v6374_v16 = vcombine.high %v9270_v14, %v9270_v14  ;;  %v7670_v17 = vld [vmem:[%s11268_s1 + $0x620] ss:$16 sps:$4 sm:$0xff]  }
  0x8b   :  { %5031 = vmatpush1.bf16.msra.mxu0 %v7578_v18  ;;  %5564 = vmatpush1.bf16.msra.mxu1 %v7581_v19  ;;  %v7673_v18 = vld [vmem:[%s11268_s1 + $0x628] ss:$16 sps:$4 sm:$0xff]   ;;  %v7678_v19 = vld [vmem:[%s11268_s1 + $0x644] ss:$16 sps:$4 sm:$0xff]  }
  0x8c   :  { %5032 = vmatprep.subr.bf16.mxu0 %v7586_v20  ;;  %5565 = vmatprep.subr.bf16.mxu1 %v7589_v21  ;;  %v7681_v20 = vld [vmem:[%s11268_s1 + $0x64c] ss:$16 sps:$4 sm:$0xff]   ;;  %v7676_v21 = vld [vmem:[%s11268_s1 + $0x640] ss:$16 sps:$4 sm:$0xff]  }
  0x8f   :  { %5033 = vmatpush1.bf16.msra.mxu0 %v7584_v22  ;;  %5566 = vmatpush1.bf16.msra.mxu1 %v7587_v23  ;;  %v7679_v22 = vld [vmem:[%s11268_s1 + $0x648] ss:$16 sps:$4 sm:$0xff]   ;;  %v7684_v23 = vld [vmem:[%s11268_s1 + $0x664] ss:$16 sps:$4 sm:$0xff]  }
  0x90   :  { %5034 = vmatprep.subr.bf16.mxu0 %v7592_v24  ;;  %5567 = vmatprep.subr.bf16.mxu1 %v7595_v25  ;;  %v7687_v24 = vld [vmem:[%s11268_s1 + $0x66c] ss:$16 sps:$4 sm:$0xff]   ;;  %v7682_v25 = vld [vmem:[%s11268_s1 + $0x660] ss:$16 sps:$4 sm:$0xff]  }
  0x93   :  { %5035 = vmatpush1.bf16.msra.mxu0 %v7590_v26  ;;  %5568 = vmatpush1.bf16.msra.mxu1 %v7593_v27  ;;  %v7685_v26 = vld [vmem:[%s11268_s1 + $0x668] ss:$16 sps:$4 sm:$0xff]   ;;  %v7690_v27 = vld [vmem:[%s11268_s1 + $0x684] ss:$16 sps:$4 sm:$0xff]  }
  0x94   :  { %5036 = vmatprep.subr.bf16.mxu0 %v7598_v28  ;;  %5569 = vmatprep.subr.bf16.mxu1 %v7601_v29  ;;  %v7693_v28 = vld [vmem:[%s11268_s1 + $0x68c] ss:$16 sps:$4 sm:$0xff]   ;;  %v7688_v29 = vld [vmem:[%s11268_s1 + $0x680] ss:$16 sps:$4 sm:$0xff]  }
  0x97   :  { %5037 = vmatpush1.bf16.msra.mxu0 %v7596_v30  ;;  %5570 = vmatpush1.bf16.msra.mxu1 %v7599_v31  ;;  %v7691_v30 = vld [vmem:[%s11268_s1 + $0x688] ss:$16 sps:$4 sm:$0xff]   ;;  %v7696_v31 = vld [vmem:[%s11268_s1 + $0x6a4] ss:$16 sps:$4 sm:$0xff]  }
  0x98   :  { %5038 = vmatprep.subr.bf16.mxu0 %v7604_v32  ;;  %5571 = vmatprep.subr.bf16.mxu1 %v7607_v33  ;;  %v7699_v32 = vld [vmem:[%s11268_s1 + $0x6ac] ss:$16 sps:$4 sm:$0xff]   ;;  %v7694_v33 = vld [vmem:[%s11268_s1 + $0x6a0] ss:$16 sps:$4 sm:$0xff]  }
  0x9b   :  { %5039 = vmatpush1.bf16.msra.mxu0 %v7602_v34  ;;  %5572 = vmatpush1.bf16.msra.mxu1 %v7605_v35  ;;  %v7697_v34 = vld [vmem:[%s11268_s1 + $0x6a8] ss:$16 sps:$4 sm:$0xff]   ;;  %v7702_v35 = vld [vmem:[%s11268_s1 + $0x6c4] ss:$16 sps:$4 sm:$0xff]  }
  0x9c   :  { %5040 = vmatprep.subr.bf16.mxu0 %v7610_v36  ;;  %5573 = vmatprep.subr.bf16.mxu1 %v7613_v37  ;;  %v7705_v36 = vld [vmem:[%s11268_s1 + $0x6cc] ss:$16 sps:$4 sm:$0xff]   ;;  %v7700_v37 = vld [vmem:[%s11268_s1 + $0x6c0] ss:$16 sps:$4 sm:$0xff]  }
  0x9f   :  { %5041 = vmatpush1.bf16.msra.mxu0 %v7608_v38  ;;  %5574 = vmatpush1.bf16.msra.mxu1 %v7611_v39  ;;  %v7703_v38 = vld [vmem:[%s11268_s1 + $0x6c8] ss:$16 sps:$4 sm:$0xff]   ;;  %v7708_v39 = vld [vmem:[%s11268_s1 + $0x6e4] ss:$16 sps:$4 sm:$0xff]  }
  0xa0   :  { %5042 = vmatprep.subr.bf16.mxu0 %v7616_v40  ;;  %5575 = vmatprep.subr.bf16.mxu1 %v7619_v41  ;;  %v7711_v40 = vld [vmem:[%s11268_s1 + $0x6ec] ss:$16 sps:$4 sm:$0xff]   ;;  %v7706_v41 = vld [vmem:[%s11268_s1 + $0x6e0] ss:$16 sps:$4 sm:$0xff]  }
  0xa3   :  { %5043 = vmatpush1.bf16.msra.mxu0 %v7614_v42  ;;  %5576 = vmatpush1.bf16.msra.mxu1 %v7617_v43  ;;  %v7709_v42 = vld [vmem:[%s11268_s1 + $0x6e8] ss:$16 sps:$4 sm:$0xff]   ;;  %v7714_v43 = vld [vmem:[%s11268_s1 + $0x704] ss:$16 sps:$4 sm:$0xff]  }
  0xa4   :  { %5044 = vmatprep.subr.bf16.mxu0 %v7622_v44  ;;  %5577 = vmatprep.subr.bf16.mxu1 %v7625_v45  ;;  %v7717_v44 = vld [vmem:[%s11268_s1 + $0x70c] ss:$16 sps:$4 sm:$0xff]   ;;  %v7712_v45 = vld [vmem:[%s11268_s1 + $0x700] ss:$16 sps:$4 sm:$0xff]  }
  0xa7   :  { %5045 = vmatpush1.bf16.msra.mxu0 %v7620_v46  ;;  %5578 = vmatpush1.bf16.msra.mxu1 %v7623_v47  ;;  %v7715_v46 = vld [vmem:[%s11268_s1 + $0x708] ss:$16 sps:$4 sm:$0xff]   ;;  %v7720_v47 = vld [vmem:[%s11268_s1 + $0x724] ss:$16 sps:$4 sm:$0xff]  }
  0xa8   :  { %5046 = vmatprep.subr.bf16.mxu0 %v7628_v48  ;;  %5579 = vmatprep.subr.bf16.mxu1 %v7631_v49  ;;  %v7723_v48 = vld [vmem:[%s11268_s1 + $0x72c] ss:$16 sps:$4 sm:$0xff]   ;;  %v7718_v49 = vld [vmem:[%s11268_s1 + $0x720] ss:$16 sps:$4 sm:$0xff]  }
  0xab   :  { %5047 = vmatpush1.bf16.msra.mxu0 %v7626_v50  ;;  %5580 = vmatpush1.bf16.msra.mxu1 %v7629_v51  ;;  %v7721_v50 = vld [vmem:[%s11268_s1 + $0x728] ss:$16 sps:$4 sm:$0xff]   ;;  %v7726_v51 = vld [vmem:[%s11268_s1 + $0x744] ss:$16 sps:$4 sm:$0xff]  }
  0xac   :  { %5048 = vmatprep.subr.bf16.mxu0 %v7634_v52  ;;  %5581 = vmatprep.subr.bf16.mxu1 %v7637_v53  ;;  %v7729_v52 = vld [vmem:[%s11268_s1 + $0x74c] ss:$16 sps:$4 sm:$0xff]   ;;  %v7724_v53 = vld [vmem:[%s11268_s1 + $0x740] ss:$16 sps:$4 sm:$0xff]  }
  0xaf   :  { %5049 = vmatpush1.bf16.msra.mxu0 %v7632_v54  ;;  %5582 = vmatpush1.bf16.msra.mxu1 %v7635_v55  ;;  %v7727_v54 = vld [vmem:[%s11268_s1 + $0x748] ss:$16 sps:$4 sm:$0xff]   ;;  %v7732_v55 = vld [vmem:[%s11268_s1 + $0x764] ss:$16 sps:$4 sm:$0xff]  }
  0xb0   :  { %5050 = vmatprep.subr.bf16.mxu0 %v7640_v56  ;;  %5583 = vmatprep.subr.bf16.mxu1 %v7643_v57  ;;  %v7735_v56 = vld [vmem:[%s11268_s1 + $0x76c] ss:$16 sps:$4 sm:$0xff]   ;;  %v7730_v57 = vld [vmem:[%s11268_s1 + $0x760] ss:$16 sps:$4 sm:$0xff]  }
  0xb3   :  { %5051 = vmatpush1.bf16.msra.mxu0 %v7638_v58  ;;  %5584 = vmatpush1.bf16.msra.mxu1 %v7641_v59  ;;  %v7733_v58 = vld [vmem:[%s11268_s1 + $0x768] ss:$16 sps:$4 sm:$0xff]   ;;  %v7738_v59 = vld [vmem:[%s11268_s1 + $0x784] ss:$16 sps:$4 sm:$0xff]  }
  0xb4   :  { %5052 = vmatprep.subr.bf16.mxu0 %v7646_v60  ;;  %5585 = vmatprep.subr.bf16.mxu1 %v7649_v61  ;;  %v7741_v60 = vld [vmem:[%s11268_s1 + $0x78c] ss:$16 sps:$4 sm:$0xff]   ;;  %v7736_v61 = vld [vmem:[%s11268_s1 + $0x780] ss:$16 sps:$4 sm:$0xff]  }
  0xb7   :  { %5053 = vmatpush1.bf16.msra.mxu0 %v7644_v62  ;;  %5586 = vmatpush1.bf16.msra.mxu1 %v7647_v63  ;;  %v7739_v62 = vld [vmem:[%s11268_s1 + $0x788] ss:$16 sps:$4 sm:$0xff]   ;;  %v7744_v63 = vld [vmem:[%s11268_s1 + $0x7a4] ss:$16 sps:$4 sm:$0xff]  }
  0xb8   :  { %5054 = vmatprep.subr.bf16.mxu0 %v7652_v0  ;;  %5587 = vmatprep.subr.bf16.mxu1 %v7655_v1  ;;  %v7747_v0 = vld [vmem:[%s11268_s1 + $0x7ac] ss:$16 sps:$4 sm:$0xff]   ;;  %v7742_v1 = vld [vmem:[%s11268_s1 + $0x7a0] ss:$16 sps:$4 sm:$0xff]  }
  0xbb   :  { %5055 = vmatpush1.bf16.msra.mxu0 %v7650_v2  ;;  %5588 = vmatpush1.bf16.msra.mxu1 %v7653_v3  ;;  %v7745_v2 = vld [vmem:[%s11268_s1 + $0x7a8] ss:$16 sps:$4 sm:$0xff]   ;;  %v7750_v3 = vld [vmem:[%s11268_s1 + $0x7c4] ss:$16 sps:$4 sm:$0xff]  }
  0xbc   :  { %5056 = vmatprep.subr.bf16.mxu0 %v7658_v4  ;;  %5589 = vmatprep.subr.bf16.mxu1 %v7661_v5  ;;  %v7753_v4 = vld [vmem:[%s11268_s1 + $0x7cc] ss:$16 sps:$4 sm:$0xff]   ;;  %v7748_v5 = vld [vmem:[%s11268_s1 + $0x7c0] ss:$16 sps:$4 sm:$0xff]  }
  0xbf   :  { %5057 = vmatpush1.bf16.msra.mxu0 %v7656_v6  ;;  %5590 = vmatpush1.bf16.msra.mxu1 %v7659_v7  ;;  %v7751_v6 = vld [vmem:[%s11268_s1 + $0x7c8] ss:$16 sps:$4 sm:$0xff]   ;;  %v7756_v7 = vld [vmem:[%s11268_s1 + $0x7e4] ss:$16 sps:$4 sm:$0xff]  }
  0xc0   :  { %5067 = vmatprep.subr.bf16.mxu0 %v7666_v8  ;;  %5600 = vmatprep.subr.bf16.mxu1 %v7669_v9  ;;  %v7759_v8 = vld [vmem:[%s11268_s1 + $0x7ec] ss:$16 sps:$4 sm:$0xff]   ;;  %v7754_v9 = vld [vmem:[%s11268_s1 + $0x7e0] ss:$16 sps:$4 sm:$0xff]  }
  0xc2   :  { %5059 = vmatmul.mubr.bf16.vlgmr.msra.gmra.mrb[0].mxu0 %v6371_v12  ;;  %5592 = vmatmul.mubr.bf16.vlgmr.msra.gmra.mrb[0].mxu1 %v6371_v12  ;;  %v7764_v12 = vld [vmem:[%s11268_s1 + $0x804] ss:$16 sps:$4 sm:$0xff]  }
  0xc3   :  { %5068 = vmatpush1.bf16.msra.mxu0 %v7664_v10  ;;  %5601 = vmatpush1.bf16.msra.mxu1 %v7667_v13  ;;  %v7757_v10 = vld [vmem:[%s11268_s1 + $0x7e8] ss:$16 sps:$4 sm:$0xff]   ;;  %v7767_v13 = vld [vmem:[%s11268_s1 + $0x80c] ss:$16 sps:$4 sm:$0xff]  }
  0xc4   :  { %5069 = vmatprep.subr.bf16.mxu0 %v7672_v15  ;;  %5602 = vmatprep.subr.bf16.mxu1 %v7675_v11  ;;  %v7762_v15 = vld [vmem:[%s11268_s1 + $0x800] ss:$16 sps:$4 sm:$0xff]   ;;  %v6373_v11 = vcombine.low %v9270_v14, %v9270_v14  ;;  %v7773_v14 = vld [vmem:[%s11268_s1 + $0x82c] ss:$16 sps:$4 sm:$0xff]  }
  0xc5   :  { %5099 = vmatprep.mubr.bf16.mxu0 %v6374_v16  ;;  %5632 = vmatprep.mubr.bf16.mxu1 %v6374_v16  ;;  %v9468_v16 = vld [vmem:[%s11269_s0 + $0x20] sm:$0xff] }
  0xc7   :  { %5070 = vmatpush1.bf16.msra.mxu0 %v7670_v17  ;;  %5603 = vmatpush1.bf16.msra.mxu1 %v7673_v18  ;;  %v7765_v17 = vld [vmem:[%s11268_s1 + $0x808] ss:$16 sps:$4 sm:$0xff]   ;;  %v7770_v18 = vld [vmem:[%s11268_s1 + $0x824] ss:$16 sps:$4 sm:$0xff]  }
  0xc8   :  { %5071 = vmatprep.subr.bf16.mxu0 %v7678_v19  ;;  %5604 = vmatprep.subr.bf16.mxu1 %v7681_v20  ;;  %v6376_v19 = vcombine.high %v9468_v16, %v9468_v16  ;;  %v7768_v20 = vld [vmem:[%s11268_s1 + $0x820] ss:$16 sps:$4 sm:$0xff]  }
  0xcb   :  { %5072 = vmatpush1.bf16.msra.mxu0 %v7676_v21  ;;  %5605 = vmatpush1.bf16.msra.mxu1 %v7679_v22  ;;  %v7771_v21 = vld [vmem:[%s11268_s1 + $0x828] ss:$16 sps:$4 sm:$0xff]   ;;  %v7776_v22 = vld [vmem:[%s11268_s1 + $0x844] ss:$16 sps:$4 sm:$0xff]  }
  0xcc   :  { %5073 = vmatprep.subr.bf16.mxu0 %v7684_v23  ;;  %5606 = vmatprep.subr.bf16.mxu1 %v7687_v24  ;;  %v7779_v23 = vld [vmem:[%s11268_s1 + $0x84c] ss:$16 sps:$4 sm:$0xff]   ;;  %v7774_v24 = vld [vmem:[%s11268_s1 + $0x840] ss:$16 sps:$4 sm:$0xff]  }
  0xcf   :  { %5074 = vmatpush1.bf16.msra.mxu0 %v7682_v25  ;;  %5607 = vmatpush1.bf16.msra.mxu1 %v7685_v26  ;;  %v7777_v25 = vld [vmem:[%s11268_s1 + $0x848] ss:$16 sps:$4 sm:$0xff]   ;;  %v7782_v26 = vld [vmem:[%s11268_s1 + $0x864] ss:$16 sps:$4 sm:$0xff]  }
  0xd0   :  { %5075 = vmatprep.subr.bf16.mxu0 %v7690_v27  ;;  %5608 = vmatprep.subr.bf16.mxu1 %v7693_v28  ;;  %v7785_v27 = vld [vmem:[%s11268_s1 + $0x86c] ss:$16 sps:$4 sm:$0xff]   ;;  %v7780_v28 = vld [vmem:[%s11268_s1 + $0x860] ss:$16 sps:$4 sm:$0xff]  }
  0xd3   :  { %5076 = vmatpush1.bf16.msra.mxu0 %v7688_v29  ;;  %5609 = vmatpush1.bf16.msra.mxu1 %v7691_v30  ;;  %v7783_v29 = vld [vmem:[%s11268_s1 + $0x868] ss:$16 sps:$4 sm:$0xff]   ;;  %v7788_v30 = vld [vmem:[%s11268_s1 + $0x884] ss:$16 sps:$4 sm:$0xff]  }
  0xd4   :  { %5077 = vmatprep.subr.bf16.mxu0 %v7696_v31  ;;  %5610 = vmatprep.subr.bf16.mxu1 %v7699_v32  ;;  %v7791_v31 = vld [vmem:[%s11268_s1 + $0x88c] ss:$16 sps:$4 sm:$0xff]   ;;  %v7786_v32 = vld [vmem:[%s11268_s1 + $0x880] ss:$16 sps:$4 sm:$0xff]  }
  0xd7   :  { %5078 = vmatpush1.bf16.msra.mxu0 %v7694_v33  ;;  %5611 = vmatpush1.bf16.msra.mxu1 %v7697_v34  ;;  %v7789_v33 = vld [vmem:[%s11268_s1 + $0x888] ss:$16 sps:$4 sm:$0xff]   ;;  %v7794_v34 = vld [vmem:[%s11268_s1 + $0x8a4] ss:$16 sps:$4 sm:$0xff]  }
  0xd8   :  { %5079 = vmatprep.subr.bf16.mxu0 %v7702_v35  ;;  %5612 = vmatprep.subr.bf16.mxu1 %v7705_v36  ;;  %v7797_v35 = vld [vmem:[%s11268_s1 + $0x8ac] ss:$16 sps:$4 sm:$0xff]   ;;  %v7792_v36 = vld [vmem:[%s11268_s1 + $0x8a0] ss:$16 sps:$4 sm:$0xff]  }
  0xdb   :  { %5080 = vmatpush1.bf16.msra.mxu0 %v7700_v37  ;;  %5613 = vmatpush1.bf16.msra.mxu1 %v7703_v38  ;;  %v7795_v37 = vld [vmem:[%s11268_s1 + $0x8a8] ss:$16 sps:$4 sm:$0xff]   ;;  %v7800_v38 = vld [vmem:[%s11268_s1 + $0x8c4] ss:$16 sps:$4 sm:$0xff]  }
  0xdc   :  { %5081 = vmatprep.subr.bf16.mxu0 %v7708_v39  ;;  %5614 = vmatprep.subr.bf16.mxu1 %v7711_v40  ;;  %v7803_v39 = vld [vmem:[%s11268_s1 + $0x8cc] ss:$16 sps:$4 sm:$0xff]   ;;  %v7798_v40 = vld [vmem:[%s11268_s1 + $0x8c0] ss:$16 sps:$4 sm:$0xff]  }
  0xdf   :  { %5082 = vmatpush1.bf16.msra.mxu0 %v7706_v41  ;;  %5615 = vmatpush1.bf16.msra.mxu1 %v7709_v42  ;;  %v7801_v41 = vld [vmem:[%s11268_s1 + $0x8c8] ss:$16 sps:$4 sm:$0xff]   ;;  %v7806_v42 = vld [vmem:[%s11268_s1 + $0x8e4] ss:$16 sps:$4 sm:$0xff]  }
  0xe0   :  { %5083 = vmatprep.subr.bf16.mxu0 %v7714_v43  ;;  %5616 = vmatprep.subr.bf16.mxu1 %v7717_v44  ;;  %v7809_v43 = vld [vmem:[%s11268_s1 + $0x8ec] ss:$16 sps:$4 sm:$0xff]   ;;  %v7804_v44 = vld [vmem:[%s11268_s1 + $0x8e0] ss:$16 sps:$4 sm:$0xff]  }
  0xe3   :  { %5084 = vmatpush1.bf16.msra.mxu0 %v7712_v45  ;;  %5617 = vmatpush1.bf16.msra.mxu1 %v7715_v46  ;;  %v7807_v45 = vld [vmem:[%s11268_s1 + $0x8e8] ss:$16 sps:$4 sm:$0xff]   ;;  %v7812_v46 = vld [vmem:[%s11268_s1 + $0x904] ss:$16 sps:$4 sm:$0xff]  }
  0xe4   :  { %5085 = vmatprep.subr.bf16.mxu0 %v7720_v47  ;;  %5618 = vmatprep.subr.bf16.mxu1 %v7723_v48  ;;  %v7815_v47 = vld [vmem:[%s11268_s1 + $0x90c] ss:$16 sps:$4 sm:$0xff]   ;;  %v7810_v48 = vld [vmem:[%s11268_s1 + $0x900] ss:$16 sps:$4 sm:$0xff]  }
  0xe7   :  { %5086 = vmatpush1.bf16.msra.mxu0 %v7718_v49  ;;  %5619 = vmatpush1.bf16.msra.mxu1 %v7721_v50  ;;  %v7813_v49 = vld [vmem:[%s11268_s1 + $0x908] ss:$16 sps:$4 sm:$0xff]   ;;  %v7818_v50 = vld [vmem:[%s11268_s1 + $0x924] ss:$16 sps:$4 sm:$0xff]  }
  0xe8   :  { %5087 = vmatprep.subr.bf16.mxu0 %v7726_v51  ;;  %5620 = vmatprep.subr.bf16.mxu1 %v7729_v52  ;;  %v7821_v51 = vld [vmem:[%s11268_s1 + $0x92c] ss:$16 sps:$4 sm:$0xff]   ;;  %v7816_v52 = vld [vmem:[%s11268_s1 + $0x920] ss:$16 sps:$4 sm:$0xff]  }
  0xeb   :  { %5088 = vmatpush1.bf16.msra.mxu0 %v7724_v53  ;;  %5621 = vmatpush1.bf16.msra.mxu1 %v7727_v54  ;;  %v7819_v53 = vld [vmem:[%s11268_s1 + $0x928] ss:$16 sps:$4 sm:$0xff]   ;;  %v7824_v54 = vld [vmem:[%s11268_s1 + $0x944] ss:$16 sps:$4 sm:$0xff]  }
  0xec   :  { %5089 = vmatprep.subr.bf16.mxu0 %v7732_v55  ;;  %5622 = vmatprep.subr.bf16.mxu1 %v7735_v56  ;;  %v7827_v55 = vld [vmem:[%s11268_s1 + $0x94c] ss:$16 sps:$4 sm:$0xff]   ;;  %v7822_v56 = vld [vmem:[%s11268_s1 + $0x940] ss:$16 sps:$4 sm:$0xff]  }
  0xef   :  { %5090 = vmatpush1.bf16.msra.mxu0 %v7730_v57  ;;  %5623 = vmatpush1.bf16.msra.mxu1 %v7733_v58  ;;  %v7825_v57 = vld [vmem:[%s11268_s1 + $0x948] ss:$16 sps:$4 sm:$0xff]   ;;  %v7830_v58 = vld [vmem:[%s11268_s1 + $0x964] ss:$16 sps:$4 sm:$0xff]  }
  0xf0   :  { %5091 = vmatprep.subr.bf16.mxu0 %v7738_v59  ;;  %5624 = vmatprep.subr.bf16.mxu1 %v7741_v60  ;;  %v7833_v59 = vld [vmem:[%s11268_s1 + $0x96c] ss:$16 sps:$4 sm:$0xff]   ;;  %v7828_v60 = vld [vmem:[%s11268_s1 + $0x960] ss:$16 sps:$4 sm:$0xff]  }
  0xf3   :  { %5092 = vmatpush1.bf16.msra.mxu0 %v7736_v61  ;;  %5625 = vmatpush1.bf16.msra.mxu1 %v7739_v62  ;;  %v7831_v61 = vld [vmem:[%s11268_s1 + $0x968] ss:$16 sps:$4 sm:$0xff]   ;;  %v7836_v62 = vld [vmem:[%s11268_s1 + $0x984] ss:$16 sps:$4 sm:$0xff]  }
  0xf4   :  { %5093 = vmatprep.subr.bf16.mxu0 %v7744_v63  ;;  %5626 = vmatprep.subr.bf16.mxu1 %v7747_v0  ;;  %v7839_v63 = vld [vmem:[%s11268_s1 + $0x98c] ss:$16 sps:$4 sm:$0xff]   ;;  %v7834_v0 = vld [vmem:[%s11268_s1 + $0x980] ss:$16 sps:$4 sm:$0xff]  }
  0xf7   :  { %5094 = vmatpush1.bf16.msra.mxu0 %v7742_v1  ;;  %5627 = vmatpush1.bf16.msra.mxu1 %v7745_v2  ;;  %v7837_v1 = vld [vmem:[%s11268_s1 + $0x988] ss:$16 sps:$4 sm:$0xff]   ;;  %v7842_v2 = vld [vmem:[%s11268_s1 + $0x9a4] ss:$16 sps:$4 sm:$0xff]  }
  0xf8   :  { %5095 = vmatprep.subr.bf16.mxu0 %v7750_v3  ;;  %5628 = vmatprep.subr.bf16.mxu1 %v7753_v4  ;;  %v7845_v3 = vld [vmem:[%s11268_s1 + $0x9ac] ss:$16 sps:$4 sm:$0xff]   ;;  %v7840_v4 = vld [vmem:[%s11268_s1 + $0x9a0] ss:$16 sps:$4 sm:$0xff]  }
  0xfb   :  { %5096 = vmatpush1.bf16.msra.mxu0 %v7748_v5  ;;  %5629 = vmatpush1.bf16.msra.mxu1 %v7751_v6  ;;  %v7843_v5 = vld [vmem:[%s11268_s1 + $0x9a8] ss:$16 sps:$4 sm:$0xff]   ;;  %v7848_v6 = vld [vmem:[%s11268_s1 + $0x9c4] ss:$16 sps:$4 sm:$0xff]  }
  0xfc   :  { %5097 = vmatprep.subr.bf16.mxu0 %v7756_v7  ;;  %5630 = vmatprep.subr.bf16.mxu1 %v7759_v8  ;;  %v7851_v7 = vld [vmem:[%s11268_s1 + $0x9cc] ss:$16 sps:$4 sm:$0xff]   ;;  %v7846_v8 = vld [vmem:[%s11268_s1 + $0x9c0] ss:$16 sps:$4 sm:$0xff]  }
  0xff   :  { %5098 = vmatpush1.bf16.msra.mxu0 %v7754_v9  ;;  %5631 = vmatpush1.bf16.msra.mxu1 %v7757_v10  ;;  %v7849_v9 = vld [vmem:[%s11268_s1 + $0x9c8] ss:$16 sps:$4 sm:$0xff]   ;;  %v7854_v10 = vld [vmem:[%s11268_s1 + $0x9e4] ss:$16 sps:$4 sm:$0xff]  }
 0x100   :  { %5108 = vmatprep.subr.bf16.mxu0 %v7764_v12  ;;  %5641 = vmatprep.subr.bf16.mxu1 %v7767_v13  ;;  %v7857_v12 = vld [vmem:[%s11268_s1 + $0x9ec] ss:$16 sps:$4 sm:$0xff]   ;;  %v7852_v13 = vld [vmem:[%s11268_s1 + $0x9e0] ss:$16 sps:$4 sm:$0xff]  }
 0x102   :  { %5100 = vmatmul.mubr.bf16.vlgmr.msra.gmra.mrb[0].mxu0 %v6373_v11  ;;  %5633 = vmatmul.mubr.bf16.vlgmr.msra.gmra.mrb[0].mxu1 %v6373_v11  ;;  %v7862_v11 = vld [vmem:[%s11268_s1 + $0xa04] ss:$16 sps:$4 sm:$0xff]  }
 0x103   :  { %5109 = vmatpush1.bf16.msra.mxu0 %v7762_v15  ;;  %5642 = vmatpush1.bf16.msra.mxu1 %v7765_v17  ;;  %v7855_v15 = vld [vmem:[%s11268_s1 + $0x9e8] ss:$16 sps:$4 sm:$0xff]   ;;  %v7865_v17 = vld [vmem:[%s11268_s1 + $0xa0c] ss:$16 sps:$4 sm:$0xff]  }
 0x104   :  { %5110 = vmatprep.subr.bf16.mxu0 %v7770_v18  ;;  %5643 = vmatprep.subr.bf16.mxu1 %v7773_v14  ;;  %v9664_v18 = vld [vmem:[%s11269_s0 + $0x28] sm:$0xff]  ;;  %v6375_v14 = vcombine.low %v9468_v16, %v9468_v16 }
 0x105   :  { %5140 = vmatprep.mubr.bf16.mxu0 %v6376_v19  ;;  %5673 = vmatprep.mubr.bf16.mxu1 %v6376_v19  ;;  %v7860_v19 = vld [vmem:[%s11268_s1 + $0xa00] ss:$16 sps:$4 sm:$0xff]   ;;  %v7871_v16 = vld [vmem:[%s11268_s1 + $0xa2c] ss:$16 sps:$4 sm:$0xff]  }
 0x107   :  { %5111 = vmatpush1.bf16.msra.mxu0 %v7768_v20  ;;  %5644 = vmatpush1.bf16.msra.mxu1 %v7771_v21  ;;  %v7863_v20 = vld [vmem:[%s11268_s1 + $0xa08] ss:$16 sps:$4 sm:$0xff]   ;;  %v7868_v21 = vld [vmem:[%s11268_s1 + $0xa24] ss:$16 sps:$4 sm:$0xff]  }
 0x108   :  { %5112 = vmatprep.subr.bf16.mxu0 %v7776_v22  ;;  %5645 = vmatprep.subr.bf16.mxu1 %v7779_v23  ;;  %v6378_v22 = vcombine.high %v9664_v18, %v9664_v18  ;;  %v7866_v23 = vld [vmem:[%s11268_s1 + $0xa20] ss:$16 sps:$4 sm:$0xff]  }
 0x10b   :  { %5113 = vmatpush1.bf16.msra.mxu0 %v7774_v24  ;;  %5646 = vmatpush1.bf16.msra.mxu1 %v7777_v25  ;;  %v7869_v24 = vld [vmem:[%s11268_s1 + $0xa28] ss:$16 sps:$4 sm:$0xff]   ;;  %v7874_v25 = vld [vmem:[%s11268_s1 + $0xa44] ss:$16 sps:$4 sm:$0xff]  }
 0x10c   :  { %5114 = vmatprep.subr.bf16.mxu0 %v7782_v26  ;;  %5647 = vmatprep.subr.bf16.mxu1 %v7785_v27  ;;  %v7877_v26 = vld [vmem:[%s11268_s1 + $0xa4c] ss:$16 sps:$4 sm:$0xff]   ;;  %v7872_v27 = vld [vmem:[%s11268_s1 + $0xa40] ss:$16 sps:$4 sm:$0xff]  }
 0x10f   :  { %5115 = vmatpush1.bf16.msra.mxu0 %v7780_v28  ;;  %5648 = vmatpush1.bf16.msra.mxu1 %v7783_v29  ;;  %v7875_v28 = vld [vmem:[%s11268_s1 + $0xa48] ss:$16 sps:$4 sm:$0xff]   ;;  %v7880_v29 = vld [vmem:[%s11268_s1 + $0xa64] ss:$16 sps:$4 sm:$0xff]  }
 0x110   :  { %5116 = vmatprep.subr.bf16.mxu0 %v7788_v30  ;;  %5649 = vmatprep.subr.bf16.mxu1 %v7791_v31  ;;  %v7883_v30 = vld [vmem:[%s11268_s1 + $0xa6c] ss:$16 sps:$4 sm:$0xff]   ;;  %v7878_v31 = vld [vmem:[%s11268_s1 + $0xa60] ss:$16 sps:$4 sm:$0xff]  }
 0x113   :  { %5117 = vmatpush1.bf16.msra.mxu0 %v7786_v32  ;;  %5650 = vmatpush1.bf16.msra.mxu1 %v7789_v33  ;;  %v7881_v32 = vld [vmem:[%s11268_s1 + $0xa68] ss:$16 sps:$4 sm:$0xff]   ;;  %v7886_v33 = vld [vmem:[%s11268_s1 + $0xa84] ss:$16 sps:$4 sm:$0xff]  }
 0x114   :  { %5118 = vmatprep.subr.bf16.mxu0 %v7794_v34  ;;  %5651 = vmatprep.subr.bf16.mxu1 %v7797_v35  ;;  %v7889_v34 = vld [vmem:[%s11268_s1 + $0xa8c] ss:$16 sps:$4 sm:$0xff]   ;;  %v7884_v35 = vld [vmem:[%s11268_s1 + $0xa80] ss:$16 sps:$4 sm:$0xff]  }
 0x117   :  { %5119 = vmatpush1.bf16.msra.mxu0 %v7792_v36  ;;  %5652 = vmatpush1.bf16.msra.mxu1 %v7795_v37  ;;  %v7887_v36 = vld [vmem:[%s11268_s1 + $0xa88] ss:$16 sps:$4 sm:$0xff]   ;;  %v7892_v37 = vld [vmem:[%s11268_s1 + $0xaa4] ss:$16 sps:$4 sm:$0xff]  }
 0x118   :  { %5120 = vmatprep.subr.bf16.mxu0 %v7800_v38  ;;  %5653 = vmatprep.subr.bf16.mxu1 %v7803_v39  ;;  %v7895_v38 = vld [vmem:[%s11268_s1 + $0xaac] ss:$16 sps:$4 sm:$0xff]   ;;  %v7890_v39 = vld [vmem:[%s11268_s1 + $0xaa0] ss:$16 sps:$4 sm:$0xff]  }
 0x11b   :  { %5121 = vmatpush1.bf16.msra.mxu0 %v7798_v40  ;;  %5654 = vmatpush1.bf16.msra.mxu1 %v7801_v41  ;;  %v7893_v40 = vld [vmem:[%s11268_s1 + $0xaa8] ss:$16 sps:$4 sm:$0xff]   ;;  %v7898_v41 = vld [vmem:[%s11268_s1 + $0xac4] ss:$16 sps:$4 sm:$0xff]  }
 0x11c   :  { %5122 = vmatprep.subr.bf16.mxu0 %v7806_v42  ;;  %5655 = vmatprep.subr.bf16.mxu1 %v7809_v43  ;;  %v7901_v42 = vld [vmem:[%s11268_s1 + $0xacc] ss:$16 sps:$4 sm:$0xff]   ;;  %v7896_v43 = vld [vmem:[%s11268_s1 + $0xac0] ss:$16 sps:$4 sm:$0xff]  }
 0x11f   :  { %5123 = vmatpush1.bf16.msra.mxu0 %v7804_v44  ;;  %5656 = vmatpush1.bf16.msra.mxu1 %v7807_v45  ;;  %v7899_v44 = vld [vmem:[%s11268_s1 + $0xac8] ss:$16 sps:$4 sm:$0xff]   ;;  %v7904_v45 = vld [vmem:[%s11268_s1 + $0xae4] ss:$16 sps:$4 sm:$0xff]  }
 0x120   :  { %5124 = vmatprep.subr.bf16.mxu0 %v7812_v46  ;;  %5657 = vmatprep.subr.bf16.mxu1 %v7815_v47  ;;  %v7907_v46 = vld [vmem:[%s11268_s1 + $0xaec] ss:$16 sps:$4 sm:$0xff]   ;;  %v7902_v47 = vld [vmem:[%s11268_s1 + $0xae0] ss:$16 sps:$4 sm:$0xff]  }
 0x123   :  { %5125 = vmatpush1.bf16.msra.mxu0 %v7810_v48  ;;  %5658 = vmatpush1.bf16.msra.mxu1 %v7813_v49  ;;  %v7905_v48 = vld [vmem:[%s11268_s1 + $0xae8] ss:$16 sps:$4 sm:$0xff]   ;;  %v7910_v49 = vld [vmem:[%s11268_s1 + $0xb04] ss:$16 sps:$4 sm:$0xff]  }
 0x124   :  { %5126 = vmatprep.subr.bf16.mxu0 %v7818_v50  ;;  %5659 = vmatprep.subr.bf16.mxu1 %v7821_v51  ;;  %v7913_v50 = vld [vmem:[%s11268_s1 + $0xb0c] ss:$16 sps:$4 sm:$0xff]   ;;  %v7908_v51 = vld [vmem:[%s11268_s1 + $0xb00] ss:$16 sps:$4 sm:$0xff]  }
 0x127   :  { %5127 = vmatpush1.bf16.msra.mxu0 %v7816_v52  ;;  %5660 = vmatpush1.bf16.msra.mxu1 %v7819_v53  ;;  %v7911_v52 = vld [vmem:[%s11268_s1 + $0xb08] ss:$16 sps:$4 sm:$0xff]   ;;  %v7916_v53 = vld [vmem:[%s11268_s1 + $0xb24] ss:$16 sps:$4 sm:$0xff]  }
 0x128   :  { %5128 = vmatprep.subr.bf16.mxu0 %v7824_v54  ;;  %5661 = vmatprep.subr.bf16.mxu1 %v7827_v55  ;;  %v7919_v54 = vld [vmem:[%s11268_s1 + $0xb2c] ss:$16 sps:$4 sm:$0xff]   ;;  %v7914_v55 = vld [vmem:[%s11268_s1 + $0xb20] ss:$16 sps:$4 sm:$0xff]  }
 0x12b   :  { %5129 = vmatpush1.bf16.msra.mxu0 %v7822_v56  ;;  %5662 = vmatpush1.bf16.msra.mxu1 %v7825_v57  ;;  %v7917_v56 = vld [vmem:[%s11268_s1 + $0xb28] ss:$16 sps:$4 sm:$0xff]   ;;  %v7922_v57 = vld [vmem:[%s11268_s1 + $0xb44] ss:$16 sps:$4 sm:$0xff]  }
 0x12c   :  { %5130 = vmatprep.subr.bf16.mxu0 %v7830_v58  ;;  %5663 = vmatprep.subr.bf16.mxu1 %v7833_v59  ;;  %v7925_v58 = vld [vmem:[%s11268_s1 + $0xb4c] ss:$16 sps:$4 sm:$0xff]   ;;  %v7920_v59 = vld [vmem:[%s11268_s1 + $0xb40] ss:$16 sps:$4 sm:$0xff]  }
 0x12f   :  { %5131 = vmatpush1.bf16.msra.mxu0 %v7828_v60  ;;  %5664 = vmatpush1.bf16.msra.mxu1 %v7831_v61  ;;  %v7923_v60 = vld [vmem:[%s11268_s1 + $0xb48] ss:$16 sps:$4 sm:$0xff]   ;;  %v7928_v61 = vld [vmem:[%s11268_s1 + $0xb64] ss:$16 sps:$4 sm:$0xff]  }
 0x130   :  { %5132 = vmatprep.subr.bf16.mxu0 %v7836_v62  ;;  %5665 = vmatprep.subr.bf16.mxu1 %v7839_v63  ;;  %v7931_v62 = vld [vmem:[%s11268_s1 + $0xb6c] ss:$16 sps:$4 sm:$0xff]   ;;  %v7926_v63 = vld [vmem:[%s11268_s1 + $0xb60] ss:$16 sps:$4 sm:$0xff]  }
 0x133   :  { %5133 = vmatpush1.bf16.msra.mxu0 %v7834_v0  ;;  %5666 = vmatpush1.bf16.msra.mxu1 %v7837_v1  ;;  %v7929_v0 = vld [vmem:[%s11268_s1 + $0xb68] ss:$16 sps:$4 sm:$0xff]   ;;  %v7934_v1 = vld [vmem:[%s11268_s1 + $0xb84] ss:$16 sps:$4 sm:$0xff]  }
 0x134   :  { %5134 = vmatprep.subr.bf16.mxu0 %v7842_v2  ;;  %5667 = vmatprep.subr.bf16.mxu1 %v7845_v3  ;;  %v7937_v2 = vld [vmem:[%s11268_s1 + $0xb8c] ss:$16 sps:$4 sm:$0xff]   ;;  %v7932_v3 = vld [vmem:[%s11268_s1 + $0xb80] ss:$16 sps:$4 sm:$0xff]  }
 0x137   :  { %5135 = vmatpush1.bf16.msra.mxu0 %v7840_v4  ;;  %5668 = vmatpush1.bf16.msra.mxu1 %v7843_v5  ;;  %v7935_v4 = vld [vmem:[%s11268_s1 + $0xb88] ss:$16 sps:$4 sm:$0xff]   ;;  %v7940_v5 = vld [vmem:[%s11268_s1 + $0xba4] ss:$16 sps:$4 sm:$0xff]  }
 0x138   :  { %5136 = vmatprep.subr.bf16.mxu0 %v7848_v6  ;;  %5669 = vmatprep.subr.bf16.mxu1 %v7851_v7  ;;  %v7943_v6 = vld [vmem:[%s11268_s1 + $0xbac] ss:$16 sps:$4 sm:$0xff]   ;;  %v7938_v7 = vld [vmem:[%s11268_s1 + $0xba0] ss:$16 sps:$4 sm:$0xff]  }
 0x13b   :  { %5137 = vmatpush1.bf16.msra.mxu0 %v7846_v8  ;;  %5670 = vmatpush1.bf16.msra.mxu1 %v7849_v9  ;;  %v7941_v8 = vld [vmem:[%s11268_s1 + $0xba8] ss:$16 sps:$4 sm:$0xff]   ;;  %v7946_v9 = vld [vmem:[%s11268_s1 + $0xbc4] ss:$16 sps:$4 sm:$0xff]  }
 0x13c   :  { %5138 = vmatprep.subr.bf16.mxu0 %v7854_v10  ;;  %5671 = vmatprep.subr.bf16.mxu1 %v7857_v12  ;;  %v7949_v10 = vld [vmem:[%s11268_s1 + $0xbcc] ss:$16 sps:$4 sm:$0xff]   ;;  %v7944_v12 = vld [vmem:[%s11268_s1 + $0xbc0] ss:$16 sps:$4 sm:$0xff]  }
 0x13f   :  { %5139 = vmatpush1.bf16.msra.mxu0 %v7852_v13  ;;  %5672 = vmatpush1.bf16.msra.mxu1 %v7855_v15  ;;  %v7947_v13 = vld [vmem:[%s11268_s1 + $0xbc8] ss:$16 sps:$4 sm:$0xff]   ;;  %v7952_v15 = vld [vmem:[%s11268_s1 + $0xbe4] ss:$16 sps:$4 sm:$0xff]  }
 0x140   :  { %5149 = vmatprep.subr.bf16.mxu0 %v7862_v11  ;;  %5682 = vmatprep.subr.bf16.mxu1 %v7865_v17  ;;  %v7955_v11 = vld [vmem:[%s11268_s1 + $0xbec] ss:$16 sps:$4 sm:$0xff]   ;;  %v7950_v17 = vld [vmem:[%s11268_s1 + $0xbe0] ss:$16 sps:$4 sm:$0xff]  }
 0x142   :  { %5141 = vmatmul.mubr.bf16.vlgmr.msra.gmra.mrb[0].mxu0 %v6375_v14  ;;  %5674 = vmatmul.mubr.bf16.vlgmr.msra.gmra.mrb[0].mxu1 %v6375_v14  ;;  %v7953_v14 = vld [vmem:[%s11268_s1 + $0xbe8] ss:$16 sps:$4 sm:$0xff]  }
 0x143   :  { %5150 = vmatpush1.bf16.msra.mxu0 %v7860_v19  ;;  %5683 = vmatpush1.bf16.msra.mxu1 %v7863_v20  ;;  %v7960_v19 = vld [vmem:[%s11268_s1 + $0xc04] ss:$16 sps:$4 sm:$0xff]   ;;  %v7963_v20 = vld [vmem:[%s11268_s1 + $0xc0c] ss:$16 sps:$4 sm:$0xff]  }
 0x144   :  { %5151 = vmatprep.subr.bf16.mxu0 %v7868_v21  ;;  %5684 = vmatprep.subr.bf16.mxu1 %v7871_v16  ;;  %v9865_v21 = vld [vmem:[%s11269_s0 + $0x30] sm:$0xff]  ;;  %v6377_v16 = vcombine.low %v9664_v18, %v9664_v18  ;;  %v7969_v18 = vld [vmem:[%s11268_s1 + $0xc2c] ss:$16 sps:$4 sm:$0xff]  }
 0x145   :  { %5181 = vmatprep.mubr.bf16.mxu0 %v6378_v22  ;;  %5714 = vmatprep.mubr.bf16.mxu1 %v6378_v22  ;;  %v7958_v22 = vld [vmem:[%s11268_s1 + $0xc00] ss:$16 sps:$4 sm:$0xff]  }
 0x147   :  { %5152 = vmatpush1.bf16.msra.mxu0 %v7866_v23  ;;  %5685 = vmatpush1.bf16.msra.mxu1 %v7869_v24  ;;  %v7961_v23 = vld [vmem:[%s11268_s1 + $0xc08] ss:$16 sps:$4 sm:$0xff]   ;;  %v7966_v24 = vld [vmem:[%s11268_s1 + $0xc24] ss:$16 sps:$4 sm:$0xff]  }
 0x148   :  { %5153 = vmatprep.subr.bf16.mxu0 %v7874_v25  ;;  %5686 = vmatprep.subr.bf16.mxu1 %v7877_v26  ;;  %v6380_v25 = vcombine.high %v9865_v21, %v9865_v21  ;;  %v7964_v26 = vld [vmem:[%s11268_s1 + $0xc20] ss:$16 sps:$4 sm:$0xff]  }
 0x14b   :  { %5154 = vmatpush1.bf16.msra.mxu0 %v7872_v27  ;;  %5687 = vmatpush1.bf16.msra.mxu1 %v7875_v28  ;;  %v7967_v27 = vld [vmem:[%s11268_s1 + $0xc28] ss:$16 sps:$4 sm:$0xff]   ;;  %v7972_v28 = vld [vmem:[%s11268_s1 + $0xc44] ss:$16 sps:$4 sm:$0xff]  }
 0x14c   :  { %5155 = vmatprep.subr.bf16.mxu0 %v7880_v29  ;;  %5688 = vmatprep.subr.bf16.mxu1 %v7883_v30  ;;  %v7975_v29 = vld [vmem:[%s11268_s1 + $0xc4c] ss:$16 sps:$4 sm:$0xff]   ;;  %v7970_v30 = vld [vmem:[%s11268_s1 + $0xc40] ss:$16 sps:$4 sm:$0xff]  }
 0x14f   :  { %5156 = vmatpush1.bf16.msra.mxu0 %v7878_v31  ;;  %5689 = vmatpush1.bf16.msra.mxu1 %v7881_v32  ;;  %v7973_v31 = vld [vmem:[%s11268_s1 + $0xc48] ss:$16 sps:$4 sm:$0xff]   ;;  %v7978_v32 = vld [vmem:[%s11268_s1 + $0xc64] ss:$16 sps:$4 sm:$0xff]  }
 0x150   :  { %5157 = vmatprep.subr.bf16.mxu0 %v7886_v33  ;;  %5690 = vmatprep.subr.bf16.mxu1 %v7889_v34  ;;  %v7981_v33 = vld [vmem:[%s11268_s1 + $0xc6c] ss:$16 sps:$4 sm:$0xff]   ;;  %v7976_v34 = vld [vmem:[%s11268_s1 + $0xc60] ss:$16 sps:$4 sm:$0xff]  }
 0x153   :  { %5158 = vmatpush1.bf16.msra.mxu0 %v7884_v35  ;;  %5691 = vmatpush1.bf16.msra.mxu1 %v7887_v36  ;;  %v7979_v35 = vld [vmem:[%s11268_s1 + $0xc68] ss:$16 sps:$4 sm:$0xff]   ;;  %v7984_v36 = vld [vmem:[%s11268_s1 + $0xc84] ss:$16 sps:$4 sm:$0xff]  }
 0x154   :  { %5159 = vmatprep.subr.bf16.mxu0 %v7892_v37  ;;  %5692 = vmatprep.subr.bf16.mxu1 %v7895_v38  ;;  %v7987_v37 = vld [vmem:[%s11268_s1 + $0xc8c] ss:$16 sps:$4 sm:$0xff]   ;;  %v7982_v38 = vld [vmem:[%s11268_s1 + $0xc80] ss:$16 sps:$4 sm:$0xff]  }
 0x157   :  { %5160 = vmatpush1.bf16.msra.mxu0 %v7890_v39  ;;  %5693 = vmatpush1.bf16.msra.mxu1 %v7893_v40  ;;  %v7985_v39 = vld [vmem:[%s11268_s1 + $0xc88] ss:$16 sps:$4 sm:$0xff]   ;;  %v7990_v40 = vld [vmem:[%s11268_s1 + $0xca4] ss:$16 sps:$4 sm:$0xff]  }
 0x158   :  { %5161 = vmatprep.subr.bf16.mxu0 %v7898_v41  ;;  %5694 = vmatprep.subr.bf16.mxu1 %v7901_v42  ;;  %v7993_v41 = vld [vmem:[%s11268_s1 + $0xcac] ss:$16 sps:$4 sm:$0xff]   ;;  %v7988_v42 = vld [vmem:[%s11268_s1 + $0xca0] ss:$16 sps:$4 sm:$0xff]  }
 0x15b   :  { %5162 = vmatpush1.bf16.msra.mxu0 %v7896_v43  ;;  %5695 = vmatpush1.bf16.msra.mxu1 %v7899_v44  ;;  %v7991_v43 = vld [vmem:[%s11268_s1 + $0xca8] ss:$16 sps:$4 sm:$0xff]   ;;  %v7996_v44 = vld [vmem:[%s11268_s1 + $0xcc4] ss:$16 sps:$4 sm:$0xff]  }
 0x15c   :  { %5163 = vmatprep.subr.bf16.mxu0 %v7904_v45  ;;  %5696 = vmatprep.subr.bf16.mxu1 %v7907_v46  ;;  %v7999_v45 = vld [vmem:[%s11268_s1 + $0xccc] ss:$16 sps:$4 sm:$0xff]   ;;  %v7994_v46 = vld [vmem:[%s11268_s1 + $0xcc0] ss:$16 sps:$4 sm:$0xff]  }
 0x15f   :  { %5164 = vmatpush1.bf16.msra.mxu0 %v7902_v47  ;;  %5697 = vmatpush1.bf16.msra.mxu1 %v7905_v48  ;;  %v7997_v47 = vld [vmem:[%s11268_s1 + $0xcc8] ss:$16 sps:$4 sm:$0xff]   ;;  %v8002_v48 = vld [vmem:[%s11268_s1 + $0xce4] ss:$16 sps:$4 sm:$0xff]  }
 0x160   :  { %5165 = vmatprep.subr.bf16.mxu0 %v7910_v49  ;;  %5698 = vmatprep.subr.bf16.mxu1 %v7913_v50  ;;  %v8005_v49 = vld [vmem:[%s11268_s1 + $0xcec] ss:$16 sps:$4 sm:$0xff]   ;;  %v8000_v50 = vld [vmem:[%s11268_s1 + $0xce0] ss:$16 sps:$4 sm:$0xff]  }
 0x163   :  { %5166 = vmatpush1.bf16.msra.mxu0 %v7908_v51  ;;  %5699 = vmatpush1.bf16.msra.mxu1 %v7911_v52  ;;  %v8003_v51 = vld [vmem:[%s11268_s1 + $0xce8] ss:$16 sps:$4 sm:$0xff]   ;;  %v8008_v52 = vld [vmem:[%s11268_s1 + $0xd04] ss:$16 sps:$4 sm:$0xff]  }
 0x164   :  { %5167 = vmatprep.subr.bf16.mxu0 %v7916_v53  ;;  %5700 = vmatprep.subr.bf16.mxu1 %v7919_v54  ;;  %v8011_v53 = vld [vmem:[%s11268_s1 + $0xd0c] ss:$16 sps:$4 sm:$0xff]   ;;  %v8006_v54 = vld [vmem:[%s11268_s1 + $0xd00] ss:$16 sps:$4 sm:$0xff]  }
 0x167   :  { %5168 = vmatpush1.bf16.msra.mxu0 %v7914_v55  ;;  %5701 = vmatpush1.bf16.msra.mxu1 %v7917_v56  ;;  %v8009_v55 = vld [vmem:[%s11268_s1 + $0xd08] ss:$16 sps:$4 sm:$0xff]   ;;  %v8014_v56 = vld [vmem:[%s11268_s1 + $0xd24] ss:$16 sps:$4 sm:$0xff]  }
 0x168   :  { %5169 = vmatprep.subr.bf16.mxu0 %v7922_v57  ;;  %5702 = vmatprep.subr.bf16.mxu1 %v7925_v58  ;;  %v8017_v57 = vld [vmem:[%s11268_s1 + $0xd2c] ss:$16 sps:$4 sm:$0xff]   ;;  %v8012_v58 = vld [vmem:[%s11268_s1 + $0xd20] ss:$16 sps:$4 sm:$0xff]  }
 0x16b   :  { %5170 = vmatpush1.bf16.msra.mxu0 %v7920_v59  ;;  %5703 = vmatpush1.bf16.msra.mxu1 %v7923_v60  ;;  %v8015_v59 = vld [vmem:[%s11268_s1 + $0xd28] ss:$16 sps:$4 sm:$0xff]   ;;  %v8020_v60 = vld [vmem:[%s11268_s1 + $0xd44] ss:$16 sps:$4 sm:$0xff]  }
 0x16c   :  { %5171 = vmatprep.subr.bf16.mxu0 %v7928_v61  ;;  %5704 = vmatprep.subr.bf16.mxu1 %v7931_v62  ;;  %v8023_v61 = vld [vmem:[%s11268_s1 + $0xd4c] ss:$16 sps:$4 sm:$0xff]   ;;  %v8018_v62 = vld [vmem:[%s11268_s1 + $0xd40] ss:$16 sps:$4 sm:$0xff]  }
 0x16f   :  { %5172 = vmatpush1.bf16.msra.mxu0 %v7926_v63  ;;  %5705 = vmatpush1.bf16.msra.mxu1 %v7929_v0  ;;  %v8021_v63 = vld [vmem:[%s11268_s1 + $0xd48] ss:$16 sps:$4 sm:$0xff]   ;;  %v8026_v0 = vld [vmem:[%s11268_s1 + $0xd64] ss:$16 sps:$4 sm:$0xff]  }
 0x170   :  { %5173 = vmatprep.subr.bf16.mxu0 %v7934_v1  ;;  %5706 = vmatprep.subr.bf16.mxu1 %v7937_v2  ;;  %v8029_v1 = vld [vmem:[%s11268_s1 + $0xd6c] ss:$16 sps:$4 sm:$0xff]   ;;  %v8024_v2 = vld [vmem:[%s11268_s1 + $0xd60] ss:$16 sps:$4 sm:$0xff]  }
 0x173   :  { %5174 = vmatpush1.bf16.msra.mxu0 %v7932_v3  ;;  %5707 = vmatpush1.bf16.msra.mxu1 %v7935_v4  ;;  %v8027_v3 = vld [vmem:[%s11268_s1 + $0xd68] ss:$16 sps:$4 sm:$0xff]   ;;  %v8032_v4 = vld [vmem:[%s11268_s1 + $0xd84] ss:$16 sps:$4 sm:$0xff]  }
 0x174   :  { %5175 = vmatprep.subr.bf16.mxu0 %v7940_v5  ;;  %5708 = vmatprep.subr.bf16.mxu1 %v7943_v6  ;;  %v8035_v5 = vld [vmem:[%s11268_s1 + $0xd8c] ss:$16 sps:$4 sm:$0xff]   ;;  %v8030_v6 = vld [vmem:[%s11268_s1 + $0xd80] ss:$16 sps:$4 sm:$0xff]  }
 0x177   :  { %5176 = vmatpush1.bf16.msra.mxu0 %v7938_v7  ;;  %5709 = vmatpush1.bf16.msra.mxu1 %v7941_v8  ;;  %v8033_v7 = vld [vmem:[%s11268_s1 + $0xd88] ss:$16 sps:$4 sm:$0xff]   ;;  %v8038_v8 = vld [vmem:[%s11268_s1 + $0xda4] ss:$16 sps:$4 sm:$0xff]  }
 0x178   :  { %5177 = vmatprep.subr.bf16.mxu0 %v7946_v9  ;;  %5710 = vmatprep.subr.bf16.mxu1 %v7949_v10  ;;  %v8041_v9 = vld [vmem:[%s11268_s1 + $0xdac] ss:$16 sps:$4 sm:$0xff]   ;;  %v8036_v10 = vld [vmem:[%s11268_s1 + $0xda0] ss:$16 sps:$4 sm:$0xff]  }
 0x17b   :  { %5178 = vmatpush1.bf16.msra.mxu0 %v7944_v12  ;;  %5711 = vmatpush1.bf16.msra.mxu1 %v7947_v13  ;;  %v8039_v12 = vld [vmem:[%s11268_s1 + $0xda8] ss:$16 sps:$4 sm:$0xff]   ;;  %v8044_v13 = vld [vmem:[%s11268_s1 + $0xdc4] ss:$16 sps:$4 sm:$0xff]  }
 0x17c   :  { %5179 = vmatprep.subr.bf16.mxu0 %v7952_v15  ;;  %5712 = vmatprep.subr.bf16.mxu1 %v7955_v11  ;;  %v8047_v15 = vld [vmem:[%s11268_s1 + $0xdcc] ss:$16 sps:$4 sm:$0xff]   ;;  %v8042_v11 = vld [vmem:[%s11268_s1 + $0xdc0] ss:$16 sps:$4 sm:$0xff]  }
 0x17f   :  { %5180 = vmatpush1.bf16.msra.mxu0 %v7950_v17  ;;  %5713 = vmatpush1.bf16.msra.mxu1 %v7953_v14  ;;  %v8045_v17 = vld [vmem:[%s11268_s1 + $0xdc8] ss:$16 sps:$4 sm:$0xff]   ;;  %v8050_v14 = vld [vmem:[%s11268_s1 + $0xde4] ss:$16 sps:$4 sm:$0xff]  }
 0x180   :  { %5190 = vmatprep.subr.bf16.mxu0 %v7960_v19  ;;  %5723 = vmatprep.subr.bf16.mxu1 %v7963_v20  ;;  %v8053_v19 = vld [vmem:[%s11268_s1 + $0xdec] ss:$16 sps:$4 sm:$0xff]   ;;  %v8048_v20 = vld [vmem:[%s11268_s1 + $0xde0] ss:$16 sps:$4 sm:$0xff]  }
 0x182   :  { %5182 = vmatmul.mubr.bf16.vlgmr.msra.gmra.mrb[0].mxu0 %v6377_v16  ;;  %5715 = vmatmul.mubr.bf16.vlgmr.msra.gmra.mrb[0].mxu1 %v6377_v16  ;;  %v8051_v16 = vld [vmem:[%s11268_s1 + $0xde8] ss:$16 sps:$4 sm:$0xff]  }
 0x183   :  { %5191 = vmatpush1.bf16.msra.mxu0 %v7958_v22  ;;  %5724 = vmatpush1.bf16.msra.mxu1 %v7961_v23  ;;  %v8058_v22 = vld [vmem:[%s11268_s1 + $0xe04] ss:$16 sps:$4 sm:$0xff]   ;;  %v8061_v23 = vld [vmem:[%s11268_s1 + $0xe0c] ss:$16 sps:$4 sm:$0xff]  }
 0x184   :  { %5192 = vmatprep.subr.bf16.mxu0 %v7966_v24  ;;  %5725 = vmatprep.subr.bf16.mxu1 %v7969_v18  ;;  %v10066_v24 = vld [vmem:[%s11269_s0 + $0x38] sm:$0xff]  ;;  %v6379_v18 = vcombine.low %v9865_v21, %v9865_v21 }
 0x185   :  { %5222 = vmatprep.mubr.bf16.mxu0 %v6380_v25  ;;  %5755 = vmatprep.mubr.bf16.mxu1 %v6380_v25  ;;  %v8056_v25 = vld [vmem:[%s11268_s1 + $0xe00] ss:$16 sps:$4 sm:$0xff]   ;;  %v8067_v21 = vld [vmem:[%s11268_s1 + $0xe2c] ss:$16 sps:$4 sm:$0xff]  }
 0x187   :  { %5193 = vmatpush1.bf16.msra.mxu0 %v7964_v26  ;;  %5726 = vmatpush1.bf16.msra.mxu1 %v7967_v27  ;;  %v8059_v26 = vld [vmem:[%s11268_s1 + $0xe08] ss:$16 sps:$4 sm:$0xff]   ;;  %v8064_v27 = vld [vmem:[%s11268_s1 + $0xe24] ss:$16 sps:$4 sm:$0xff]  }
 0x188   :  { %5194 = vmatprep.subr.bf16.mxu0 %v7972_v28  ;;  %5727 = vmatprep.subr.bf16.mxu1 %v7975_v29  ;;  %v6382_v28 = vcombine.high %v10066_v24, %v10066_v24  ;;  %v8062_v29 = vld [vmem:[%s11268_s1 + $0xe20] ss:$16 sps:$4 sm:$0xff]  }
 0x18b   :  { %5195 = vmatpush1.bf16.msra.mxu0 %v7970_v30  ;;  %5728 = vmatpush1.bf16.msra.mxu1 %v7973_v31  ;;  %v8065_v30 = vld [vmem:[%s11268_s1 + $0xe28] ss:$16 sps:$4 sm:$0xff]   ;;  %v8070_v31 = vld [vmem:[%s11268_s1 + $0xe44] ss:$16 sps:$4 sm:$0xff]  }
 0x18c   :  { %5196 = vmatprep.subr.bf16.mxu0 %v7978_v32  ;;  %5729 = vmatprep.subr.bf16.mxu1 %v7981_v33  ;;  %v8073_v32 = vld [vmem:[%s11268_s1 + $0xe4c] ss:$16 sps:$4 sm:$0xff]   ;;  %v8068_v33 = vld [vmem:[%s11268_s1 + $0xe40] ss:$16 sps:$4 sm:$0xff]  }
 0x18f   :  { %5197 = vmatpush1.bf16.msra.mxu0 %v7976_v34  ;;  %5730 = vmatpush1.bf16.msra.mxu1 %v7979_v35  ;;  %v8071_v34 = vld [vmem:[%s11268_s1 + $0xe48] ss:$16 sps:$4 sm:$0xff]   ;;  %v8076_v35 = vld [vmem:[%s11268_s1 + $0xe64] ss:$16 sps:$4 sm:$0xff]  }
 0x190   :  { %5198 = vmatprep.subr.bf16.mxu0 %v7984_v36  ;;  %5731 = vmatprep.subr.bf16.mxu1 %v7987_v37  ;;  %v8079_v36 = vld [vmem:[%s11268_s1 + $0xe6c] ss:$16 sps:$4 sm:$0xff]   ;;  %v8074_v37 = vld [vmem:[%s11268_s1 + $0xe60] ss:$16 sps:$4 sm:$0xff]  }
 0x193   :  { %5199 = vmatpush1.bf16.msra.mxu0 %v7982_v38  ;;  %5732 = vmatpush1.bf16.msra.mxu1 %v7985_v39  ;;  %v8077_v38 = vld [vmem:[%s11268_s1 + $0xe68] ss:$16 sps:$4 sm:$0xff]   ;;  %v8082_v39 = vld [vmem:[%s11268_s1 + $0xe84] ss:$16 sps:$4 sm:$0xff]  }
 0x194   :  { %5200 = vmatprep.subr.bf16.mxu0 %v7990_v40  ;;  %5733 = vmatprep.subr.bf16.mxu1 %v7993_v41  ;;  %v8085_v40 = vld [vmem:[%s11268_s1 + $0xe8c] ss:$16 sps:$4 sm:$0xff]   ;;  %v8080_v41 = vld [vmem:[%s11268_s1 + $0xe80] ss:$16 sps:$4 sm:$0xff]  }
 0x197   :  { %5201 = vmatpush1.bf16.msra.mxu0 %v7988_v42  ;;  %5734 = vmatpush1.bf16.msra.mxu1 %v7991_v43  ;;  %v8083_v42 = vld [vmem:[%s11268_s1 + $0xe88] ss:$16 sps:$4 sm:$0xff]   ;;  %v8088_v43 = vld [vmem:[%s11268_s1 + $0xea4] ss:$16 sps:$4 sm:$0xff]  }
 0x198   :  { %5202 = vmatprep.subr.bf16.mxu0 %v7996_v44  ;;  %5735 = vmatprep.subr.bf16.mxu1 %v7999_v45  ;;  %v8091_v44 = vld [vmem:[%s11268_s1 + $0xeac] ss:$16 sps:$4 sm:$0xff]   ;;  %v8086_v45 = vld [vmem:[%s11268_s1 + $0xea0] ss:$16 sps:$4 sm:$0xff]  }
 0x19b   :  { %5203 = vmatpush1.bf16.msra.mxu0 %v7994_v46  ;;  %5736 = vmatpush1.bf16.msra.mxu1 %v7997_v47  ;;  %v8089_v46 = vld [vmem:[%s11268_s1 + $0xea8] ss:$16 sps:$4 sm:$0xff]   ;;  %v8094_v47 = vld [vmem:[%s11268_s1 + $0xec4] ss:$16 sps:$4 sm:$0xff]  }
 0x19c   :  { %5204 = vmatprep.subr.bf16.mxu0 %v8002_v48  ;;  %5737 = vmatprep.subr.bf16.mxu1 %v8005_v49  ;;  %v8097_v48 = vld [vmem:[%s11268_s1 + $0xecc] ss:$16 sps:$4 sm:$0xff]   ;;  %v8092_v49 = vld [vmem:[%s11268_s1 + $0xec0] ss:$16 sps:$4 sm:$0xff]  }
 0x19f   :  { %5205 = vmatpush1.bf16.msra.mxu0 %v8000_v50  ;;  %5738 = vmatpush1.bf16.msra.mxu1 %v8003_v51  ;;  %v8095_v50 = vld [vmem:[%s11268_s1 + $0xec8] ss:$16 sps:$4 sm:$0xff]   ;;  %v8100_v51 = vld [vmem:[%s11268_s1 + $0xee4] ss:$16 sps:$4 sm:$0xff]  }
 0x1a0   :  { %5206 = vmatprep.subr.bf16.mxu0 %v8008_v52  ;;  %5739 = vmatprep.subr.bf16.mxu1 %v8011_v53  ;;  %v8103_v52 = vld [vmem:[%s11268_s1 + $0xeec] ss:$16 sps:$4 sm:$0xff]   ;;  %v8098_v53 = vld [vmem:[%s11268_s1 + $0xee0] ss:$16 sps:$4 sm:$0xff]  }
 0x1a3   :  { %5207 = vmatpush1.bf16.msra.mxu0 %v8006_v54  ;;  %5740 = vmatpush1.bf16.msra.mxu1 %v8009_v55  ;;  %v8101_v54 = vld [vmem:[%s11268_s1 + $0xee8] ss:$16 sps:$4 sm:$0xff]   ;;  %v8106_v55 = vld [vmem:[%s11268_s1 + $0xf04] ss:$16 sps:$4 sm:$0xff]  }
 0x1a4   :  { %5208 = vmatprep.subr.bf16.mxu0 %v8014_v56  ;;  %5741 = vmatprep.subr.bf16.mxu1 %v8017_v57  ;;  %v8109_v56 = vld [vmem:[%s11268_s1 + $0xf0c] ss:$16 sps:$4 sm:$0xff]   ;;  %v8104_v57 = vld [vmem:[%s11268_s1 + $0xf00] ss:$16 sps:$4 sm:$0xff]  }
 0x1a7   :  { %5209 = vmatpush1.bf16.msra.mxu0 %v8012_v58  ;;  %5742 = vmatpush1.bf16.msra.mxu1 %v8015_v59  ;;  %v8107_v58 = vld [vmem:[%s11268_s1 + $0xf08] ss:$16 sps:$4 sm:$0xff]   ;;  %v8112_v59 = vld [vmem:[%s11268_s1 + $0xf24] ss:$16 sps:$4 sm:$0xff]  }
 0x1a8   :  { %5210 = vmatprep.subr.bf16.mxu0 %v8020_v60  ;;  %5743 = vmatprep.subr.bf16.mxu1 %v8023_v61  ;;  %v8115_v60 = vld [vmem:[%s11268_s1 + $0xf2c] ss:$16 sps:$4 sm:$0xff]   ;;  %v8110_v61 = vld [vmem:[%s11268_s1 + $0xf20] ss:$16 sps:$4 sm:$0xff]  }
 0x1ab   :  { %5211 = vmatpush1.bf16.msra.mxu0 %v8018_v62  ;;  %5744 = vmatpush1.bf16.msra.mxu1 %v8021_v63  ;;  %v8113_v62 = vld [vmem:[%s11268_s1 + $0xf28] ss:$16 sps:$4 sm:$0xff]   ;;  %v8118_v63 = vld [vmem:[%s11268_s1 + $0xf44] ss:$16 sps:$4 sm:$0xff]  }
 0x1ac   :  { %5212 = vmatprep.subr.bf16.mxu0 %v8026_v0  ;;  %5745 = vmatprep.subr.bf16.mxu1 %v8029_v1  ;;  %v8121_v0 = vld [vmem:[%s11268_s1 + $0xf4c] ss:$16 sps:$4 sm:$0xff]   ;;  %v8116_v1 = vld [vmem:[%s11268_s1 + $0xf40] ss:$16 sps:$4 sm:$0xff]  }
 0x1af   :  { %5213 = vmatpush1.bf16.msra.mxu0 %v8024_v2  ;;  %5746 = vmatpush1.bf16.msra.mxu1 %v8027_v3  ;;  %v8119_v2 = vld [vmem:[%s11268_s1 + $0xf48] ss:$16 sps:$4 sm:$0xff]   ;;  %v8124_v3 = vld [vmem:[%s11268_s1 + $0xf64] ss:$16 sps:$4 sm:$0xff]  }
 0x1b0   :  { %5214 = vmatprep.subr.bf16.mxu0 %v8032_v4  ;;  %5747 = vmatprep.subr.bf16.mxu1 %v8035_v5  ;;  %v8127_v4 = vld [vmem:[%s11268_s1 + $0xf6c] ss:$16 sps:$4 sm:$0xff]   ;;  %v8122_v5 = vld [vmem:[%s11268_s1 + $0xf60] ss:$16 sps:$4 sm:$0xff]  }
 0x1b3   :  { %5215 = vmatpush1.bf16.msra.mxu0 %v8030_v6  ;;  %5748 = vmatpush1.bf16.msra.mxu1 %v8033_v7  ;;  %v8125_v6 = vld [vmem:[%s11268_s1 + $0xf68] ss:$16 sps:$4 sm:$0xff]   ;;  %v8130_v7 = vld [vmem:[%s11268_s1 + $0xf84] ss:$16 sps:$4 sm:$0xff]  }
 0x1b4   :  { %5216 = vmatprep.subr.bf16.mxu0 %v8038_v8  ;;  %5749 = vmatprep.subr.bf16.mxu1 %v8041_v9  ;;  %v8133_v8 = vld [vmem:[%s11268_s1 + $0xf8c] ss:$16 sps:$4 sm:$0xff]   ;;  %v8128_v9 = vld [vmem:[%s11268_s1 + $0xf80] ss:$16 sps:$4 sm:$0xff]  }
 0x1b7   :  { %5217 = vmatpush1.bf16.msra.mxu0 %v8036_v10  ;;  %5750 = vmatpush1.bf16.msra.mxu1 %v8039_v12  ;;  %v8131_v10 = vld [vmem:[%s11268_s1 + $0xf88] ss:$16 sps:$4 sm:$0xff]   ;;  %v8136_v12 = vld [vmem:[%s11268_s1 + $0xfa4] ss:$16 sps:$4 sm:$0xff]  }
 0x1b8   :  { %5218 = vmatprep.subr.bf16.mxu0 %v8044_v13  ;;  %5751 = vmatprep.subr.bf16.mxu1 %v8047_v15  ;;  %v8139_v13 = vld [vmem:[%s11268_s1 + $0xfac] ss:$16 sps:$4 sm:$0xff]   ;;  %v8134_v15 = vld [vmem:[%s11268_s1 + $0xfa0] ss:$16 sps:$4 sm:$0xff]  }
 0x1bb   :  { %5219 = vmatpush1.bf16.msra.mxu0 %v8042_v11  ;;  %5752 = vmatpush1.bf16.msra.mxu1 %v8045_v17  ;;  %v8137_v11 = vld [vmem:[%s11268_s1 + $0xfa8] ss:$16 sps:$4 sm:$0xff]   ;;  %v8142_v17 = vld [vmem:[%s11268_s1 + $0xfc4] ss:$16 sps:$4 sm:$0xff]  }
 0x1bc   :  { %5220 = vmatprep.subr.bf16.mxu0 %v8050_v14  ;;  %5753 = vmatprep.subr.bf16.mxu1 %v8053_v19  ;;  %v8145_v14 = vld [vmem:[%s11268_s1 + $0xfcc] ss:$16 sps:$4 sm:$0xff]   ;;  %v8140_v19 = vld [vmem:[%s11268_s1 + $0xfc0] ss:$16 sps:$4 sm:$0xff]  }
 0x1bf   :  { %5221 = vmatpush1.bf16.msra.mxu0 %v8048_v20  ;;  %5754 = vmatpush1.bf16.msra.mxu1 %v8051_v16  ;;  %v8143_v20 = vld [vmem:[%s11268_s1 + $0xfc8] ss:$16 sps:$4 sm:$0xff]   ;;  %v8148_v16 = vld [vmem:[%s11268_s1 + $0xfe4] ss:$16 sps:$4 sm:$0xff]  }
 0x1c0   :  { %5231 = vmatprep.subr.bf16.mxu0 %v8058_v22  ;;  %5764 = vmatprep.subr.bf16.mxu1 %v8061_v23  ;;  %v8151_v22 = vld [vmem:[%s11268_s1 + $0xfec] ss:$16 sps:$4 sm:$0xff]   ;;  %v8146_v23 = vld [vmem:[%s11268_s1 + $0xfe0] ss:$16 sps:$4 sm:$0xff]  }
 0x1c2   :  { %5223 = vmatmul.mubr.bf16.vlgmr.msra.gmra.mrb[0].mxu0 %v6379_v18  ;;  %5756 = vmatmul.mubr.bf16.vlgmr.msra.gmra.mrb[0].mxu1 %v6379_v18  ;;  %v8149_v18 = vld [vmem:[%s11268_s1 + $0xfe8] ss:$16 sps:$4 sm:$0xff]  }
 0x1c3   :  { %5232 = vmatpush1.bf16.msra.mxu0 %v8056_v25  ;;  %5765 = vmatpush1.bf16.msra.mxu1 %v8059_v26  ;;  %v8156_v25 = vld [vmem:[%s11268_s1 + $0x1004] ss:$16 sps:$4 sm:$0xff]   ;;  %v8159_v26 = vld [vmem:[%s11268_s1 + $0x100c] ss:$16 sps:$4 sm:$0xff]  }
 0x1c4   :  { %5233 = vmatprep.subr.bf16.mxu0 %v8064_v27  ;;  %5766 = vmatprep.subr.bf16.mxu1 %v8067_v21  ;;  %v6381_v27 = vcombine.low %v10066_v24, %v10066_v24  ;;  %v10269_v21 = vld [vmem:[%s11269_s0 + $0x40] sm:$0xff] }
 0x1c5   :  { %5263 = vmatprep.mubr.bf16.mxu0 %v6382_v28  ;;  %5796 = vmatprep.mubr.bf16.mxu1 %v6382_v28  ;;  %v8154_v28 = vld [vmem:[%s11268_s1 + $0x1000] ss:$16 sps:$4 sm:$0xff]   ;;  %v8162_v24 = vld [vmem:[%s11268_s1 + $0x1024] ss:$16 sps:$4 sm:$0xff]  }
 0x1c7   :  { %5234 = vmatpush1.bf16.msra.mxu0 %v8062_v29  ;;  %5767 = vmatpush1.bf16.msra.mxu1 %v8065_v30  ;;  %v8157_v29 = vld [vmem:[%s11268_s1 + $0x1008] ss:$16 sps:$4 sm:$0xff]   ;;  %v8165_v30 = vld [vmem:[%s11268_s1 + $0x102c] ss:$16 sps:$4 sm:$0xff]  }
 0x1c8   :  { %5235 = vmatprep.subr.bf16.mxu0 %v8070_v31  ;;  %5768 = vmatprep.subr.bf16.mxu1 %v8073_v32  ;;  %v6384_v31 = vcombine.high %v10269_v21, %v10269_v21  ;;  %v8160_v32 = vld [vmem:[%s11268_s1 + $0x1020] ss:$16 sps:$4 sm:$0xff]  }
 0x1cb   :  { %5236 = vmatpush1.bf16.msra.mxu0 %v8068_v33  ;;  %5769 = vmatpush1.bf16.msra.mxu1 %v8071_v34  ;;  %v8163_v33 = vld [vmem:[%s11268_s1 + $0x1028] ss:$16 sps:$4 sm:$0xff]   ;;  %v8168_v34 = vld [vmem:[%s11268_s1 + $0x1044] ss:$16 sps:$4 sm:$0xff]  }
 0x1cc   :  { %5237 = vmatprep.subr.bf16.mxu0 %v8076_v35  ;;  %5770 = vmatprep.subr.bf16.mxu1 %v8079_v36  ;;  %v8171_v35 = vld [vmem:[%s11268_s1 + $0x104c] ss:$16 sps:$4 sm:$0xff]   ;;  %v8166_v36 = vld [vmem:[%s11268_s1 + $0x1040] ss:$16 sps:$4 sm:$0xff]  }
 0x1cf   :  { %5238 = vmatpush1.bf16.msra.mxu0 %v8074_v37  ;;  %5771 = vmatpush1.bf16.msra.mxu1 %v8077_v38  ;;  %v8169_v37 = vld [vmem:[%s11268_s1 + $0x1048] ss:$16 sps:$4 sm:$0xff]   ;;  %v8174_v38 = vld [vmem:[%s11268_s1 + $0x1064] ss:$16 sps:$4 sm:$0xff]  }
 0x1d0   :  { %5239 = vmatprep.subr.bf16.mxu0 %v8082_v39  ;;  %5772 = vmatprep.subr.bf16.mxu1 %v8085_v40  ;;  %v8177_v39 = vld [vmem:[%s11268_s1 + $0x106c] ss:$16 sps:$4 sm:$0xff]   ;;  %v8172_v40 = vld [vmem:[%s11268_s1 + $0x1060] ss:$16 sps:$4 sm:$0xff]  }
 0x1d3   :  { %5240 = vmatpush1.bf16.msra.mxu0 %v8080_v41  ;;  %5773 = vmatpush1.bf16.msra.mxu1 %v8083_v42  ;;  %v8175_v41 = vld [vmem:[%s11268_s1 + $0x1068] ss:$16 sps:$4 sm:$0xff]   ;;  %v8180_v42 = vld [vmem:[%s11268_s1 + $0x1084] ss:$16 sps:$4 sm:$0xff]  }
 0x1d4   :  { %5241 = vmatprep.subr.bf16.mxu0 %v8088_v43  ;;  %5774 = vmatprep.subr.bf16.mxu1 %v8091_v44  ;;  %v8183_v43 = vld [vmem:[%s11268_s1 + $0x108c] ss:$16 sps:$4 sm:$0xff]   ;;  %v8178_v44 = vld [vmem:[%s11268_s1 + $0x1080] ss:$16 sps:$4 sm:$0xff]  }
 0x1d7   :  { %5242 = vmatpush1.bf16.msra.mxu0 %v8086_v45  ;;  %5775 = vmatpush1.bf16.msra.mxu1 %v8089_v46  ;;  %v8181_v45 = vld [vmem:[%s11268_s1 + $0x1088] ss:$16 sps:$4 sm:$0xff]   ;;  %v8186_v46 = vld [vmem:[%s11268_s1 + $0x10a4] ss:$16 sps:$4 sm:$0xff]  }
 0x1d8   :  { %5243 = vmatprep.subr.bf16.mxu0 %v8094_v47  ;;  %5776 = vmatprep.subr.bf16.mxu1 %v8097_v48  ;;  %v8189_v47 = vld [vmem:[%s11268_s1 + $0x10ac] ss:$16 sps:$4 sm:$0xff]   ;;  %v8184_v48 = vld [vmem:[%s11268_s1 + $0x10a0] ss:$16 sps:$4 sm:$0xff]  }
 0x1db   :  { %5244 = vmatpush1.bf16.msra.mxu0 %v8092_v49  ;;  %5777 = vmatpush1.bf16.msra.mxu1 %v8095_v50  ;;  %v8187_v49 = vld [vmem:[%s11268_s1 + $0x10a8] ss:$16 sps:$4 sm:$0xff]   ;;  %v8192_v50 = vld [vmem:[%s11268_s1 + $0x10c4] ss:$16 sps:$4 sm:$0xff]  }
 0x1dc   :  { %5245 = vmatprep.subr.bf16.mxu0 %v8100_v51  ;;  %5778 = vmatprep.subr.bf16.mxu1 %v8103_v52  ;;  %v8195_v51 = vld [vmem:[%s11268_s1 + $0x10cc] ss:$16 sps:$4 sm:$0xff]   ;;  %v8190_v52 = vld [vmem:[%s11268_s1 + $0x10c0] ss:$16 sps:$4 sm:$0xff]  }
 0x1df   :  { %5246 = vmatpush1.bf16.msra.mxu0 %v8098_v53  ;;  %5779 = vmatpush1.bf16.msra.mxu1 %v8101_v54  ;;  %v8193_v53 = vld [vmem:[%s11268_s1 + $0x10c8] ss:$16 sps:$4 sm:$0xff]   ;;  %v8198_v54 = vld [vmem:[%s11268_s1 + $0x10e4] ss:$16 sps:$4 sm:$0xff]  }
 0x1e0   :  { %5247 = vmatprep.subr.bf16.mxu0 %v8106_v55  ;;  %5780 = vmatprep.subr.bf16.mxu1 %v8109_v56  ;;  %v8201_v55 = vld [vmem:[%s11268_s1 + $0x10ec] ss:$16 sps:$4 sm:$0xff]   ;;  %v8196_v56 = vld [vmem:[%s11268_s1 + $0x10e0] ss:$16 sps:$4 sm:$0xff]  }
 0x1e3   :  { %5248 = vmatpush1.bf16.msra.mxu0 %v8104_v57  ;;  %5781 = vmatpush1.bf16.msra.mxu1 %v8107_v58  ;;  %v8199_v57 = vld [vmem:[%s11268_s1 + $0x10e8] ss:$16 sps:$4 sm:$0xff]   ;;  %v8204_v58 = vld [vmem:[%s11268_s1 + $0x1104] ss:$16 sps:$4 sm:$0xff]  }
 0x1e4   :  { %5249 = vmatprep.subr.bf16.mxu0 %v8112_v59  ;;  %5782 = vmatprep.subr.bf16.mxu1 %v8115_v60  ;;  %v8207_v59 = vld [vmem:[%s11268_s1 + $0x110c] ss:$16 sps:$4 sm:$0xff]   ;;  %v8202_v60 = vld [vmem:[%s11268_s1 + $0x1100] ss:$16 sps:$4 sm:$0xff]  }
 0x1e7   :  { %5250 = vmatpush1.bf16.msra.mxu0 %v8110_v61  ;;  %5783 = vmatpush1.bf16.msra.mxu1 %v8113_v62  ;;  %v8205_v61 = vld [vmem:[%s11268_s1 + $0x1108] ss:$16 sps:$4 sm:$0xff]   ;;  %v8210_v62 = vld [vmem:[%s11268_s1 + $0x1124] ss:$16 sps:$4 sm:$0xff]  }
 0x1e8   :  { %5251 = vmatprep.subr.bf16.mxu0 %v8118_v63  ;;  %5784 = vmatprep.subr.bf16.mxu1 %v8121_v0  ;;  %v8213_v63 = vld [vmem:[%s11268_s1 + $0x112c] ss:$16 sps:$4 sm:$0xff]   ;;  %v8208_v0 = vld [vmem:[%s11268_s1 + $0x1120] ss:$16 sps:$4 sm:$0xff]  }
 0x1eb   :  { %5252 = vmatpush1.bf16.msra.mxu0 %v8116_v1  ;;  %5785 = vmatpush1.bf16.msra.mxu1 %v8119_v2  ;;  %v8211_v1 = vld [vmem:[%s11268_s1 + $0x1128] ss:$16 sps:$4 sm:$0xff]   ;;  %v8216_v2 = vld [vmem:[%s11268_s1 + $0x1144] ss:$16 sps:$4 sm:$0xff]  }
 0x1ec   :  { %5253 = vmatprep.subr.bf16.mxu0 %v8124_v3  ;;  %5786 = vmatprep.subr.bf16.mxu1 %v8127_v4  ;;  %v8219_v3 = vld [vmem:[%s11268_s1 + $0x114c] ss:$16 sps:$4 sm:$0xff]   ;;  %v8214_v4 = vld [vmem:[%s11268_s1 + $0x1140] ss:$16 sps:$4 sm:$0xff]  }
 0x1ef   :  { %5254 = vmatpush1.bf16.msra.mxu0 %v8122_v5  ;;  %5787 = vmatpush1.bf16.msra.mxu1 %v8125_v6  ;;  %v8217_v5 = vld [vmem:[%s11268_s1 + $0x1148] ss:$16 sps:$4 sm:$0xff]   ;;  %v8222_v6 = vld [vmem:[%s11268_s1 + $0x1164] ss:$16 sps:$4 sm:$0xff]  }
 0x1f0   :  { %5255 = vmatprep.subr.bf16.mxu0 %v8130_v7  ;;  %5788 = vmatprep.subr.bf16.mxu1 %v8133_v8  ;;  %v8225_v7 = vld [vmem:[%s11268_s1 + $0x116c] ss:$16 sps:$4 sm:$0xff]   ;;  %v8220_v8 = vld [vmem:[%s11268_s1 + $0x1160] ss:$16 sps:$4 sm:$0xff]  }
 0x1f3   :  { %5256 = vmatpush1.bf16.msra.mxu0 %v8128_v9  ;;  %5789 = vmatpush1.bf16.msra.mxu1 %v8131_v10  ;;  %v8223_v9 = vld [vmem:[%s11268_s1 + $0x1168] ss:$16 sps:$4 sm:$0xff]   ;;  %v8228_v10 = vld [vmem:[%s11268_s1 + $0x1184] ss:$16 sps:$4 sm:$0xff]  }
 0x1f4   :  { %5257 = vmatprep.subr.bf16.mxu0 %v8136_v12  ;;  %5790 = vmatprep.subr.bf16.mxu1 %v8139_v13  ;;  %v8231_v12 = vld [vmem:[%s11268_s1 + $0x118c] ss:$16 sps:$4 sm:$0xff]   ;;  %v8226_v13 = vld [vmem:[%s11268_s1 + $0x1180] ss:$16 sps:$4 sm:$0xff]  }
 0x1f7   :  { %5258 = vmatpush1.bf16.msra.mxu0 %v8134_v15  ;;  %5791 = vmatpush1.bf16.msra.mxu1 %v8137_v11  ;;  %v8229_v15 = vld [vmem:[%s11268_s1 + $0x1188] ss:$16 sps:$4 sm:$0xff]   ;;  %v8234_v11 = vld [vmem:[%s11268_s1 + $0x11a4] ss:$16 sps:$4 sm:$0xff]  }
 0x1f8   :  { %5259 = vmatprep.subr.bf16.mxu0 %v8142_v17  ;;  %5792 = vmatprep.subr.bf16.mxu1 %v8145_v14  ;;  %v8237_v17 = vld [vmem:[%s11268_s1 + $0x11ac] ss:$16 sps:$4 sm:$0xff]   ;;  %v8232_v14 = vld [vmem:[%s11268_s1 + $0x11a0] ss:$16 sps:$4 sm:$0xff]  }
 0x1fb   :  { %5260 = vmatpush1.bf16.msra.mxu0 %v8140_v19  ;;  %5793 = vmatpush1.bf16.msra.mxu1 %v8143_v20  ;;  %v8235_v19 = vld [vmem:[%s11268_s1 + $0x11a8] ss:$16 sps:$4 sm:$0xff]   ;;  %v8240_v20 = vld [vmem:[%s11268_s1 + $0x11c4] ss:$16 sps:$4 sm:$0xff]  }
 0x1fc   :  { %5261 = vmatprep.subr.bf16.mxu0 %v8148_v16  ;;  %5794 = vmatprep.subr.bf16.mxu1 %v8151_v22  ;;  %v8243_v16 = vld [vmem:[%s11268_s1 + $0x11cc] ss:$16 sps:$4 sm:$0xff]   ;;  %v8238_v22 = vld [vmem:[%s11268_s1 + $0x11c0] ss:$16 sps:$4 sm:$0xff]  }
 0x1ff   :  { %5262 = vmatpush1.bf16.msra.mxu0 %v8146_v23  ;;  %5795 = vmatpush1.bf16.msra.mxu1 %v8149_v18  ;;  %v8241_v23 = vld [vmem:[%s11268_s1 + $0x11c8] ss:$16 sps:$4 sm:$0xff]   ;;  %v8246_v18 = vld [vmem:[%s11268_s1 + $0x11e4] ss:$16 sps:$4 sm:$0xff]  }
 0x200   :  { %5272 = vmatprep.subr.bf16.mxu0 %v8156_v25  ;;  %5805 = vmatprep.subr.bf16.mxu1 %v8159_v26  ;;  %v8249_v25 = vld [vmem:[%s11268_s1 + $0x11ec] ss:$16 sps:$4 sm:$0xff]   ;;  %v8244_v26 = vld [vmem:[%s11268_s1 + $0x11e0] ss:$16 sps:$4 sm:$0xff]  }
 0x202   :  { %5264 = vmatmul.mubr.bf16.vlgmr.msra.gmra.mrb[0].mxu0 %v6381_v27  ;;  %5797 = vmatmul.mubr.bf16.vlgmr.msra.gmra.mrb[0].mxu1 %v6381_v27  ;;  %v8247_v27 = vld [vmem:[%s11268_s1 + $0x11e8] ss:$16 sps:$4 sm:$0xff]  }
 0x203   :  { %5273 = vmatpush1.bf16.msra.mxu0 %v8154_v28  ;;  %5806 = vmatpush1.bf16.msra.mxu1 %v8157_v29  ;;  %v8254_v28 = vld [vmem:[%s11268_s1 + $0x1204] ss:$16 sps:$4 sm:$0xff]   ;;  %v8257_v29 = vld [vmem:[%s11268_s1 + $0x120c] ss:$16 sps:$4 sm:$0xff]  }
 0x204   :  { %5274 = vmatprep.subr.bf16.mxu0 %v8162_v24  ;;  %5807 = vmatprep.subr.bf16.mxu1 %v8165_v30  ;;  %v6383_v24 = vcombine.low %v10269_v21, %v10269_v21  ;;  %v10470_v30 = vld [vmem:[%s11269_s0 + $0x48] sm:$0xff]  ;;  %v8260_v21 = vld [vmem:[%s11268_s1 + $0x1224] ss:$16 sps:$4 sm:$0xff]  }
 0x205   :  { %5304 = vmatprep.mubr.bf16.mxu0 %v6384_v31  ;;  %5837 = vmatprep.mubr.bf16.mxu1 %v6384_v31  ;;  %v8252_v31 = vld [vmem:[%s11268_s1 + $0x1200] ss:$16 sps:$4 sm:$0xff]  }
 0x207   :  { %5275 = vmatpush1.bf16.msra.mxu0 %v8160_v32  ;;  %5808 = vmatpush1.bf16.msra.mxu1 %v8163_v33  ;;  %v8255_v32 = vld [vmem:[%s11268_s1 + $0x1208] ss:$16 sps:$4 sm:$0xff]   ;;  %v8263_v33 = vld [vmem:[%s11268_s1 + $0x122c] ss:$16 sps:$4 sm:$0xff]  }
 0x208   :  { %5276 = vmatprep.subr.bf16.mxu0 %v8168_v34  ;;  %5809 = vmatprep.subr.bf16.mxu1 %v8171_v35  ;;  %v6386_v34 = vcombine.high %v10470_v30, %v10470_v30  ;;  %v8258_v35 = vld [vmem:[%s11268_s1 + $0x1220] ss:$16 sps:$4 sm:$0xff]  }
 0x20b   :  { %5277 = vmatpush1.bf16.msra.mxu0 %v8166_v36  ;;  %5810 = vmatpush1.bf16.msra.mxu1 %v8169_v37  ;;  %v8261_v36 = vld [vmem:[%s11268_s1 + $0x1228] ss:$16 sps:$4 sm:$0xff]   ;;  %v8266_v37 = vld [vmem:[%s11268_s1 + $0x1244] ss:$16 sps:$4 sm:$0xff]  }
 0x20c   :  { %5278 = vmatprep.subr.bf16.mxu0 %v8174_v38  ;;  %5811 = vmatprep.subr.bf16.mxu1 %v8177_v39  ;;  %v8269_v38 = vld [vmem:[%s11268_s1 + $0x124c] ss:$16 sps:$4 sm:$0xff]   ;;  %v8264_v39 = vld [vmem:[%s11268_s1 + $0x1240] ss:$16 sps:$4 sm:$0xff]  }
 0x20f   :  { %5279 = vmatpush1.bf16.msra.mxu0 %v8172_v40  ;;  %5812 = vmatpush1.bf16.msra.mxu1 %v8175_v41  ;;  %v8267_v40 = vld [vmem:[%s11268_s1 + $0x1248] ss:$16 sps:$4 sm:$0xff]   ;;  %v8272_v41 = vld [vmem:[%s11268_s1 + $0x1264] ss:$16 sps:$4 sm:$0xff]  }
 0x210   :  { %5280 = vmatprep.subr.bf16.mxu0 %v8180_v42  ;;  %5813 = vmatprep.subr.bf16.mxu1 %v8183_v43  ;;  %v8275_v42 = vld [vmem:[%s11268_s1 + $0x126c] ss:$16 sps:$4 sm:$0xff]   ;;  %v8270_v43 = vld [vmem:[%s11268_s1 + $0x1260] ss:$16 sps:$4 sm:$0xff]  }
 0x213   :  { %5281 = vmatpush1.bf16.msra.mxu0 %v8178_v44  ;;  %5814 = vmatpush1.bf16.msra.mxu1 %v8181_v45  ;;  %v8273_v44 = vld [vmem:[%s11268_s1 + $0x1268] ss:$16 sps:$4 sm:$0xff]   ;;  %v8278_v45 = vld [vmem:[%s11268_s1 + $0x1284] ss:$16 sps:$4 sm:$0xff]  }
 0x214   :  { %5282 = vmatprep.subr.bf16.mxu0 %v8186_v46  ;;  %5815 = vmatprep.subr.bf16.mxu1 %v8189_v47  ;;  %v8281_v46 = vld [vmem:[%s11268_s1 + $0x128c] ss:$16 sps:$4 sm:$0xff]   ;;  %v8276_v47 = vld [vmem:[%s11268_s1 + $0x1280] ss:$16 sps:$4 sm:$0xff]  }
 0x217   :  { %5283 = vmatpush1.bf16.msra.mxu0 %v8184_v48  ;;  %5816 = vmatpush1.bf16.msra.mxu1 %v8187_v49  ;;  %v8279_v48 = vld [vmem:[%s11268_s1 + $0x1288] ss:$16 sps:$4 sm:$0xff]   ;;  %v8284_v49 = vld [vmem:[%s11268_s1 + $0x12a4] ss:$16 sps:$4 sm:$0xff]  }
 0x218   :  { %5284 = vmatprep.subr.bf16.mxu0 %v8192_v50  ;;  %5817 = vmatprep.subr.bf16.mxu1 %v8195_v51  ;;  %v8287_v50 = vld [vmem:[%s11268_s1 + $0x12ac] ss:$16 sps:$4 sm:$0xff]   ;;  %v8282_v51 = vld [vmem:[%s11268_s1 + $0x12a0] ss:$16 sps:$4 sm:$0xff]  }
 0x21b   :  { %5285 = vmatpush1.bf16.msra.mxu0 %v8190_v52  ;;  %5818 = vmatpush1.bf16.msra.mxu1 %v8193_v53  ;;  %v8285_v52 = vld [vmem:[%s11268_s1 + $0x12a8] ss:$16 sps:$4 sm:$0xff]   ;;  %v8290_v53 = vld [vmem:[%s11268_s1 + $0x12c4] ss:$16 sps:$4 sm:$0xff]  }
 0x21c   :  { %5286 = vmatprep.subr.bf16.mxu0 %v8198_v54  ;;  %5819 = vmatprep.subr.bf16.mxu1 %v8201_v55  ;;  %v8293_v54 = vld [vmem:[%s11268_s1 + $0x12cc] ss:$16 sps:$4 sm:$0xff]   ;;  %v8288_v55 = vld [vmem:[%s11268_s1 + $0x12c0] ss:$16 sps:$4 sm:$0xff]  }
 0x21f   :  { %5287 = vmatpush1.bf16.msra.mxu0 %v8196_v56  ;;  %5820 = vmatpush1.bf16.msra.mxu1 %v8199_v57  ;;  %v8291_v56 = vld [vmem:[%s11268_s1 + $0x12c8] ss:$16 sps:$4 sm:$0xff]   ;;  %v8296_v57 = vld [vmem:[%s11268_s1 + $0x12e4] ss:$16 sps:$4 sm:$0xff]  }
 0x220   :  { %5288 = vmatprep.subr.bf16.mxu0 %v8204_v58  ;;  %5821 = vmatprep.subr.bf16.mxu1 %v8207_v59  ;;  %v8299_v58 = vld [vmem:[%s11268_s1 + $0x12ec] ss:$16 sps:$4 sm:$0xff]   ;;  %v8294_v59 = vld [vmem:[%s11268_s1 + $0x12e0] ss:$16 sps:$4 sm:$0xff]  }
 0x223   :  { %5289 = vmatpush1.bf16.msra.mxu0 %v8202_v60  ;;  %5822 = vmatpush1.bf16.msra.mxu1 %v8205_v61  ;;  %v8297_v60 = vld [vmem:[%s11268_s1 + $0x12e8] ss:$16 sps:$4 sm:$0xff]   ;;  %v8302_v61 = vld [vmem:[%s11268_s1 + $0x1304] ss:$16 sps:$4 sm:$0xff]  }
 0x224   :  { %5290 = vmatprep.subr.bf16.mxu0 %v8210_v62  ;;  %5823 = vmatprep.subr.bf16.mxu1 %v8213_v63  ;;  %v8305_v62 = vld [vmem:[%s11268_s1 + $0x130c] ss:$16 sps:$4 sm:$0xff]   ;;  %v8300_v63 = vld [vmem:[%s11268_s1 + $0x1300] ss:$16 sps:$4 sm:$0xff]  }
 0x227   :  { %5291 = vmatpush1.bf16.msra.mxu0 %v8208_v0  ;;  %5824 = vmatpush1.bf16.msra.mxu1 %v8211_v1  ;;  %v8303_v0 = vld [vmem:[%s11268_s1 + $0x1308] ss:$16 sps:$4 sm:$0xff]   ;;  %v8308_v1 = vld [vmem:[%s11268_s1 + $0x1324] ss:$16 sps:$4 sm:$0xff]  }
 0x228   :  { %5292 = vmatprep.subr.bf16.mxu0 %v8216_v2  ;;  %5825 = vmatprep.subr.bf16.mxu1 %v8219_v3  ;;  %v8311_v2 = vld [vmem:[%s11268_s1 + $0x132c] ss:$16 sps:$4 sm:$0xff]   ;;  %v8306_v3 = vld [vmem:[%s11268_s1 + $0x1320] ss:$16 sps:$4 sm:$0xff]  }
 0x22b   :  { %5293 = vmatpush1.bf16.msra.mxu0 %v8214_v4  ;;  %5826 = vmatpush1.bf16.msra.mxu1 %v8217_v5  ;;  %v8309_v4 = vld [vmem:[%s11268_s1 + $0x1328] ss:$16 sps:$4 sm:$0xff]   ;;  %v8314_v5 = vld [vmem:[%s11268_s1 + $0x1344] ss:$16 sps:$4 sm:$0xff]  }
 0x22c   :  { %5294 = vmatprep.subr.bf16.mxu0 %v8222_v6  ;;  %5827 = vmatprep.subr.bf16.mxu1 %v8225_v7  ;;  %v8317_v6 = vld [vmem:[%s11268_s1 + $0x134c] ss:$16 sps:$4 sm:$0xff]   ;;  %v8312_v7 = vld [vmem:[%s11268_s1 + $0x1340] ss:$16 sps:$4 sm:$0xff]  }
 0x22f   :  { %5295 = vmatpush1.bf16.msra.mxu0 %v8220_v8  ;;  %5828 = vmatpush1.bf16.msra.mxu1 %v8223_v9  ;;  %v8315_v8 = vld [vmem:[%s11268_s1 + $0x1348] ss:$16 sps:$4 sm:$0xff]   ;;  %v8320_v9 = vld [vmem:[%s11268_s1 + $0x1364] ss:$16 sps:$4 sm:$0xff]  }
 0x230   :  { %5296 = vmatprep.subr.bf16.mxu0 %v8228_v10  ;;  %5829 = vmatprep.subr.bf16.mxu1 %v8231_v12  ;;  %v8323_v10 = vld [vmem:[%s11268_s1 + $0x136c] ss:$16 sps:$4 sm:$0xff]   ;;  %v8318_v12 = vld [vmem:[%s11268_s1 + $0x1360] ss:$16 sps:$4 sm:$0xff]  }
 0x233   :  { %5297 = vmatpush1.bf16.msra.mxu0 %v8226_v13  ;;  %5830 = vmatpush1.bf16.msra.mxu1 %v8229_v15  ;;  %v8321_v13 = vld [vmem:[%s11268_s1 + $0x1368] ss:$16 sps:$4 sm:$0xff]   ;;  %v8326_v15 = vld [vmem:[%s11268_s1 + $0x1384] ss:$16 sps:$4 sm:$0xff]  }
 0x234   :  { %5298 = vmatprep.subr.bf16.mxu0 %v8234_v11  ;;  %5831 = vmatprep.subr.bf16.mxu1 %v8237_v17  ;;  %v8329_v11 = vld [vmem:[%s11268_s1 + $0x138c] ss:$16 sps:$4 sm:$0xff]   ;;  %v8324_v17 = vld [vmem:[%s11268_s1 + $0x1380] ss:$16 sps:$4 sm:$0xff]  }
 0x237   :  { %5299 = vmatpush1.bf16.msra.mxu0 %v8232_v14  ;;  %5832 = vmatpush1.bf16.msra.mxu1 %v8235_v19  ;;  %v8327_v14 = vld [vmem:[%s11268_s1 + $0x1388] ss:$16 sps:$4 sm:$0xff]   ;;  %v8332_v19 = vld [vmem:[%s11268_s1 + $0x13a4] ss:$16 sps:$4 sm:$0xff]  }
 0x238   :  { %5300 = vmatprep.subr.bf16.mxu0 %v8240_v20  ;;  %5833 = vmatprep.subr.bf16.mxu1 %v8243_v16  ;;  %v8335_v20 = vld [vmem:[%s11268_s1 + $0x13ac] ss:$16 sps:$4 sm:$0xff]   ;;  %v8330_v16 = vld [vmem:[%s11268_s1 + $0x13a0] ss:$16 sps:$4 sm:$0xff]  }
 0x23b   :  { %5301 = vmatpush1.bf16.msra.mxu0 %v8238_v22  ;;  %5834 = vmatpush1.bf16.msra.mxu1 %v8241_v23  ;;  %v8333_v22 = vld [vmem:[%s11268_s1 + $0x13a8] ss:$16 sps:$4 sm:$0xff]   ;;  %v8338_v23 = vld [vmem:[%s11268_s1 + $0x13c4] ss:$16 sps:$4 sm:$0xff]  }
 0x23c   :  { %5302 = vmatprep.subr.bf16.mxu0 %v8246_v18  ;;  %5835 = vmatprep.subr.bf16.mxu1 %v8249_v25  ;;  %v8341_v18 = vld [vmem:[%s11268_s1 + $0x13cc] ss:$16 sps:$4 sm:$0xff]   ;;  %v8336_v25 = vld [vmem:[%s11268_s1 + $0x13c0] ss:$16 sps:$4 sm:$0xff]  }
 0x23f   :  { %5303 = vmatpush1.bf16.msra.mxu0 %v8244_v26  ;;  %5836 = vmatpush1.bf16.msra.mxu1 %v8247_v27  ;;  %v8339_v26 = vld [vmem:[%s11268_s1 + $0x13c8] ss:$16 sps:$4 sm:$0xff]   ;;  %v8344_v27 = vld [vmem:[%s11268_s1 + $0x13e4] ss:$16 sps:$4 sm:$0xff]  }
 0x240   :  { %5313 = vmatprep.subr.bf16.mxu0 %v8254_v28  ;;  %5846 = vmatprep.subr.bf16.mxu1 %v8257_v29  ;;  %v8347_v28 = vld [vmem:[%s11268_s1 + $0x13ec] ss:$16 sps:$4 sm:$0xff]   ;;  %v8342_v29 = vld [vmem:[%s11268_s1 + $0x13e0] ss:$16 sps:$4 sm:$0xff]  }
 0x242   :  { %5305 = vmatmul.mubr.bf16.vlgmr.msra.gmra.mrb[0].mxu0 %v6383_v24  ;;  %5838 = vmatmul.mubr.bf16.vlgmr.msra.gmra.mrb[0].mxu1 %v6383_v24  ;;  %v8345_v24 = vld [vmem:[%s11268_s1 + $0x13e8] ss:$16 sps:$4 sm:$0xff]  }
 0x243   :  { %5314 = vmatpush1.bf16.msra.mxu0 %v8252_v31  ;;  %5847 = vmatpush1.bf16.msra.mxu1 %v8255_v32  ;;  %v8352_v31 = vld [vmem:[%s11268_s1 + $0x1404] ss:$16 sps:$4 sm:$0xff]   ;;  %v8355_v32 = vld [vmem:[%s11268_s1 + $0x140c] ss:$16 sps:$4 sm:$0xff]  }
 0x244   :  { %5315 = vmatprep.subr.bf16.mxu0 %v8260_v21  ;;  %5848 = vmatprep.subr.bf16.mxu1 %v8263_v33  ;;  %v6385_v21 = vcombine.low %v10470_v30, %v10470_v30  ;;  %v10671_v33 = vld [vmem:[%s11269_s0 + $0x50] sm:$0xff] }
 0x245   :  { %5345 = vmatprep.mubr.bf16.mxu0 %v6386_v34  ;;  %5878 = vmatprep.mubr.bf16.mxu1 %v6386_v34  ;;  %v8350_v34 = vld [vmem:[%s11268_s1 + $0x1400] ss:$16 sps:$4 sm:$0xff]   ;;  %v8358_v30 = vld [vmem:[%s11268_s1 + $0x1424] ss:$16 sps:$4 sm:$0xff]  }
 0x247   :  { %5316 = vmatpush1.bf16.msra.mxu0 %v8258_v35  ;;  %5849 = vmatpush1.bf16.msra.mxu1 %v8261_v36  ;;  %v8353_v35 = vld [vmem:[%s11268_s1 + $0x1408] ss:$16 sps:$4 sm:$0xff]   ;;  %v8361_v36 = vld [vmem:[%s11268_s1 + $0x142c] ss:$16 sps:$4 sm:$0xff]  }
 0x248   :  { %5317 = vmatprep.subr.bf16.mxu0 %v8266_v37  ;;  %5850 = vmatprep.subr.bf16.mxu1 %v8269_v38  ;;  %v6388_v37 = vcombine.high %v10671_v33, %v10671_v33  ;;  %v8356_v38 = vld [vmem:[%s11268_s1 + $0x1420] ss:$16 sps:$4 sm:$0xff]  }
 0x24b   :  { %5318 = vmatpush1.bf16.msra.mxu0 %v8264_v39  ;;  %5851 = vmatpush1.bf16.msra.mxu1 %v8267_v40  ;;  %v8359_v39 = vld [vmem:[%s11268_s1 + $0x1428] ss:$16 sps:$4 sm:$0xff]   ;;  %v8364_v40 = vld [vmem:[%s11268_s1 + $0x1444] ss:$16 sps:$4 sm:$0xff]  }
 0x24c   :  { %5319 = vmatprep.subr.bf16.mxu0 %v8272_v41  ;;  %5852 = vmatprep.subr.bf16.mxu1 %v8275_v42  ;;  %v8367_v41 = vld [vmem:[%s11268_s1 + $0x144c] ss:$16 sps:$4 sm:$0xff]   ;;  %v8362_v42 = vld [vmem:[%s11268_s1 + $0x1440] ss:$16 sps:$4 sm:$0xff]  }
 0x24f   :  { %5320 = vmatpush1.bf16.msra.mxu0 %v8270_v43  ;;  %5853 = vmatpush1.bf16.msra.mxu1 %v8273_v44  ;;  %v8365_v43 = vld [vmem:[%s11268_s1 + $0x1448] ss:$16 sps:$4 sm:$0xff]   ;;  %v8370_v44 = vld [vmem:[%s11268_s1 + $0x1464] ss:$16 sps:$4 sm:$0xff]  }
 0x250   :  { %5321 = vmatprep.subr.bf16.mxu0 %v8278_v45  ;;  %5854 = vmatprep.subr.bf16.mxu1 %v8281_v46  ;;  %v8373_v45 = vld [vmem:[%s11268_s1 + $0x146c] ss:$16 sps:$4 sm:$0xff]   ;;  %v8368_v46 = vld [vmem:[%s11268_s1 + $0x1460] ss:$16 sps:$4 sm:$0xff]  }
 0x253   :  { %5322 = vmatpush1.bf16.msra.mxu0 %v8276_v47  ;;  %5855 = vmatpush1.bf16.msra.mxu1 %v8279_v48  ;;  %v8371_v47 = vld [vmem:[%s11268_s1 + $0x1468] ss:$16 sps:$4 sm:$0xff]   ;;  %v8376_v48 = vld [vmem:[%s11268_s1 + $0x1484] ss:$16 sps:$4 sm:$0xff]  }
 0x254   :  { %5323 = vmatprep.subr.bf16.mxu0 %v8284_v49  ;;  %5856 = vmatprep.subr.bf16.mxu1 %v8287_v50  ;;  %v8379_v49 = vld [vmem:[%s11268_s1 + $0x148c] ss:$16 sps:$4 sm:$0xff]   ;;  %v8374_v50 = vld [vmem:[%s11268_s1 + $0x1480] ss:$16 sps:$4 sm:$0xff]  }
 0x257   :  { %5324 = vmatpush1.bf16.msra.mxu0 %v8282_v51  ;;  %5857 = vmatpush1.bf16.msra.mxu1 %v8285_v52  ;;  %v8377_v51 = vld [vmem:[%s11268_s1 + $0x1488] ss:$16 sps:$4 sm:$0xff]   ;;  %v8382_v52 = vld [vmem:[%s11268_s1 + $0x14a4] ss:$16 sps:$4 sm:$0xff]  }
 0x258   :  { %5325 = vmatprep.subr.bf16.mxu0 %v8290_v53  ;;  %5858 = vmatprep.subr.bf16.mxu1 %v8293_v54  ;;  %v8385_v53 = vld [vmem:[%s11268_s1 + $0x14ac] ss:$16 sps:$4 sm:$0xff]   ;;  %v8380_v54 = vld [vmem:[%s11268_s1 + $0x14a0] ss:$16 sps:$4 sm:$0xff]  }
 0x25b   :  { %5326 = vmatpush1.bf16.msra.mxu0 %v8288_v55  ;;  %5859 = vmatpush1.bf16.msra.mxu1 %v8291_v56  ;;  %v8383_v55 = vld [vmem:[%s11268_s1 + $0x14a8] ss:$16 sps:$4 sm:$0xff]   ;;  %v8388_v56 = vld [vmem:[%s11268_s1 + $0x14c4] ss:$16 sps:$4 sm:$0xff]  }
 0x25c   :  { %5327 = vmatprep.subr.bf16.mxu0 %v8296_v57  ;;  %5860 = vmatprep.subr.bf16.mxu1 %v8299_v58  ;;  %v8391_v57 = vld [vmem:[%s11268_s1 + $0x14cc] ss:$16 sps:$4 sm:$0xff]   ;;  %v8386_v58 = vld [vmem:[%s11268_s1 + $0x14c0] ss:$16 sps:$4 sm:$0xff]  }
 0x25f   :  { %5328 = vmatpush1.bf16.msra.mxu0 %v8294_v59  ;;  %5861 = vmatpush1.bf16.msra.mxu1 %v8297_v60  ;;  %v8389_v59 = vld [vmem:[%s11268_s1 + $0x14c8] ss:$16 sps:$4 sm:$0xff]   ;;  %v8394_v60 = vld [vmem:[%s11268_s1 + $0x14e4] ss:$16 sps:$4 sm:$0xff]  }
 0x260   :  { %5329 = vmatprep.subr.bf16.mxu0 %v8302_v61  ;;  %5862 = vmatprep.subr.bf16.mxu1 %v8305_v62  ;;  %v8397_v61 = vld [vmem:[%s11268_s1 + $0x14ec] ss:$16 sps:$4 sm:$0xff]   ;;  %v8392_v62 = vld [vmem:[%s11268_s1 + $0x14e0] ss:$16 sps:$4 sm:$0xff]  }
 0x263   :  { %5330 = vmatpush1.bf16.msra.mxu0 %v8300_v63  ;;  %5863 = vmatpush1.bf16.msra.mxu1 %v8303_v0  ;;  %v8395_v63 = vld [vmem:[%s11268_s1 + $0x14e8] ss:$16 sps:$4 sm:$0xff]   ;;  %v8400_v0 = vld [vmem:[%s11268_s1 + $0x1504] ss:$16 sps:$4 sm:$0xff]  }
 0x264   :  { %5331 = vmatprep.subr.bf16.mxu0 %v8308_v1  ;;  %5864 = vmatprep.subr.bf16.mxu1 %v8311_v2  ;;  %v8403_v1 = vld [vmem:[%s11268_s1 + $0x150c] ss:$16 sps:$4 sm:$0xff]   ;;  %v8398_v2 = vld [vmem:[%s11268_s1 + $0x1500] ss:$16 sps:$4 sm:$0xff]  }
 0x267   :  { %5332 = vmatpush1.bf16.msra.mxu0 %v8306_v3  ;;  %5865 = vmatpush1.bf16.msra.mxu1 %v8309_v4  ;;  %v8401_v3 = vld [vmem:[%s11268_s1 + $0x1508] ss:$16 sps:$4 sm:$0xff]   ;;  %v8406_v4 = vld [vmem:[%s11268_s1 + $0x1524] ss:$16 sps:$4 sm:$0xff]  }
 0x268   :  { %5333 = vmatprep.subr.bf16.mxu0 %v8314_v5  ;;  %5866 = vmatprep.subr.bf16.mxu1 %v8317_v6  ;;  %v8409_v5 = vld [vmem:[%s11268_s1 + $0x152c] ss:$16 sps:$4 sm:$0xff]   ;;  %v8404_v6 = vld [vmem:[%s11268_s1 + $0x1520] ss:$16 sps:$4 sm:$0xff]  }
 0x26b   :  { %5334 = vmatpush1.bf16.msra.mxu0 %v8312_v7  ;;  %5867 = vmatpush1.bf16.msra.mxu1 %v8315_v8  ;;  %v8407_v7 = vld [vmem:[%s11268_s1 + $0x1528] ss:$16 sps:$4 sm:$0xff]   ;;  %v8412_v8 = vld [vmem:[%s11268_s1 + $0x1544] ss:$16 sps:$4 sm:$0xff]  }
 0x26c   :  { %5335 = vmatprep.subr.bf16.mxu0 %v8320_v9  ;;  %5868 = vmatprep.subr.bf16.mxu1 %v8323_v10  ;;  %v8415_v9 = vld [vmem:[%s11268_s1 + $0x154c] ss:$16 sps:$4 sm:$0xff]   ;;  %v8410_v10 = vld [vmem:[%s11268_s1 + $0x1540] ss:$16 sps:$4 sm:$0xff]  }
 0x26f   :  { %5336 = vmatpush1.bf16.msra.mxu0 %v8318_v12  ;;  %5869 = vmatpush1.bf16.msra.mxu1 %v8321_v13  ;;  %v8413_v12 = vld [vmem:[%s11268_s1 + $0x1548] ss:$16 sps:$4 sm:$0xff]   ;;  %v8418_v13 = vld [vmem:[%s11268_s1 + $0x1564] ss:$16 sps:$4 sm:$0xff]  }
 0x270   :  { %5337 = vmatprep.subr.bf16.mxu0 %v8326_v15  ;;  %5870 = vmatprep.subr.bf16.mxu1 %v8329_v11  ;;  %v8421_v15 = vld [vmem:[%s11268_s1 + $0x156c] ss:$16 sps:$4 sm:$0xff]   ;;  %v8416_v11 = vld [vmem:[%s11268_s1 + $0x1560] ss:$16 sps:$4 sm:$0xff]  }
 0x273   :  { %5338 = vmatpush1.bf16.msra.mxu0 %v8324_v17  ;;  %5871 = vmatpush1.bf16.msra.mxu1 %v8327_v14  ;;  %v8419_v17 = vld [vmem:[%s11268_s1 + $0x1568] ss:$16 sps:$4 sm:$0xff]   ;;  %v8424_v14 = vld [vmem:[%s11268_s1 + $0x1584] ss:$16 sps:$4 sm:$0xff]  }
 0x274   :  { %5339 = vmatprep.subr.bf16.mxu0 %v8332_v19  ;;  %5872 = vmatprep.subr.bf16.mxu1 %v8335_v20  ;;  %v8427_v19 = vld [vmem:[%s11268_s1 + $0x158c] ss:$16 sps:$4 sm:$0xff]   ;;  %v8422_v20 = vld [vmem:[%s11268_s1 + $0x1580] ss:$16 sps:$4 sm:$0xff]  }
 0x277   :  { %5340 = vmatpush1.bf16.msra.mxu0 %v8330_v16  ;;  %5873 = vmatpush1.bf16.msra.mxu1 %v8333_v22  ;;  %v8425_v16 = vld [vmem:[%s11268_s1 + $0x1588] ss:$16 sps:$4 sm:$0xff]   ;;  %v8430_v22 = vld [vmem:[%s11268_s1 + $0x15a4] ss:$16 sps:$4 sm:$0xff]  }
 0x278   :  { %5341 = vmatprep.subr.bf16.mxu0 %v8338_v23  ;;  %5874 = vmatprep.subr.bf16.mxu1 %v8341_v18  ;;  %v8433_v23 = vld [vmem:[%s11268_s1 + $0x15ac] ss:$16 sps:$4 sm:$0xff]   ;;  %v8428_v18 = vld [vmem:[%s11268_s1 + $0x15a0] ss:$16 sps:$4 sm:$0xff]  }
 0x27b   :  { %5342 = vmatpush1.bf16.msra.mxu0 %v8336_v25  ;;  %5875 = vmatpush1.bf16.msra.mxu1 %v8339_v26  ;;  %v8431_v25 = vld [vmem:[%s11268_s1 + $0x15a8] ss:$16 sps:$4 sm:$0xff]   ;;  %v8436_v26 = vld [vmem:[%s11268_s1 + $0x15c4] ss:$16 sps:$4 sm:$0xff]  }
 0x27c   :  { %5343 = vmatprep.subr.bf16.mxu0 %v8344_v27  ;;  %5876 = vmatprep.subr.bf16.mxu1 %v8347_v28  ;;  %v8439_v27 = vld [vmem:[%s11268_s1 + $0x15cc] ss:$16 sps:$4 sm:$0xff]   ;;  %v8434_v28 = vld [vmem:[%s11268_s1 + $0x15c0] ss:$16 sps:$4 sm:$0xff]  }
 0x27f   :  { %5344 = vmatpush1.bf16.msra.mxu0 %v8342_v29  ;;  %5877 = vmatpush1.bf16.msra.mxu1 %v8345_v24  ;;  %v8437_v29 = vld [vmem:[%s11268_s1 + $0x15c8] ss:$16 sps:$4 sm:$0xff]   ;;  %v8442_v24 = vld [vmem:[%s11268_s1 + $0x15e4] ss:$16 sps:$4 sm:$0xff]  }
 0x280   :  { %5354 = vmatprep.subr.bf16.mxu0 %v8352_v31  ;;  %5887 = vmatprep.subr.bf16.mxu1 %v8355_v32  ;;  %v8445_v31 = vld [vmem:[%s11268_s1 + $0x15ec] ss:$16 sps:$4 sm:$0xff]   ;;  %v8440_v32 = vld [vmem:[%s11268_s1 + $0x15e0] ss:$16 sps:$4 sm:$0xff]  }
 0x282   :  { %5346 = vmatmul.mubr.bf16.vlgmr.msra.gmra.mrb[0].mxu0 %v6385_v21  ;;  %5879 = vmatmul.mubr.bf16.vlgmr.msra.gmra.mrb[0].mxu1 %v6385_v21  ;;  %v8443_v21 = vld [vmem:[%s11268_s1 + $0x15e8] ss:$16 sps:$4 sm:$0xff]  }
 0x283   :  { %5355 = vmatpush1.bf16.msra.mxu0 %v8350_v34  ;;  %5888 = vmatpush1.bf16.msra.mxu1 %v8353_v35  ;;  %v8450_v34 = vld [vmem:[%s11268_s1 + $0x1604] ss:$16 sps:$4 sm:$0xff]   ;;  %v8453_v35 = vld [vmem:[%s11268_s1 + $0x160c] ss:$16 sps:$4 sm:$0xff]  }
 0x284   :  { %5356 = vmatprep.subr.bf16.mxu0 %v8358_v30  ;;  %5889 = vmatprep.subr.bf16.mxu1 %v8361_v36  ;;  %v10870_v30 = vld [vmem:[%s11269_s0 + $0x58] sm:$0xff]  ;;  %v8448_v36 = vld [vmem:[%s11268_s1 + $0x1600] ss:$16 sps:$4 sm:$0xff]  }
 0x285   :  { %5386 = vmatprep.mubr.bf16.mxu0 %v6388_v37  ;;  %5919 = vmatprep.mubr.bf16.mxu1 %v6388_v37  ;;  %v8451_v37 = vld [vmem:[%s11268_s1 + $0x1608] ss:$16 sps:$4 sm:$0xff]  }
 0x287   :  { %5357 = vmatpush1.bf16.msra.mxu0 %v8356_v38  ;;  %5890 = vmatpush1.bf16.msra.mxu1 %v8359_v39  ;;  %v6387_v38 = vcombine.low %v10671_v33, %v10671_v33  ;;  %v8456_v39 = vld [vmem:[%s11268_s1 + $0x1624] ss:$16 sps:$4 sm:$0xff]   ;;  %v8454_v33 = vld [vmem:[%s11268_s1 + $0x1620] ss:$16 sps:$4 sm:$0xff]  }
 0x288   :  { %5358 = vmatprep.subr.bf16.mxu0 %v8364_v40  ;;  %5891 = vmatprep.subr.bf16.mxu1 %v8367_v41  ;;  %v8459_v40 = vld [vmem:[%s11268_s1 + $0x162c] ss:$16 sps:$4 sm:$0xff]   ;;  %v6390_v41 = vcombine.high %v10870_v30, %v10870_v30 }
 0x28b   :  { %5359 = vmatpush1.bf16.msra.mxu0 %v8362_v42  ;;  %5892 = vmatpush1.bf16.msra.mxu1 %v8365_v43  ;;  %v8457_v42 = vld [vmem:[%s11268_s1 + $0x1628] ss:$16 sps:$4 sm:$0xff]   ;;  %v8462_v43 = vld [vmem:[%s11268_s1 + $0x1644] ss:$16 sps:$4 sm:$0xff]  }
 0x28c   :  { %5360 = vmatprep.subr.bf16.mxu0 %v8370_v44  ;;  %5893 = vmatprep.subr.bf16.mxu1 %v8373_v45  ;;  %v8465_v44 = vld [vmem:[%s11268_s1 + $0x164c] ss:$16 sps:$4 sm:$0xff]   ;;  %v8460_v45 = vld [vmem:[%s11268_s1 + $0x1640] ss:$16 sps:$4 sm:$0xff]  }
 0x28f   :  { %5361 = vmatpush1.bf16.msra.mxu0 %v8368_v46  ;;  %5894 = vmatpush1.bf16.msra.mxu1 %v8371_v47  ;;  %v8463_v46 = vld [vmem:[%s11268_s1 + $0x1648] ss:$16 sps:$4 sm:$0xff]   ;;  %v8468_v47 = vld [vmem:[%s11268_s1 + $0x1664] ss:$16 sps:$4 sm:$0xff]  }
 0x290   :  { %5362 = vmatprep.subr.bf16.mxu0 %v8376_v48  ;;  %5895 = vmatprep.subr.bf16.mxu1 %v8379_v49  ;;  %v8471_v48 = vld [vmem:[%s11268_s1 + $0x166c] ss:$16 sps:$4 sm:$0xff]   ;;  %v8466_v49 = vld [vmem:[%s11268_s1 + $0x1660] ss:$16 sps:$4 sm:$0xff]  }
 0x293   :  { %5363 = vmatpush1.bf16.msra.mxu0 %v8374_v50  ;;  %5896 = vmatpush1.bf16.msra.mxu1 %v8377_v51  ;;  %v8469_v50 = vld [vmem:[%s11268_s1 + $0x1668] ss:$16 sps:$4 sm:$0xff]   ;;  %v8474_v51 = vld [vmem:[%s11268_s1 + $0x1684] ss:$16 sps:$4 sm:$0xff]  }
 0x294   :  { %5364 = vmatprep.subr.bf16.mxu0 %v8382_v52  ;;  %5897 = vmatprep.subr.bf16.mxu1 %v8385_v53  ;;  %v8477_v52 = vld [vmem:[%s11268_s1 + $0x168c] ss:$16 sps:$4 sm:$0xff]   ;;  %v8472_v53 = vld [vmem:[%s11268_s1 + $0x1680] ss:$16 sps:$4 sm:$0xff]  }
 0x297   :  { %5365 = vmatpush1.bf16.msra.mxu0 %v8380_v54  ;;  %5898 = vmatpush1.bf16.msra.mxu1 %v8383_v55  ;;  %v8475_v54 = vld [vmem:[%s11268_s1 + $0x1688] ss:$16 sps:$4 sm:$0xff]   ;;  %v8480_v55 = vld [vmem:[%s11268_s1 + $0x16a4] ss:$16 sps:$4 sm:$0xff]  }
 0x298   :  { %5366 = vmatprep.subr.bf16.mxu0 %v8388_v56  ;;  %5899 = vmatprep.subr.bf16.mxu1 %v8391_v57  ;;  %v8483_v56 = vld [vmem:[%s11268_s1 + $0x16ac] ss:$16 sps:$4 sm:$0xff]   ;;  %v8478_v57 = vld [vmem:[%s11268_s1 + $0x16a0] ss:$16 sps:$4 sm:$0xff]  }
 0x29b   :  { %5367 = vmatpush1.bf16.msra.mxu0 %v8386_v58  ;;  %5900 = vmatpush1.bf16.msra.mxu1 %v8389_v59  ;;  %v8481_v58 = vld [vmem:[%s11268_s1 + $0x16a8] ss:$16 sps:$4 sm:$0xff]   ;;  %v8486_v59 = vld [vmem:[%s11268_s1 + $0x16c4] ss:$16 sps:$4 sm:$0xff]  }
 0x29c   :  { %5368 = vmatprep.subr.bf16.mxu0 %v8394_v60  ;;  %5901 = vmatprep.subr.bf16.mxu1 %v8397_v61  ;;  %v8489_v60 = vld [vmem:[%s11268_s1 + $0x16cc] ss:$16 sps:$4 sm:$0xff]   ;;  %v8484_v61 = vld [vmem:[%s11268_s1 + $0x16c0] ss:$16 sps:$4 sm:$0xff]  }
 0x29f   :  { %5369 = vmatpush1.bf16.msra.mxu0 %v8392_v62  ;;  %5902 = vmatpush1.bf16.msra.mxu1 %v8395_v63  ;;  %v8487_v62 = vld [vmem:[%s11268_s1 + $0x16c8] ss:$16 sps:$4 sm:$0xff]   ;;  %v8492_v63 = vld [vmem:[%s11268_s1 + $0x16e4] ss:$16 sps:$4 sm:$0xff]  }
 0x2a0   :  { %5370 = vmatprep.subr.bf16.mxu0 %v8400_v0  ;;  %5903 = vmatprep.subr.bf16.mxu1 %v8403_v1  ;;  %v8495_v0 = vld [vmem:[%s11268_s1 + $0x16ec] ss:$16 sps:$4 sm:$0xff]   ;;  %v8490_v1 = vld [vmem:[%s11268_s1 + $0x16e0] ss:$16 sps:$4 sm:$0xff]  }
 0x2a3   :  { %5371 = vmatpush1.bf16.msra.mxu0 %v8398_v2  ;;  %5904 = vmatpush1.bf16.msra.mxu1 %v8401_v3  ;;  %v8493_v2 = vld [vmem:[%s11268_s1 + $0x16e8] ss:$16 sps:$4 sm:$0xff]   ;;  %v8498_v3 = vld [vmem:[%s11268_s1 + $0x1704] ss:$16 sps:$4 sm:$0xff]  }
 0x2a4   :  { %5372 = vmatprep.subr.bf16.mxu0 %v8406_v4  ;;  %5905 = vmatprep.subr.bf16.mxu1 %v8409_v5  ;;  %v8501_v4 = vld [vmem:[%s11268_s1 + $0x170c] ss:$16 sps:$4 sm:$0xff]   ;;  %v8496_v5 = vld [vmem:[%s11268_s1 + $0x1700] ss:$16 sps:$4 sm:$0xff]  }
 0x2a7   :  { %5373 = vmatpush1.bf16.msra.mxu0 %v8404_v6  ;;  %5906 = vmatpush1.bf16.msra.mxu1 %v8407_v7  ;;  %v8499_v6 = vld [vmem:[%s11268_s1 + $0x1708] ss:$16 sps:$4 sm:$0xff]   ;;  %v8504_v7 = vld [vmem:[%s11268_s1 + $0x1724] ss:$16 sps:$4 sm:$0xff]  }
 0x2a8   :  { %5374 = vmatprep.subr.bf16.mxu0 %v8412_v8  ;;  %5907 = vmatprep.subr.bf16.mxu1 %v8415_v9  ;;  %v8507_v8 = vld [vmem:[%s11268_s1 + $0x172c] ss:$16 sps:$4 sm:$0xff]   ;;  %v8502_v9 = vld [vmem:[%s11268_s1 + $0x1720] ss:$16 sps:$4 sm:$0xff]  }
 0x2ab   :  { %5375 = vmatpush1.bf16.msra.mxu0 %v8410_v10  ;;  %5908 = vmatpush1.bf16.msra.mxu1 %v8413_v12  ;;  %v8505_v10 = vld [vmem:[%s11268_s1 + $0x1728] ss:$16 sps:$4 sm:$0xff]   ;;  %v8510_v12 = vld [vmem:[%s11268_s1 + $0x1744] ss:$16 sps:$4 sm:$0xff]  }
 0x2ac   :  { %5376 = vmatprep.subr.bf16.mxu0 %v8418_v13  ;;  %5909 = vmatprep.subr.bf16.mxu1 %v8421_v15  ;;  %v8513_v13 = vld [vmem:[%s11268_s1 + $0x174c] ss:$16 sps:$4 sm:$0xff]   ;;  %v8508_v15 = vld [vmem:[%s11268_s1 + $0x1740] ss:$16 sps:$4 sm:$0xff]  }
 0x2af   :  { %5377 = vmatpush1.bf16.msra.mxu0 %v8416_v11  ;;  %5910 = vmatpush1.bf16.msra.mxu1 %v8419_v17  ;;  %v8511_v11 = vld [vmem:[%s11268_s1 + $0x1748] ss:$16 sps:$4 sm:$0xff]   ;;  %v8516_v17 = vld [vmem:[%s11268_s1 + $0x1764] ss:$16 sps:$4 sm:$0xff]  }
 0x2b0   :  { %5378 = vmatprep.subr.bf16.mxu0 %v8424_v14  ;;  %5911 = vmatprep.subr.bf16.mxu1 %v8427_v19  ;;  %v8519_v14 = vld [vmem:[%s11268_s1 + $0x176c] ss:$16 sps:$4 sm:$0xff]   ;;  %v8514_v19 = vld [vmem:[%s11268_s1 + $0x1760] ss:$16 sps:$4 sm:$0xff]  }
 0x2b3   :  { %5379 = vmatpush1.bf16.msra.mxu0 %v8422_v20  ;;  %5912 = vmatpush1.bf16.msra.mxu1 %v8425_v16  ;;  %v8517_v20 = vld [vmem:[%s11268_s1 + $0x1768] ss:$16 sps:$4 sm:$0xff]   ;;  %v8522_v16 = vld [vmem:[%s11268_s1 + $0x1784] ss:$16 sps:$4 sm:$0xff]  }
 0x2b4   :  { %5380 = vmatprep.subr.bf16.mxu0 %v8430_v22  ;;  %5913 = vmatprep.subr.bf16.mxu1 %v8433_v23  ;;  %v8525_v22 = vld [vmem:[%s11268_s1 + $0x178c] ss:$16 sps:$4 sm:$0xff]   ;;  %v8520_v23 = vld [vmem:[%s11268_s1 + $0x1780] ss:$16 sps:$4 sm:$0xff]  }
 0x2b7   :  { %5381 = vmatpush1.bf16.msra.mxu0 %v8428_v18  ;;  %5914 = vmatpush1.bf16.msra.mxu1 %v8431_v25  ;;  %v8523_v18 = vld [vmem:[%s11268_s1 + $0x1788] ss:$16 sps:$4 sm:$0xff]   ;;  %v8528_v25 = vld [vmem:[%s11268_s1 + $0x17a4] ss:$16 sps:$4 sm:$0xff]  }
 0x2b8   :  { %5382 = vmatprep.subr.bf16.mxu0 %v8436_v26  ;;  %5915 = vmatprep.subr.bf16.mxu1 %v8439_v27  ;;  %v8531_v26 = vld [vmem:[%s11268_s1 + $0x17ac] ss:$16 sps:$4 sm:$0xff]   ;;  %v8526_v27 = vld [vmem:[%s11268_s1 + $0x17a0] ss:$16 sps:$4 sm:$0xff]  }
 0x2bb   :  { %5383 = vmatpush1.bf16.msra.mxu0 %v8434_v28  ;;  %5916 = vmatpush1.bf16.msra.mxu1 %v8437_v29  ;;  %v8529_v28 = vld [vmem:[%s11268_s1 + $0x17a8] ss:$16 sps:$4 sm:$0xff]   ;;  %v8534_v29 = vld [vmem:[%s11268_s1 + $0x17c4] ss:$16 sps:$4 sm:$0xff]  }
 0x2bc   :  { %5384 = vmatprep.subr.bf16.mxu0 %v8442_v24  ;;  %5917 = vmatprep.subr.bf16.mxu1 %v8445_v31  ;;  %v8537_v24 = vld [vmem:[%s11268_s1 + $0x17cc] ss:$16 sps:$4 sm:$0xff]   ;;  %v8532_v31 = vld [vmem:[%s11268_s1 + $0x17c0] ss:$16 sps:$4 sm:$0xff]  }
 0x2bf   :  { %5385 = vmatpush1.bf16.msra.mxu0 %v8440_v32  ;;  %5918 = vmatpush1.bf16.msra.mxu1 %v8443_v21  ;;  %v8535_v32 = vld [vmem:[%s11268_s1 + $0x17c8] ss:$16 sps:$4 sm:$0xff]   ;;  %v8540_v21 = vld [vmem:[%s11268_s1 + $0x17e4] ss:$16 sps:$4 sm:$0xff]  }
 0x2c0   :  { %5395 = vmatprep.subr.bf16.mxu0 %v8450_v34  ;;  %5928 = vmatprep.subr.bf16.mxu1 %v8453_v35  ;;  %v8543_v34 = vld [vmem:[%s11268_s1 + $0x17ec] ss:$16 sps:$4 sm:$0xff]   ;;  %v8538_v35 = vld [vmem:[%s11268_s1 + $0x17e0] ss:$16 sps:$4 sm:$0xff]  }
 0x2c2   :  { %5387 = vmatmul.mubr.bf16.vlgmr.msra.gmra.mrb[0].mxu0 %v6387_v38  ;;  %5920 = vmatmul.mubr.bf16.vlgmr.msra.gmra.mrb[0].mxu1 %v6387_v38  ;;  %v8551_v38 = vld [vmem:[%s11268_s1 + $0x180c] ss:$16 sps:$4 sm:$0xff]  }
 0x2c3   :  { %5396 = vmatpush1.bf16.msra.mxu0 %v8448_v36  ;;  %5929 = vmatpush1.bf16.msra.mxu1 %v8451_v37  ;;  %v8541_v36 = vld [vmem:[%s11268_s1 + $0x17e8] ss:$16 sps:$4 sm:$0xff]   ;;  %v8548_v37 = vld [vmem:[%s11268_s1 + $0x1804] ss:$16 sps:$4 sm:$0xff]  }
 0x2c4   :  { %5397 = vmatprep.subr.bf16.mxu0 %v8456_v39  ;;  %5930 = vmatprep.subr.bf16.mxu1 %v8459_v40  ;;  %v6389_v39 = vcombine.low %v10870_v30, %v10870_v30  ;;  %v8546_v40 = vld [vmem:[%s11268_s1 + $0x1800] ss:$16 sps:$4 sm:$0xff]   ;;  %v8557_v30 = vld [vmem:[%s11268_s1 + $0x182c] ss:$16 sps:$4 sm:$0xff]  }
 0x2c5   :  { %5427 = vmatprep.mubr.bf16.mxu0 %v6390_v41  ;;  %5960 = vmatprep.mubr.bf16.mxu1 %v6390_v41  ;;  %v8549_v41 = vld [vmem:[%s11268_s1 + $0x1808] ss:$16 sps:$4 sm:$0xff]  }
 0x2c7   :  { %5398 = vmatpush1.bf16.msra.mxu0 %v8454_v33  ;;  %5931 = vmatpush1.bf16.msra.mxu1 %v8457_v42  ;;  %v8554_v33 = vld [vmem:[%s11268_s1 + $0x1824] ss:$16 sps:$4 sm:$0xff]   ;;  %v8552_v42 = vld [vmem:[%s11268_s1 + $0x1820] ss:$16 sps:$4 sm:$0xff]  }
 0x2c8   :  { %5399 = vmatprep.subr.bf16.mxu0 %v8462_v43  ;;  %5932 = vmatprep.subr.bf16.mxu1 %v8465_v44  ;;  %v8555_v43 = vld [vmem:[%s11268_s1 + $0x1828] ss:$16 sps:$4 sm:$0xff]   ;;  %v8560_v44 = vld [vmem:[%s11268_s1 + $0x1844] ss:$16 sps:$4 sm:$0xff]  }
 0x2cb   :  { %5400 = vmatpush1.bf16.msra.mxu0 %v8460_v45  ;;  %5933 = vmatpush1.bf16.msra.mxu1 %v8463_v46  ;;  %v8563_v45 = vld [vmem:[%s11268_s1 + $0x184c] ss:$16 sps:$4 sm:$0xff]   ;;  %v8627_v46 = vmov 0  }
 0x2cc   :  { %5401 = vmatprep.subr.bf16.mxu0 %v8468_v47  ;;  %5934 = vmatprep.subr.bf16.mxu1 %v8471_v48  ;;  %v8558_v47 = vld [vmem:[%s11268_s1 + $0x1840] ss:$16 sps:$4 sm:$0xff]   ;;  %v8561_v48 = vld [vmem:[%s11268_s1 + $0x1848] ss:$16 sps:$4 sm:$0xff]  }
 0x2cf   :  { %5402 = vmatpush1.bf16.msra.mxu0 %v8466_v49  ;;  %5935 = vmatpush1.bf16.msra.mxu1 %v8469_v50  ;;  %v8566_v49 = vld [vmem:[%s11268_s1 + $0x1864] ss:$16 sps:$4 sm:$0xff]   ;;  %v8569_v50 = vld [vmem:[%s11268_s1 + $0x186c] ss:$16 sps:$4 sm:$0xff]  }
 0x2d0   :  { %5403 = vmatprep.subr.bf16.mxu0 %v8474_v51  ;;  %5936 = vmatprep.subr.bf16.mxu1 %v8477_v52  ;;  %v8564_v51 = vld [vmem:[%s11268_s1 + $0x1860] ss:$16 sps:$4 sm:$0xff]   ;;  %v8567_v52 = vld [vmem:[%s11268_s1 + $0x1868] ss:$16 sps:$4 sm:$0xff]  }
 0x2d3   :  { %5404 = vmatpush1.bf16.msra.mxu0 %v8472_v53  ;;  %5937 = vmatpush1.bf16.msra.mxu1 %v8475_v54  ;;  %v8572_v53 = vld [vmem:[%s11268_s1 + $0x1884] ss:$16 sps:$4 sm:$0xff]   ;;  %v8575_v54 = vld [vmem:[%s11268_s1 + $0x188c] ss:$16 sps:$4 sm:$0xff]  }
 0x2d4   :  { %5405 = vmatprep.subr.bf16.mxu0 %v8480_v55  ;;  %5938 = vmatprep.subr.bf16.mxu1 %v8483_v56  ;;  %v8570_v55 = vld [vmem:[%s11268_s1 + $0x1880] ss:$16 sps:$4 sm:$0xff]   ;;  %v8573_v56 = vld [vmem:[%s11268_s1 + $0x1888] ss:$16 sps:$4 sm:$0xff]  }
 0x2d7   :  { %5406 = vmatpush1.bf16.msra.mxu0 %v8478_v57  ;;  %5939 = vmatpush1.bf16.msra.mxu1 %v8481_v58  ;;  %v8578_v57 = vld [vmem:[%s11268_s1 + $0x18a4] ss:$16 sps:$4 sm:$0xff]   ;;  %v8581_v58 = vld [vmem:[%s11268_s1 + $0x18ac] ss:$16 sps:$4 sm:$0xff]  }
 0x2d8   :  { %5407 = vmatprep.subr.bf16.mxu0 %v8486_v59  ;;  %5940 = vmatprep.subr.bf16.mxu1 %v8489_v60  ;;  %v8576_v59 = vld [vmem:[%s11268_s1 + $0x18a0] ss:$16 sps:$4 sm:$0xff]   ;;  %v8579_v60 = vld [vmem:[%s11268_s1 + $0x18a8] ss:$16 sps:$4 sm:$0xff]  }
 0x2db   :  { %5408 = vmatpush1.bf16.msra.mxu0 %v8484_v61  ;;  %5941 = vmatpush1.bf16.msra.mxu1 %v8487_v62  ;;  %v8584_v61 = vld [vmem:[%s11268_s1 + $0x18c4] ss:$16 sps:$4 sm:$0xff]   ;;  %v8587_v62 = vld [vmem:[%s11268_s1 + $0x18cc] ss:$16 sps:$4 sm:$0xff]  }
 0x2dc   :  { %5409 = vmatprep.subr.bf16.mxu0 %v8492_v63  ;;  %5942 = vmatprep.subr.bf16.mxu1 %v8495_v0  ;;  %v8582_v63 = vld [vmem:[%s11268_s1 + $0x18c0] ss:$16 sps:$4 sm:$0xff]   ;;  %v8585_v0 = vld [vmem:[%s11268_s1 + $0x18c8] ss:$16 sps:$4 sm:$0xff]  }
 0x2df   :  { %5410 = vmatpush1.bf16.msra.mxu0 %v8490_v1  ;;  %5943 = vmatpush1.bf16.msra.mxu1 %v8493_v2  ;;  %v8590_v1 = vld [vmem:[%s11268_s1 + $0x18e4] ss:$16 sps:$4 sm:$0xff]   ;;  %v8593_v2 = vld [vmem:[%s11268_s1 + $0x18ec] ss:$16 sps:$4 sm:$0xff]  }
 0x2e0   :  { %5411 = vmatprep.subr.bf16.mxu0 %v8498_v3  ;;  %5944 = vmatprep.subr.bf16.mxu1 %v8501_v4  ;;  %v8588_v3 = vld [vmem:[%s11268_s1 + $0x18e0] ss:$16 sps:$4 sm:$0xff]   ;;  %v8591_v4 = vld [vmem:[%s11268_s1 + $0x18e8] ss:$16 sps:$4 sm:$0xff]  }
 0x2e3   :  { %5412 = vmatpush1.bf16.msra.mxu0 %v8496_v5  ;;  %5945 = vmatpush1.bf16.msra.mxu1 %v8499_v6  ;;  %v8595_v5 = vld [vmem:[%s11270_s3 + $0x40] sm:$0xff]  }
 0x2e4   :  { %5413 = vmatprep.subr.bf16.mxu0 %v8504_v7  ;;  %5946 = vmatprep.subr.bf16.mxu1 %v8507_v8  ;;  %v8596_v6 = vld [vmem:[%s11270_s3 + $0xc0] sm:$0xff]  }
 0x2e5   :  { %v8594_v7 = vld [vmem:[%s11269_s0 + $0x60] ss:$0 sps:$4 sm:$0xff]  }
 0x2e6   :  { %v8597_v8 = vld [vmem:[%s11270_s3] sm:$0xff]  }
 0x2e7   :  { %5414 = vmatpush1.bf16.msra.mxu0 %v8502_v9  ;;  %5947 = vmatpush1.bf16.msra.mxu1 %v8505_v10  ;;  %v8598_v9 = vld [vmem:[%s11270_s3 + $0x80] sm:$0xff]   ;;  %v8599_v10 = vld [vmem:[%s11270_s3 + $0x48] sm:$0xff]  }
 0x2e8   :  { %5415 = vmatprep.subr.bf16.mxu0 %v8510_v12  ;;  %5948 = vmatprep.subr.bf16.mxu1 %v8513_v13  ;;  %v8600_v12 = vld [vmem:[%s11270_s3 + $0xc8] sm:$0xff]  }
 0x2e9   :  { %v8601_v13 = vld [vmem:[%s11270_s3 + $0x8] sm:$0xff]  }
 0x2eb   :  { %5416 = vmatpush1.bf16.msra.mxu0 %v8508_v15  ;;  %5949 = vmatpush1.bf16.msra.mxu1 %v8511_v11  ;;  %v8602_v15 = vld [vmem:[%s11270_s3 + $0x88] sm:$0xff]   ;;  %v8603_v11 = vld [vmem:[%s11270_s3 + $0x50] sm:$0xff]  }
 0x2ec   :  { %5417 = vmatprep.subr.bf16.mxu0 %v8516_v17  ;;  %5950 = vmatprep.subr.bf16.mxu1 %v8519_v14  ;;  %v8604_v17 = vld [vmem:[%s11270_s3 + $0xd0] sm:$0xff]  }
 0x2ed   :  { %v8605_v14 = vld [vmem:[%s11270_s3 + $0x10] sm:$0xff]  }
 0x2ef   :  { %5418 = vmatpush1.bf16.msra.mxu0 %v8514_v19  ;;  %5951 = vmatpush1.bf16.msra.mxu1 %v8517_v20  ;;  %v8606_v19 = vld [vmem:[%s11270_s3 + $0x90] sm:$0xff]   ;;  %v8607_v20 = vld [vmem:[%s11270_s3 + $0x58] sm:$0xff]  }
 0x2f0   :  { %5419 = vmatprep.subr.bf16.mxu0 %v8522_v16  ;;  %5952 = vmatprep.subr.bf16.mxu1 %v8525_v22  ;;  %v8608_v16 = vld [vmem:[%s11270_s3 + $0xd8] sm:$0xff]  }
 0x2f1   :  { %v8609_v22 = vld [vmem:[%s11270_s3 + $0x18] sm:$0xff]  }
 0x2f3   :  { %5420 = vmatpush1.bf16.msra.mxu0 %v8520_v23  ;;  %5953 = vmatpush1.bf16.msra.mxu1 %v8523_v18  ;;  %v8610_v23 = vld [vmem:[%s11270_s3 + $0x98] sm:$0xff]   ;;  %v8611_v18 = vld [vmem:[%s11270_s3 + $0x60] sm:$0xff]  }
 0x2f4   :  { %5421 = vmatprep.subr.bf16.mxu0 %v8528_v25  ;;  %5954 = vmatprep.subr.bf16.mxu1 %v8531_v26  ;;  %v8612_v25 = vld [vmem:[%s11270_s3 + $0xe0] sm:$0xff]  }
 0x2f5   :  { %v8613_v26 = vld [vmem:[%s11270_s3 + $0x20] sm:$0xff]  }
 0x2f7   :  { %5422 = vmatpush1.bf16.msra.mxu0 %v8526_v27  ;;  %5955 = vmatpush1.bf16.msra.mxu1 %v8529_v28  ;;  %v8614_v27 = vld [vmem:[%s11270_s3 + $0xa0] sm:$0xff]   ;;  %v8615_v28 = vld [vmem:[%s11270_s3 + $0x68] sm:$0xff]  }
 0x2f8   :  { %5423 = vmatprep.subr.bf16.mxu0 %v8534_v29  ;;  %5956 = vmatprep.subr.bf16.mxu1 %v8537_v24  ;;  %v8616_v29 = vld [vmem:[%s11270_s3 + $0xe8] sm:$0xff]  }
 0x2f9   :  { %v8617_v24 = vld [vmem:[%s11270_s3 + $0x28] sm:$0xff]  }
 0x2fb   :  { %5424 = vmatpush1.bf16.msra.mxu0 %v8532_v31  ;;  %5957 = vmatpush1.bf16.msra.mxu1 %v8535_v32  ;;  %v8618_v31 = vld [vmem:[%s11270_s3 + $0xa8] sm:$0xff]   ;;  %v8619_v32 = vld [vmem:[%s11270_s3 + $0x70] sm:$0xff]  }
 0x2fc   :  { %5425 = vmatprep.subr.bf16.mxu0 %v8540_v21  ;;  %5958 = vmatprep.subr.bf16.mxu1 %v8543_v34  ;;  %v8620_v21 = vld [vmem:[%s11270_s3 + $0xf0] sm:$0xff]  }
 0x2fd   :  { %v8621_v34 = vld [vmem:[%s11270_s3 + $0x30] sm:$0xff]  }
 0x2ff   :  { %5426 = vmatpush1.bf16.msra.mxu0 %v8538_v35  ;;  %5959 = vmatpush1.bf16.msra.mxu1 %v8541_v36  ;;  %v8622_v35 = vld [vmem:[%s11270_s3 + $0xb0] sm:$0xff]   ;;  %v8623_v36 = vld [vmem:[%s11270_s3 + $0x78] sm:$0xff]  }
 0x300   :  { %5436 = vmatprep.subr.bf16.mxu0 %v8548_v37  ;;  %5969 = vmatprep.subr.bf16.mxu1 %v8551_v38  ;;  %v8624_v37 = vld [vmem:[%s11270_s3 + $0xf8] sm:$0xff]  }
 0x301   :  { %v8625_v38 = vld [vmem:[%s11270_s3 + $0x38] sm:$0xff]  }
 0x302   :  { %5428 = vmatmul.mubr.bf16.vlgmr.msra.gmra.mrb[0].mxu0 %v6389_v39  ;;  %5961 = vmatmul.mubr.bf16.vlgmr.msra.gmra.mrb[0].mxu1 %v6389_v39  ;;  %v8626_v39 = vld [vmem:[%s11270_s3 + $0xb8] sm:$0xff]  }
 0x303   :  { %5437 = vmatpush1.bf16.msra.mxu0 %v8546_v40  ;;  %5970 = vmatpush1.bf16.msra.mxu1 %v8549_v41  ;;  %v836_v40 = vlaneseq }
 0x304   :  { %5438 = vmatprep.subr.bf16.mxu0 %v8554_v33  ;;  %5971 = vmatprep.subr.bf16.mxu1 %v8557_v30 }
 0x305   :  { %5468 = vmatprep.mubr.bf16.mxu0 %v8627_v46  ;;  %6001 = vmatprep.mubr.bf16.mxu1 %v8627_v46  ;;  %v837_v41 = vshrl.u32 %v836_v40, 7 }
 0x307   :  { %5439 = vmatpush1.bf16.msra.mxu0 %v8552_v42  ;;  %5972 = vmatpush1.bf16.msra.mxu1 %v8555_v43  ;;  %v838_v33 = vsub.s32 0, %v837_v41  ;;  %v846_v30 = vsub.s32 2, %v837_v41  ;;  %v834_v42 = vld [vmem:[%s11271_s2] sm:$0xf]  ;;  %v842_v43 = vsub.s32 1, %v837_v41 }
 0x308   :  { %5440 = vmatprep.subr.bf16.mxu0 %v8560_v44  ;;  %5973 = vmatprep.subr.bf16.mxu1 %v8563_v45  ;;  %v850_v44 = vsub.s32 3, %v837_v41 }
 0x309   :  { %v839_v45 = vrot.slane %v834_v42, %v838_v33  ;;  %v847_v46 = vrot.slane %v834_v42, %v846_v30 }
 0x30b   :  { %5441 = vmatpush1.bf16.msra.mxu0 %v8558_v47  ;;  %5974 = vmatpush1.bf16.msra.mxu1 %v8561_v48  ;;  %v843_v47 = vrot.slane %v834_v42, %v842_v43  ;;  %v851_v48 = vrot.slane %v834_v42, %v850_v44 }
 0x30c   :  { %5442 = vmatprep.subr.bf16.mxu0 %v8566_v49  ;;  %5975 = vmatprep.subr.bf16.mxu1 %v8569_v50 }
 0x30f   :  { %5443 = vmatpush1.bf16.msra.mxu0 %v8564_v51  ;;  %5976 = vmatpush1.bf16.msra.mxu1 %v8567_v52 }
 0x310   :  { %5444 = vmatprep.subr.bf16.mxu0 %v8572_v53  ;;  %5977 = vmatprep.subr.bf16.mxu1 %v8575_v54 }
 0x313   :  { %5445 = vmatpush1.bf16.msra.mxu0 %v8570_v55  ;;  %5978 = vmatpush1.bf16.msra.mxu1 %v8573_v56 }
 0x314   :  { %5446 = vmatprep.subr.bf16.mxu0 %v8578_v57  ;;  %5979 = vmatprep.subr.bf16.mxu1 %v8581_v58 }
 0x317   :  { %5447 = vmatpush1.bf16.msra.mxu0 %v8576_v59  ;;  %5980 = vmatpush1.bf16.msra.mxu1 %v8579_v60 }
 0x318   :  { %5448 = vmatprep.subr.bf16.mxu0 %v8584_v61  ;;  %5981 = vmatprep.subr.bf16.mxu1 %v8587_v62 }
 0x31b   :  { %5449 = vmatpush1.bf16.msra.mxu0 %v8582_v63  ;;  %5982 = vmatpush1.bf16.msra.mxu1 %v8585_v0 }
 0x31c   :  { %5450 = vmatprep.subr.bf16.mxu0 %v8590_v1  ;;  %5983 = vmatprep.subr.bf16.mxu1 %v8593_v2 }
 0x31f   :  { %5451 = vmatpush1.bf16.msra.mxu0 %v8588_v3  ;;  %5984 = vmatpush1.bf16.msra.mxu1 %v8591_v4 }
 0x320   :  { %7225 = vmatprep.subr.bf16.mxu0 %v8595_v5  ;;  %7247 = vmatprep.subr.bf16.mxu1 %v8596_v6 }
 0x322   :  { %5469 = vmatmul.mubr.bf16.vlgmr.msra.gmra.mrb[0].mxu0 %v8594_v7  ;;  %6002 = vmatmul.mubr.bf16.vlgmr.msra.gmra.mrb[0].mxu1 %v8594_v7  ;;  %v7192_v7 = vld [vmem:[%s11272_s4] ss:$0 sm:$0xff] }
 0x323   :  { %7226 = vmatpush3.bf16.msra.mxu0 %v8597_v8  ;;  %7248 = vmatpush3.bf16.msra.mxu1 %v8598_v9 }
 0x324   :  { %7227 = vmatprep.subr.bf16.mxu0 %v8599_v10  ;;  %7249 = vmatprep.subr.bf16.mxu1 %v8600_v12 }
 0x327   :  { %7228 = vmatpush3.bf16.msra.mxu0 %v8601_v13  ;;  %7250 = vmatpush3.bf16.msra.mxu1 %v8602_v15 }
 0x328   :  { %7229 = vmatprep.subr.bf16.mxu0 %v8603_v11  ;;  %7251 = vmatprep.subr.bf16.mxu1 %v8604_v17 }
 0x32b   :  { %7230 = vmatpush3.bf16.msra.mxu0 %v8605_v14  ;;  %7252 = vmatpush3.bf16.msra.mxu1 %v8606_v19 }
 0x32c   :  { %7231 = vmatprep.subr.bf16.mxu0 %v8607_v20  ;;  %7253 = vmatprep.subr.bf16.mxu1 %v8608_v16 }
 0x32f   :  { %7232 = vmatpush3.bf16.msra.mxu0 %v8609_v22  ;;  %7254 = vmatpush3.bf16.msra.mxu1 %v8610_v23 }
 0x330   :  { %7233 = vmatprep.subr.bf16.mxu0 %v8611_v18  ;;  %7255 = vmatprep.subr.bf16.mxu1 %v8612_v25 }
 0x333   :  { %7234 = vmatpush3.bf16.msra.mxu0 %v8613_v26  ;;  %7256 = vmatpush3.bf16.msra.mxu1 %v8614_v27 }
 0x334   :  { %7235 = vmatprep.subr.bf16.mxu0 %v8615_v28  ;;  %7257 = vmatprep.subr.bf16.mxu1 %v8616_v29 }
 0x337   :  { %7236 = vmatpush3.bf16.msra.mxu0 %v8617_v24  ;;  %7258 = vmatpush3.bf16.msra.mxu1 %v8618_v31 }
 0x338   :  { %7237 = vmatprep.subr.bf16.mxu0 %v8619_v32  ;;  %7259 = vmatprep.subr.bf16.mxu1 %v8620_v21 }
 0x33b   :  { %7238 = vmatpush3.bf16.msra.mxu0 %v8621_v34  ;;  %7260 = vmatpush3.bf16.msra.mxu1 %v8622_v35 }
 0x33c   :  { %7239 = vmatprep.subr.bf16.mxu0 %v8623_v36  ;;  %7261 = vmatprep.subr.bf16.mxu1 %v8624_v37 }
 0x33f   :  { %7240 = vmatpush3.bf16.msra.mxu0 %v8625_v38  ;;  %7262 = vmatpush3.bf16.msra.mxu1 %v8626_v39 }
 0x3f5   :  { %v5470_v49 = vpop.f32.mrb[0].mxu0  ;;  %v6003_v50 = vpop.f32.mrb[0].mxu1 }
 0x3f6   :  { %v7269_v51 = vadd.f32 %v5470_v49, %v839_v45  ;;  %v7271_v52 = vadd.f32 %v6003_v50, %v847_v46  ;;  %v5472_v53 = vpop.f32.mrb[1].mxu0  ;;  %v6005_v54 = vpop.f32.mrb[1].mxu1 }
 0x3f7   :  { %v7270_v55 = vadd.f32 %v5472_v53, %v843_v47  ;;  %v7272_v56 = vadd.f32 %v6005_v54, %v851_v48  ;;  %v5474_v57 = vpop.f32.mrb[2].mxu0  ;;  %v6007_v58 = vpop.f32.mrb[2].mxu1 }
 0x3f8   :  { %v6010_v59 = vmax.f32 %v7269_v51, 0.0  ;;  %v6012_v60 = vmax.f32 %v7271_v52, 0.0  ;;  %v5475_v61 = vpop.f32.mrb[3].mxu0  ;;  %v6008_v62 = vpop.f32.mrb[3].mxu1 }
 0x3f9   :  { %v6011_v63 = vmax.f32 %v7270_v55, 0.0  ;;  %v6013_v0 = vmax.f32 %v7272_v56, 0.0 }
 0x3fa   :  { %v6014_v3 = vpack.c.bf16 %v6010_v59, %v6010_v59  ;;  %v6016_v4 = vpack.c.bf16 %v6012_v60, %v6012_v60 }
 0x3fb   :  { %v6015_v1 = vpack.c.bf16 %v6011_v63, %v6011_v63  ;;  %v6017_v2 = vpack.c.bf16 %v6013_v0, %v6013_v0 }
 0x3fd   :  { %6313 = vmatprep.mubr.bf16.mxu0 %v6015_v1  ;;  %6353 = vmatprep.mubr.bf16.mxu1 %v6017_v2 }
 0x3fe   :  { %6314 = vmatmul.mubr.bf16.vlgmr.msra.gmra.mrb[4].mxu0 %v6014_v3  ;;  %6354 = vmatmul.mubr.bf16.vlgmr.msra.gmra.mrb[4].mxu1 %v6016_v4 }
 0x4d1   :  { %v7241_v5 = vpop.f32.mrb[4].mxu0  ;;  %v7263_v6 = vpop.f32.mrb[4].mxu1 }
 0x4d2   :  { %v7242_v8 = vpop.f32.mrb[5].mxu0  ;;  %v7264_v9 = vpop.f32.mrb[5].mxu1 }
 0x4d3   :  { %v7243_v10 = vadd.f32 %v7242_v8, %v7241_v5  ;;  %v7265_v12 = vadd.f32 %v7264_v9, %v7263_v6  ;;  %v7244_v13 = vpop.f32.mrb[6].mxu0  ;;  %v7266_v15 = vpop.f32.mrb[6].mxu1 }
 0x4d4   :  { %v7245_v11 = vpop.f32.mrb[7].mxu0  ;;  %v7267_v17 = vpop.f32.mrb[7].mxu1 }
 0x4d5   :  { %v6316_v14 = vadd.f32 %v7243_v10, %v7192_v7 }
 0x4d7   :  { %v6356_v19 = vadd.f32 %v7265_v12, %v6316_v14 }
 0x4d9   :  { %6362 = vst.msk [vmem:[%s11273_s5] sm:$0xff] %vm6361_vm0, %v6356_v19 }

</bundles_post_ra>
